<compile_context>
chip_gen: v7x
topology: tpu7x:2x2x1
jax: 0.10.0
libtpu: 0.0.40
codegen_flags: <defaults>
</compile_context>

<pallas_src>
import functools

import jax
import jax.numpy as jnp
from jax import lax
from jax.experimental import pallas as pl
from jax.experimental.pallas import tpu as pltpu

BN_EPS = 1e-5
COMPUTE_DTYPE = jnp.bfloat16          # MXU input dtype (f32 accumulation)
VMEM_LIMIT = 32 * 1024 * 1024         # conservative: fits v7x's 64 MiB VMEM


# ---------------------------------------------------------------------------
# Fused Conv2d(3x3, pad=1) + ReLU + BatchNorm(inference) [+ MaxPool2d(2, 2)].
# One image per grid step; the batch grid axis is "parallel".
# ---------------------------------------------------------------------------
def conv3x3_relu_bn_kernel(x_ref, w_ref, b_ref, scale_ref, shift_ref, o_ref,
                           xp_ref, col_ref, *pool_scratch, pool):
    # x_ref   : (1, H, W, Cin)     one image
    # w_ref   : (9*Cin, Cout)      3x3 weights, im2col order (tap-major), bf16
    # b/scale/shift_ref : (1, Cout) f32
    # o_ref   : (1, Ho, Wo, Cout)  Ho,Wo = H,W (no pool) or H/2,W/2 (fused pool)
    # xp_ref  : (H+2, W+2, Cin)    VMEM scratch: zero-padded image (in-kernel halo)
    # col_ref : (H*W, 9*Cin)       VMEM scratch: im2col patch matrix
    _, H, W, Cin = x_ref.shape
    Cout = o_ref.shape[-1]

    # In-kernel halo: zero the padded scratch, write the interior (no XLA pad).
    xp_ref[...] = jnp.zeros_like(xp_ref)
    xp_ref[1:H + 1, 1:W + 1, :] = x_ref[0]

    # im2col -> one MXU matmul with K = 9*Cin (instead of 9 small-K matmuls).
    for tap in range(9):
        dy, dx = tap // 3, tap % 3
        col_ref[:, tap * Cin:(tap + 1) * Cin] = (
            xp_ref[dy:dy + H, dx:dx + W, :].reshape(H * W, Cin))

    acc = jnp.dot(col_ref[...].astype(w_ref.dtype), w_ref[...],
                  preferred_element_type=jnp.float32)

    # f32 epilogue: conv bias -> ReLU -> folded BatchNorm affine.
    acc = acc + b_ref[...]
    acc = jnp.maximum(acc, 0.0)
    acc = acc * scale_ref[...] + shift_ref[...]
    y = acc.reshape(H, W, Cout)

    if pool:
        # Fused MaxPool2d(2, 2) via stride-2 window reads from VMEM scratch.
        y_ref, h_ref = pool_scratch
        Ho, Wo = H // 2, W // 2
        y_ref[...] = y
        # pool along W (sublane-strided loads)
        h_ref[...] = jnp.maximum(y_ref[:, pl.ds(0, Wo, 2), :],
                                 y_ref[:, pl.ds(1, Wo, 2), :])
        # pool along H (major-dim strided loads)
        out = jnp.maximum(h_ref[pl.ds(0, Ho, 2), :, :],
                          h_ref[pl.ds(1, Ho, 2), :, :])
        o_ref[...] = out[None].astype(o_ref.dtype)
    else:
        o_ref[...] = y[None].astype(o_ref.dtype)


def conv3x3_relu_bn(x, w9, b, scale, shift, *, pool):
    # x: (N, H, W, Cin) NHWC f32 ; w9: (9*Cin, Cout) bf16 im2col layout.
    N, H, W, Cin = x.shape
    Cout = w9.shape[-1]
    Ho, Wo = (H // 2, W // 2) if pool else (H, W)

    scratch = [pltpu.VMEM((H + 2, W + 2, Cin), jnp.float32),
               pltpu.VMEM((H * W, 9 * Cin), jnp.float32)]
    if pool:
        scratch += [pltpu.VMEM((H, W, Cout), jnp.float32),
                    pltpu.VMEM((H, Wo, Cout), jnp.float32)]

    grid_spec = pltpu.PrefetchScalarGridSpec(
        num_scalar_prefetch=0,
        grid=(N,),
        in_specs=[
            pl.BlockSpec((1, H, W, Cin), lambda n: (n, 0, 0, 0)),
            pl.BlockSpec((9 * Cin, Cout), lambda n: (0, 0)),
            pl.BlockSpec((1, Cout), lambda n: (0, 0)),
            pl.BlockSpec((1, Cout), lambda n: (0, 0)),
            pl.BlockSpec((1, Cout), lambda n: (0, 0)),
        ],
        out_specs=pl.BlockSpec((1, Ho, Wo, Cout), lambda n: (n, 0, 0, 0)),
        scratch_shapes=scratch,
    )
    return pl.pallas_call(
        functools.partial(conv3x3_relu_bn_kernel, pool=pool),
        out_shape=jax.ShapeDtypeStruct((N, Ho, Wo, Cout), x.dtype),
        grid_spec=grid_spec,
        compiler_params=pltpu.CompilerParams(
            dimension_semantics=("parallel",),
            vmem_limit_bytes=VMEM_LIMIT),
    )(x, w9, b.reshape(1, Cout), scale.reshape(1, Cout), shift.reshape(1, Cout))


# ---------------------------------------------------------------------------
# Linear (+ optional fused ReLU): K-tiled accumulator matmul.
# Grid = (N-tiles, K-tiles) with K last and "arbitrary"; f32 VMEM accumulator.
# ---------------------------------------------------------------------------
def linear_kernel(x_ref, w_ref, b_ref, o_ref, acc_ref, *, relu):
    k = pl.program_id(1)

    @pl.when(k == 0)
    def _():
        acc_ref[...] = jnp.zeros_like(acc_ref)

    acc_ref[...] += jnp.dot(x_ref[...].astype(w_ref.dtype), w_ref[...],
                            preferred_element_type=jnp.float32)

    @pl.when(k == pl.num_programs(1) - 1)
    def _():
        y = acc_ref[...] + b_ref[...]
        if relu:
            y = jnp.maximum(y, 0.0)
        o_ref[...] = y.astype(o_ref.dtype)


def _pick_tile(dim, target):
    # Largest tile <= target that divides dim and is a multiple of 128,
    # otherwise the full dim (full-extent blocks are always legal).
    if dim % 128 == 0:
        t = min(target, dim)
        while (dim % t) or (t % 128):
            t -= 128
        return t
    return dim


def linear(x, w, b, *, relu=False, tn=512, tk=256):
    M, K = x.shape
    N = w.shape[1]
    tn = _pick_tile(N, tn)
    tk = _pick_tile(K, tk)

    grid_spec = pltpu.PrefetchScalarGridSpec(
        num_scalar_prefetch=0,
        grid=(N // tn, K // tk),              # reduction axis (K) last
        in_specs=[
            pl.BlockSpec((M, tk), lambda n, k: (0, k)),
            pl.BlockSpec((tk, tn), lambda n, k: (k, n)),
            pl.BlockSpec((1, tn), lambda n, k: (0, n)),
        ],
        out_specs=pl.BlockSpec((M, tn), lambda n, k: (0, n)),
        scratch_shapes=[pltpu.VMEM((M, tn), jnp.float32)],
    )
    return pl.pallas_call(
        functools.partial(linear_kernel, relu=relu),
        out_shape=jax.ShapeDtypeStruct((M, N), x.dtype),
        grid_spec=grid_spec,
        compiler_params=pltpu.CompilerParams(
            dimension_semantics=("parallel", "arbitrary"),
            vmem_limit_bytes=VMEM_LIMIT),
    )(x, w, b.reshape(1, N))


# ---------------------------------------------------------------------------
# Parameter init (deterministic, synthetic) and forward pass.
# ---------------------------------------------------------------------------
def init_vgg_params(key, num_convs, channels, in_hw, out_dim=16):
    params = {"blocks": []}
    for n, (in_c, out_c) in zip(num_convs, channels):
        convs = []
        c_in = in_c
        for _ in range(n):
            key, k1, k2, k3, k4, k5, k6 = jax.random.split(key, 7)
            w = 0.1 * jax.random.normal(k1, (3, 3, c_in, out_c), jnp.float32)
            b = 0.1 * jax.random.normal(k2, (out_c,), jnp.float32)
            gamma = 1.0 + 0.1 * jax.random.normal(k3, (out_c,), jnp.float32)
            beta = 0.1 * jax.random.normal(k4, (out_c,), jnp.float32)
            rmean = 0.1 * jax.random.normal(k5, (out_c,), jnp.float32)
            rvar = 0.5 + jnp.abs(jax.random.normal(k6, (out_c,), jnp.float32))
            scale = gamma / jnp.sqrt(rvar + BN_EPS)
            shift = beta - rmean * scale
            # im2col weight layout (tap-major, cin-minor), stored bf16.
            w9 = w.reshape(9 * c_in, out_c).astype(COMPUTE_DTYPE)
            convs.append((w9, b, scale, shift))
            c_in = out_c
        params["blocks"].append(convs)

    c_last = channels[-1][1]
    hf = in_hw[0] // (2 ** len(num_convs))
    wf = in_hw[1] // (2 ** len(num_convs))
    feat = c_last * hf * wf
    assert feat == out_dim * c_last

    key, k1, k2, k3, k4 = jax.random.split(key, 5)
    # fc1 weight is generated in PyTorch's NCHW-flatten row order, then its
    # rows are permuted ONCE so the FC consumes NHWC-flattened features
    # directly (removes a per-forward transpose; bit-exact equivalent).
    fc1_w_nchw = 0.02 * jax.random.normal(k1, (feat, 1024), jnp.float32)
    c_idx = jnp.arange(c_last)
    h_idx = jnp.arange(hf)
    w_idx = jnp.arange(wf)
    perm = (c_idx[None, None, :] * (hf * wf)
            + h_idx[:, None, None] * wf
            + w_idx[None, :, None]).reshape(-1)
    params["fc1_w"] = fc1_w_nchw[perm].astype(COMPUTE_DTYPE)
    params["fc1_b"] = 0.02 * jax.random.normal(k2, (1024,), jnp.float32)
    params["fc2_w"] = (0.02 * jax.random.normal(k3, (1024, 10), jnp.float32)
                       ).astype(COMPUTE_DTYPE)
    params["fc2_b"] = 0.02 * jax.random.normal(k4, (10,), jnp.float32)
    return params


def vgg_forward(params, x_nchw):
    # x_nchw: (N, C, H, W) as in the PyTorch module.
    x = jnp.transpose(x_nchw, (0, 2, 3, 1))  # NCHW -> NHWC, once on entry
    for block in params["blocks"]:
        n_convs = len(block)
        for i, (w9, b, scale, shift) in enumerate(block):
            x = conv3x3_relu_bn(x, w9, b, scale, shift,
                                pool=(i == n_convs - 1))
    n = x.shape[0]
    x = x.reshape(n, -1)                     # NHWC flatten (fc1 rows pre-permuted)
    x = linear(x, params["fc1_w"], params["fc1_b"], relu=True)
    # Dropout(0.5): eval-mode identity.
    x = linear(x, params["fc2_w"], params["fc2_b"], relu=False)
    return x


# ---------------------------------------------------------------------------
# Pure-JAX reference with matching precision (bf16 matmul inputs, f32
# accumulation / epilogue) used for the correctness check.
# ---------------------------------------------------------------------------
def vgg_reference(params, x_nchw):
    x = jnp.transpose(x_nchw, (0, 2, 3, 1))
    for block in params["blocks"]:
        n_convs = len(block)
        for i, (w9, b, scale, shift) in enumerate(block):
            cin, cout = w9.shape[0] // 9, w9.shape[1]
            w = w9.reshape(3, 3, cin, cout)
            y = lax.conv_general_dilated(
                x.astype(COMPUTE_DTYPE), w, window_strides=(1, 1),
                padding=((1, 1), (1, 1)),
                dimension_numbers=("NHWC", "HWIO", "NHWC"),
                preferred_element_type=jnp.float32)
            y = jnp.maximum(y + b[None, None, None, :], 0.0)
            x = y * scale[None, None, None, :] + shift[None, None, None, :]
            if i == n_convs - 1:
                x = lax.reduce_window(x, -jnp.inf, lax.max,
                                      (1, 2, 2, 1), (1, 2, 2, 1), "VALID")
    n = x.shape[0]
    x = x.reshape(n, -1)
    x = jnp.dot(x.astype(COMPUTE_DTYPE), params["fc1_w"],
                preferred_element_type=jnp.float32) + params["fc1_b"]
    x = jnp.maximum(x, 0.0)
    x = jnp.dot(x.astype(COMPUTE_DTYPE), params["fc2_w"],
                preferred_element_type=jnp.float32) + params["fc2_b"]
    return x


if __name__ == "__main__":
    # Small VGG config: two blocks, 16x16 input -> 4x4 after two 2x2 pools,
    # so fc_in = 4*4*16 = 256 (out_dim = 16, the module default).
    num_convs = (1, 2)
    channels = ((4, 8), (8, 16))
    H_in = W_in = 16
    out_dim = (H_in // 2 ** len(num_convs)) * (W_in // 2 ** len(num_convs))

    key = jax.random.PRNGKey(0)
    kp, kx = jax.random.split(key)
    params = init_vgg_params(kp, num_convs, channels, (H_in, W_in), out_dim)
    x = jax.random.normal(kx, (2, 4, H_in, W_in), jnp.float32)  # NCHW

    out = jax.jit(vgg_forward)(params, x)
    out = jax.block_until_ready(out)
    assert out.shape == (2, 10) and out.dtype == jnp.float32

    ref = vgg_reference(params, x)
    assert jnp.allclose(out, ref, rtol=2e-2, atol=2e-2), float(
        jnp.max(jnp.abs(out - ref)))

    print("KERNEL_OK")
</pallas_src>

<mosaic_0001>
module attributes {stable_mosaic.version = 11 : i64} {
  func.func @conv3x3_relu_bn_kernel(%arg0: i32, %arg1: memref<1x16x16x4xf32, #tpu.memory_space<vmem>>, %arg2: memref<36x8xbf16, #tpu.memory_space<vmem>>, %arg3: memref<1x8xf32, #tpu.memory_space<vmem>>, %arg4: memref<1x8xf32, #tpu.memory_space<vmem>>, %arg5: memref<1x8xf32, #tpu.memory_space<vmem>>, %arg6: memref<1x8x8x8xf32, #tpu.memory_space<vmem>>, %arg7: memref<18x18x4xf32, #tpu.memory_space<vmem>>, %arg8: memref<256x36xf32, #tpu.memory_space<vmem>>, %arg9: memref<16x16x8xf32, #tpu.memory_space<vmem>>, %arg10: memref<16x8x8xf32, #tpu.memory_space<vmem>>) attributes {dimension_semantics = [#tpu.dimension_semantics<parallel>], iteration_bounds = array<i64: 2>, scalar_prefetch = 0 : i64, scratch_operands = 4 : i64, tpu.core_type = #tpu.core_type<tc>, window_params = [{transform_indices = @transform_0, window_bounds = array<i64: 1, 16, 16, 4>}, {pipeline_mode = #tpu.pipeline_mode<synchronous>, transform_indices = @transform_1, window_bounds = array<i64: 36, 8>}, {pipeline_mode = #tpu.pipeline_mode<synchronous>, transform_indices = @transform_2, window_bounds = array<i64: 1, 8>}, {pipeline_mode = #tpu.pipeline_mode<synchronous>, transform_indices = @transform_3, window_bounds = array<i64: 1, 8>}, {pipeline_mode = #tpu.pipeline_mode<synchronous>, transform_indices = @transform_4, window_bounds = array<i64: 1, 8>}, {transform_indices = @transform_5, window_bounds = array<i64: 1, 8, 8, 8>}]} {
    %cst = arith.constant 0.000000e+00 : f32
    %0 = vector.broadcast %cst : f32 to vector<18x18x4xf32>
    %c0 = arith.constant 0 : index
    %c0_0 = arith.constant 0 : index
    %c0_1 = arith.constant 0 : index
    %1 = vector.load %arg7[%c0, %c0_0, %c0_1] : memref<18x18x4xf32, #tpu.memory_space<vmem>>, vector<18x18x4xf32>
    tpu.vector_store %arg7[%c0, %c0_0, %c0_1], %0 {strides = array<i32>} : memref<18x18x4xf32, #tpu.memory_space<vmem>>, vector<18x18x4xf32>,
    %c0_2 = arith.constant 0 : index
    %c0_3 = arith.constant 0 : index
    %c0_4 = arith.constant 0 : index
    %c0_5 = arith.constant 0 : index
    %2 = vector.load %arg1[%c0_2, %c0_3, %c0_4, %c0_5] : memref<1x16x16x4xf32, #tpu.memory_space<vmem>>, vector<1x16x16x4xf32>
    %3 = vector.shape_cast %2 : vector<1x16x16x4xf32> to vector<16x16x4xf32>
    %c1 = arith.constant 1 : index
    %c1_6 = arith.constant 1 : index
    %c0_7 = arith.constant 0 : index
    %4 = vector.load %arg7[%c1, %c1_6, %c0_7] : memref<18x18x4xf32, #tpu.memory_space<vmem>>, vector<16x16x4xf32>
    tpu.vector_store %arg7[%c1, %c1_6, %c0_7], %3 {strides = array<i32>} : memref<18x18x4xf32, #tpu.memory_space<vmem>>, vector<16x16x4xf32>,
    %c0_8 = arith.constant 0 : index
    %c0_9 = arith.constant 0 : index
    %c0_10 = arith.constant 0 : index
    %5 = vector.load %arg7[%c0_8, %c0_9, %c0_10] : memref<18x18x4xf32, #tpu.memory_space<vmem>>, vector<16x16x4xf32>
    %6 = vector.shape_cast %5 : vector<16x16x4xf32> to vector<256x4xf32>
    %c0_11 = arith.constant 0 : index
    %c0_12 = arith.constant 0 : index
    %7 = vector.load %arg8[%c0_11, %c0_12] : memref<256x36xf32, #tpu.memory_space<vmem>>, vector<256x4xf32>
    tpu.vector_store %arg8[%c0_11, %c0_12], %6 {strides = array<i32>} : memref<256x36xf32, #tpu.memory_space<vmem>>, vector<256x4xf32>,
    %c0_13 = arith.constant 0 : index
    %c1_14 = arith.constant 1 : index
    %c0_15 = arith.constant 0 : index
    %8 = vector.load %arg7[%c0_13, %c1_14, %c0_15] : memref<18x18x4xf32, #tpu.memory_space<vmem>>, vector<16x16x4xf32>
    %9 = vector.shape_cast %8 : vector<16x16x4xf32> to vector<256x4xf32>
    %c0_16 = arith.constant 0 : index
    %c4 = arith.constant 4 : index
    %10 = vector.load %arg8[%c0_16, %c4] : memref<256x36xf32, #tpu.memory_space<vmem>>, vector<256x4xf32>
    tpu.vector_store %arg8[%c0_16, %c4], %9 {strides = array<i32>} : memref<256x36xf32, #tpu.memory_space<vmem>>, vector<256x4xf32>,
    %c0_17 = arith.constant 0 : index
    %c2 = arith.constant 2 : index
    %c0_18 = arith.constant 0 : index
    %11 = vector.load %arg7[%c0_17, %c2, %c0_18] : memref<18x18x4xf32, #tpu.memory_space<vmem>>, vector<16x16x4xf32>
    %12 = vector.shape_cast %11 : vector<16x16x4xf32> to vector<256x4xf32>
    %c0_19 = arith.constant 0 : index
    %c8 = arith.constant 8 : index
    %13 = vector.load %arg8[%c0_19, %c8] : memref<256x36xf32, #tpu.memory_space<vmem>>, vector<256x4xf32>
    tpu.vector_store %arg8[%c0_19, %c8], %12 {strides = array<i32>} : memref<256x36xf32, #tpu.memory_space<vmem>>, vector<256x4xf32>,
    %c1_20 = arith.constant 1 : index
    %c0_21 = arith.constant 0 : index
    %c0_22 = arith.constant 0 : index
    %14 = vector.load %arg7[%c1_20, %c0_21, %c0_22] : memref<18x18x4xf32, #tpu.memory_space<vmem>>, vector<16x16x4xf32>
    %15 = vector.shape_cast %14 : vector<16x16x4xf32> to vector<256x4xf32>
    %c0_23 = arith.constant 0 : index
    %c12 = arith.constant 12 : index
    %16 = vector.load %arg8[%c0_23, %c12] : memref<256x36xf32, #tpu.memory_space<vmem>>, vector<256x4xf32>
    tpu.vector_store %arg8[%c0_23, %c12], %15 {strides = array<i32>} : memref<256x36xf32, #tpu.memory_space<vmem>>, vector<256x4xf32>,
    %c1_24 = arith.constant 1 : index
    %c1_25 = arith.constant 1 : index
    %c0_26 = arith.constant 0 : index
    %17 = vector.load %arg7[%c1_24, %c1_25, %c0_26] : memref<18x18x4xf32, #tpu.memory_space<vmem>>, vector<16x16x4xf32>
    %18 = vector.shape_cast %17 : vector<16x16x4xf32> to vector<256x4xf32>
    %c0_27 = arith.constant 0 : index
    %c16 = arith.constant 16 : index
    %19 = vector.load %arg8[%c0_27, %c16] : memref<256x36xf32, #tpu.memory_space<vmem>>, vector<256x4xf32>
    tpu.vector_store %arg8[%c0_27, %c16], %18 {strides = array<i32>} : memref<256x36xf32, #tpu.memory_space<vmem>>, vector<256x4xf32>,
    %c1_28 = arith.constant 1 : index
    %c2_29 = arith.constant 2 : index
    %c0_30 = arith.constant 0 : index
    %20 = vector.load %arg7[%c1_28, %c2_29, %c0_30] : memref<18x18x4xf32, #tpu.memory_space<vmem>>, vector<16x16x4xf32>
    %21 = vector.shape_cast %20 : vector<16x16x4xf32> to vector<256x4xf32>
    %c0_31 = arith.constant 0 : index
    %c20 = arith.constant 20 : index
    %22 = vector.load %arg8[%c0_31, %c20] : memref<256x36xf32, #tpu.memory_space<vmem>>, vector<256x4xf32>
    tpu.vector_store %arg8[%c0_31, %c20], %21 {strides = array<i32>} : memref<256x36xf32, #tpu.memory_space<vmem>>, vector<256x4xf32>,
    %c2_32 = arith.constant 2 : index
    %c0_33 = arith.constant 0 : index
    %c0_34 = arith.constant 0 : index
    %23 = vector.load %arg7[%c2_32, %c0_33, %c0_34] : memref<18x18x4xf32, #tpu.memory_space<vmem>>, vector<16x16x4xf32>
    %24 = vector.shape_cast %23 : vector<16x16x4xf32> to vector<256x4xf32>
    %c0_35 = arith.constant 0 : index
    %c24 = arith.constant 24 : index
    %25 = vector.load %arg8[%c0_35, %c24] : memref<256x36xf32, #tpu.memory_space<vmem>>, vector<256x4xf32>
    tpu.vector_store %arg8[%c0_35, %c24], %24 {strides = array<i32>} : memref<256x36xf32, #tpu.memory_space<vmem>>, vector<256x4xf32>,
    %c2_36 = arith.constant 2 : index
    %c1_37 = arith.constant 1 : index
    %c0_38 = arith.constant 0 : index
    %26 = vector.load %arg7[%c2_36, %c1_37, %c0_38] : memref<18x18x4xf32, #tpu.memory_space<vmem>>, vector<16x16x4xf32>
    %27 = vector.shape_cast %26 : vector<16x16x4xf32> to vector<256x4xf32>
    %c0_39 = arith.constant 0 : index
    %c28 = arith.constant 28 : index
    %28 = vector.load %arg8[%c0_39, %c28] : memref<256x36xf32, #tpu.memory_space<vmem>>, vector<256x4xf32>
    tpu.vector_store %arg8[%c0_39, %c28], %27 {strides = array<i32>} : memref<256x36xf32, #tpu.memory_space<vmem>>, vector<256x4xf32>,
    %c2_40 = arith.constant 2 : index
    %c2_41 = arith.constant 2 : index
    %c0_42 = arith.constant 0 : index
    %29 = vector.load %arg7[%c2_40, %c2_41, %c0_42] : memref<18x18x4xf32, #tpu.memory_space<vmem>>, vector<16x16x4xf32>
    %30 = vector.shape_cast %29 : vector<16x16x4xf32> to vector<256x4xf32>
    %c0_43 = arith.constant 0 : index
    %c32 = arith.constant 32 : index
    %31 = vector.load %arg8[%c0_43, %c32] : memref<256x36xf32, #tpu.memory_space<vmem>>, vector<256x4xf32>
    tpu.vector_store %arg8[%c0_43, %c32], %30 {strides = array<i32>} : memref<256x36xf32, #tpu.memory_space<vmem>>, vector<256x4xf32>,
    %c0_44 = arith.constant 0 : index
    %c0_45 = arith.constant 0 : index
    %32 = vector.load %arg8[%c0_44, %c0_45] : memref<256x36xf32, #tpu.memory_space<vmem>>, vector<256x36xf32>
    %33 = arith.truncf %32 : vector<256x36xf32> to vector<256x36xbf16>
    %c0_46 = arith.constant 0 : index
    %c0_47 = arith.constant 0 : index
    %34 = vector.load %arg2[%c0_46, %c0_47] : memref<36x8xbf16, #tpu.memory_space<vmem>>, vector<36x8xbf16>
    %cst_48 = arith.constant dense<0.000000e+00> : vector<256x8xf32>
    %35 = tpu.matmul %33, %34, %cst_48 {dimension_numbers = #tpu.dot_dimension_numbers<[1], [0], [0], [1], [0, 0, 1, 1], [], []>} : vector<256x36xbf16>, vector<36x8xbf16>, vector<256x8xf32> -> vector<256x8xf32>
    %c0_49 = arith.constant 0 : index
    %c0_50 = arith.constant 0 : index
    %36 = vector.load %arg3[%c0_49, %c0_50] : memref<1x8xf32, #tpu.memory_space<vmem>>, vector<1x8xf32>
    %37 = vector.broadcast %36 : vector<1x8xf32> to vector<256x8xf32>
    %38 = arith.addf %35, %37 : vector<256x8xf32>
    %cst_51 = arith.constant 0.000000e+00 : f32
    %39 = vector.broadcast %cst_51 : f32 to vector<256x8xf32>
    %40 = arith.maximumf %38, %39 : vector<256x8xf32>
    %c0_52 = arith.constant 0 : index
    %c0_53 = arith.constant 0 : index
    %41 = vector.load %arg4[%c0_52, %c0_53] : memref<1x8xf32, #tpu.memory_space<vmem>>, vector<1x8xf32>
    %42 = vector.broadcast %41 : vector<1x8xf32> to vector<256x8xf32>
    %43 = arith.mulf %40, %42 : vector<256x8xf32>
    %c0_54 = arith.constant 0 : index
    %c0_55 = arith.constant 0 : index
    %44 = vector.load %arg5[%c0_54, %c0_55] : memref<1x8xf32, #tpu.memory_space<vmem>>, vector<1x8xf32>
    %45 = vector.broadcast %44 : vector<1x8xf32> to vector<256x8xf32>
    %46 = arith.addf %43, %45 : vector<256x8xf32>
    %47 = vector.shape_cast %46 : vector<256x8xf32> to vector<16x16x8xf32>
    %c0_56 = arith.constant 0 : index
    %c0_57 = arith.constant 0 : index
    %c0_58 = arith.constant 0 : index
    %48 = vector.load %arg9[%c0_56, %c0_57, %c0_58] : memref<16x16x8xf32, #tpu.memory_space<vmem>>, vector<16x16x8xf32>
    tpu.vector_store %arg9[%c0_56, %c0_57, %c0_58], %47 {strides = array<i32>} : memref<16x16x8xf32, #tpu.memory_space<vmem>>, vector<16x16x8xf32>,
    %c0_59 = arith.constant 0 : index
    %c0_60 = arith.constant 0 : index
    %c0_61 = arith.constant 0 : index
    %49 = tpu.strided_load %arg9[%c0_59, %c0_60, %c0_61] {strides = array<i32: 1, 2, 1>} : memref<16x16x8xf32, #tpu.memory_space<vmem>>, vector<16x8x8xf32>
    %c0_62 = arith.constant 0 : index
    %c1_63 = arith.constant 1 : index
    %c0_64 = arith.constant 0 : index
    %50 = tpu.strided_load %arg9[%c0_62, %c1_63, %c0_64] {strides = array<i32: 1, 2, 1>} : memref<16x16x8xf32, #tpu.memory_space<vmem>>, vector<16x8x8xf32>
    %51 = arith.maximumf %49, %50 : vector<16x8x8xf32>
    %c0_65 = arith.constant 0 : index
    %c0_66 = arith.constant 0 : index
    %c0_67 = arith.constant 0 : index
    %52 = vector.load %arg10[%c0_65, %c0_66, %c0_67] : memref<16x8x8xf32, #tpu.memory_space<vmem>>, vector<16x8x8xf32>
    tpu.vector_store %arg10[%c0_65, %c0_66, %c0_67], %51 {strides = array<i32>} : memref<16x8x8xf32, #tpu.memory_space<vmem>>, vector<16x8x8xf32>,
    %c0_68 = arith.constant 0 : index
    %c0_69 = arith.constant 0 : index
    %c0_70 = arith.constant 0 : index
    %53 = tpu.strided_load %arg10[%c0_68, %c0_69, %c0_70] {strides = array<i32: 2, 1, 1>} : memref<16x8x8xf32, #tpu.memory_space<vmem>>, vector<8x8x8xf32>
    %c1_71 = arith.constant 1 : index
    %c0_72 = arith.constant 0 : index
    %c0_73 = arith.constant 0 : index
    %54 = tpu.strided_load %arg10[%c1_71, %c0_72, %c0_73] {strides = array<i32: 2, 1, 1>} : memref<16x8x8xf32, #tpu.memory_space<vmem>>, vector<8x8x8xf32>
    %55 = arith.maximumf %53, %54 : vector<8x8x8xf32>
    %56 = vector.shape_cast %55 : vector<8x8x8xf32> to vector<1x8x8x8xf32>
    %c0_74 = arith.constant 0 : index
    %c0_75 = arith.constant 0 : index
    %c0_76 = arith.constant 0 : index
    %c0_77 = arith.constant 0 : index
    %57 = vector.load %arg6[%c0_74, %c0_75, %c0_76, %c0_77] : memref<1x8x8x8xf32, #tpu.memory_space<vmem>>, vector<1x8x8x8xf32>
    tpu.vector_store %arg6[%c0_74, %c0_75, %c0_76, %c0_77], %56 {strides = array<i32>} : memref<1x8x8x8xf32, #tpu.memory_space<vmem>>, vector<1x8x8x8xf32>,
    return
  }
  func.func @transform_0(%arg0: i32) -> (i32, i32, i32, i32) {
    %c0_i32 = arith.constant 0 : i32
    %c0_i32_0 = arith.constant 0 : i32
    %c0_i32_1 = arith.constant 0 : i32
    %c0_i32_2 = arith.constant 0 : i32
    return %arg0, %c0_i32, %c0_i32_0, %c0_i32_1 : i32, i32, i32, i32
  }
  func.func @transform_1(%arg0: i32) -> (i32, i32) {
    %c0_i32 = arith.constant 0 : i32
    %c0_i32_0 = arith.constant 0 : i32
    %c0_i32_1 = arith.constant 0 : i32
    return %c0_i32, %c0_i32_0 : i32, i32
  }
  func.func @transform_2(%arg0: i32) -> (i32, i32) {
    %c0_i32 = arith.constant 0 : i32
    %c0_i32_0 = arith.constant 0 : i32
    %c0_i32_1 = arith.constant 0 : i32
    return %c0_i32, %c0_i32_0 : i32, i32
  }
  func.func @transform_3(%arg0: i32) -> (i32, i32) {
    %c0_i32 = arith.constant 0 : i32
    %c0_i32_0 = arith.constant 0 : i32
    %c0_i32_1 = arith.constant 0 : i32
    return %c0_i32, %c0_i32_0 : i32, i32
  }
  func.func @transform_4(%arg0: i32) -> (i32, i32) {
    %c0_i32 = arith.constant 0 : i32
    %c0_i32_0 = arith.constant 0 : i32
    %c0_i32_1 = arith.constant 0 : i32
    return %c0_i32, %c0_i32_0 : i32, i32
  }
  func.func @transform_5(%arg0: i32) -> (i32, i32, i32, i32) {
    %c0_i32 = arith.constant 0 : i32
    %c0_i32_0 = arith.constant 0 : i32
    %c0_i32_1 = arith.constant 0 : i32
    %c0_i32_2 = arith.constant 0 : i32
    return %arg0, %c0_i32, %c0_i32_0, %c0_i32_1 : i32, i32, i32, i32
  }
}

module attributes {stable_mosaic.version = 11 : i64} {
  func.func @conv3x3_relu_bn_kernel(%arg0: i32, %arg1: memref<1x8x8x8xf32, #tpu.memory_space<vmem>>, %arg2: memref<72x16xbf16, #tpu.memory_space<vmem>>, %arg3: memref<1x16xf32, #tpu.memory_space<vmem>>, %arg4: memref<1x16xf32, #tpu.memory_space<vmem>>, %arg5: memref<1x16xf32, #tpu.memory_space<vmem>>, %arg6: memref<1x8x8x16xf32, #tpu.memory_space<vmem>>, %arg7: memref<10x10x8xf32, #tpu.memory_space<vmem>>, %arg8: memref<64x72xf32, #tpu.memory_space<vmem>>) attributes {dimension_semantics = [#tpu.dimension_semantics<parallel>], iteration_bounds = array<i64: 2>, scalar_prefetch = 0 : i64, scratch_operands = 2 : i64, tpu.core_type = #tpu.core_type<tc>, window_params = [{transform_indices = @transform_0, window_bounds = array<i64: 1, 8, 8, 8>}, {pipeline_mode = #tpu.pipeline_mode<synchronous>, transform_indices = @transform_1, window_bounds = array<i64: 72, 16>}, {pipeline_mode = #tpu.pipeline_mode<synchronous>, transform_indices = @transform_2, window_bounds = array<i64: 1, 16>}, {pipeline_mode = #tpu.pipeline_mode<synchronous>, transform_indices = @transform_3, window_bounds = array<i64: 1, 16>}, {pipeline_mode = #tpu.pipeline_mode<synchronous>, transform_indices = @transform_4, window_bounds = array<i64: 1, 16>}, {transform_indices = @transform_5, window_bounds = array<i64: 1, 8, 8, 16>}]} {
    %cst = arith.constant 0.000000e+00 : f32
    %0 = vector.broadcast %cst : f32 to vector<10x10x8xf32>
    %c0 = arith.constant 0 : index
    %c0_0 = arith.constant 0 : index
    %c0_1 = arith.constant 0 : index
    %1 = vector.load %arg7[%c0, %c0_0, %c0_1] : memref<10x10x8xf32, #tpu.memory_space<vmem>>, vector<10x10x8xf32>
    tpu.vector_store %arg7[%c0, %c0_0, %c0_1], %0 {strides = array<i32>} : memref<10x10x8xf32, #tpu.memory_space<vmem>>, vector<10x10x8xf32>,
    %c0_2 = arith.constant 0 : index
    %c0_3 = arith.constant 0 : index
    %c0_4 = arith.constant 0 : index
    %c0_5 = arith.constant 0 : index
    %2 = vector.load %arg1[%c0_2, %c0_3, %c0_4, %c0_5] : memref<1x8x8x8xf32, #tpu.memory_space<vmem>>, vector<1x8x8x8xf32>
    %3 = vector.shape_cast %2 : vector<1x8x8x8xf32> to vector<8x8x8xf32>
    %c1 = arith.constant 1 : index
    %c1_6 = arith.constant 1 : index
    %c0_7 = arith.constant 0 : index
    %4 = vector.load %arg7[%c1, %c1_6, %c0_7] : memref<10x10x8xf32, #tpu.memory_space<vmem>>, vector<8x8x8xf32>
    tpu.vector_store %arg7[%c1, %c1_6, %c0_7], %3 {strides = array<i32>} : memref<10x10x8xf32, #tpu.memory_space<vmem>>, vector<8x8x8xf32>,
    %c0_8 = arith.constant 0 : index
    %c0_9 = arith.constant 0 : index
    %c0_10 = arith.constant 0 : index
    %5 = vector.load %arg7[%c0_8, %c0_9, %c0_10] : memref<10x10x8xf32, #tpu.memory_space<vmem>>, vector<8x8x8xf32>
    %6 = vector.shape_cast %5 : vector<8x8x8xf32> to vector<64x8xf32>
    %c0_11 = arith.constant 0 : index
    %c0_12 = arith.constant 0 : index
    %7 = vector.load %arg8[%c0_11, %c0_12] : memref<64x72xf32, #tpu.memory_space<vmem>>, vector<64x8xf32>
    tpu.vector_store %arg8[%c0_11, %c0_12], %6 {strides = array<i32>} : memref<64x72xf32, #tpu.memory_space<vmem>>, vector<64x8xf32>,
    %c0_13 = arith.constant 0 : index
    %c1_14 = arith.constant 1 : index
    %c0_15 = arith.constant 0 : index
    %8 = vector.load %arg7[%c0_13, %c1_14, %c0_15] : memref<10x10x8xf32, #tpu.memory_space<vmem>>, vector<8x8x8xf32>
    %9 = vector.shape_cast %8 : vector<8x8x8xf32> to vector<64x8xf32>
    %c0_16 = arith.constant 0 : index
    %c8 = arith.constant 8 : index
    %10 = vector.load %arg8[%c0_16, %c8] : memref<64x72xf32, #tpu.memory_space<vmem>>, vector<64x8xf32>
    tpu.vector_store %arg8[%c0_16, %c8], %9 {strides = array<i32>} : memref<64x72xf32, #tpu.memory_space<vmem>>, vector<64x8xf32>,
    %c0_17 = arith.constant 0 : index
    %c2 = arith.constant 2 : index
    %c0_18 = arith.constant 0 : index
    %11 = vector.load %arg7[%c0_17, %c2, %c0_18] : memref<10x10x8xf32, #tpu.memory_space<vmem>>, vector<8x8x8xf32>
    %12 = vector.shape_cast %11 : vector<8x8x8xf32> to vector<64x8xf32>
    %c0_19 = arith.constant 0 : index
    %c16 = arith.constant 16 : index
    %13 = vector.load %arg8[%c0_19, %c16] : memref<64x72xf32, #tpu.memory_space<vmem>>, vector<64x8xf32>
    tpu.vector_store %arg8[%c0_19, %c16], %12 {strides = array<i32>} : memref<64x72xf32, #tpu.memory_space<vmem>>, vector<64x8xf32>,
    %c1_20 = arith.constant 1 : index
    %c0_21 = arith.constant 0 : index
    %c0_22 = arith.constant 0 : index
    %14 = vector.load %arg7[%c1_20, %c0_21, %c0_22] : memref<10x10x8xf32, #tpu.memory_space<vmem>>, vector<8x8x8xf32>
    %15 = vector.shape_cast %14 : vector<8x8x8xf32> to vector<64x8xf32>
    %c0_23 = arith.constant 0 : index
    %c24 = arith.constant 24 : index
    %16 = vector.load %arg8[%c0_23, %c24] : memref<64x72xf32, #tpu.memory_space<vmem>>, vector<64x8xf32>
    tpu.vector_store %arg8[%c0_23, %c24], %15 {strides = array<i32>} : memref<64x72xf32, #tpu.memory_space<vmem>>, vector<64x8xf32>,
    %c1_24 = arith.constant 1 : index
    %c1_25 = arith.constant 1 : index
    %c0_26 = arith.constant 0 : index
    %17 = vector.load %arg7[%c1_24, %c1_25, %c0_26] : memref<10x10x8xf32, #tpu.memory_space<vmem>>, vector<8x8x8xf32>
    %18 = vector.shape_cast %17 : vector<8x8x8xf32> to vector<64x8xf32>
    %c0_27 = arith.constant 0 : index
    %c32 = arith.constant 32 : index
    %19 = vector.load %arg8[%c0_27, %c32] : memref<64x72xf32, #tpu.memory_space<vmem>>, vector<64x8xf32>
    tpu.vector_store %arg8[%c0_27, %c32], %18 {strides = array<i32>} : memref<64x72xf32, #tpu.memory_space<vmem>>, vector<64x8xf32>,
    %c1_28 = arith.constant 1 : index
    %c2_29 = arith.constant 2 : index
    %c0_30 = arith.constant 0 : index
    %20 = vector.load %arg7[%c1_28, %c2_29, %c0_30] : memref<10x10x8xf32, #tpu.memory_space<vmem>>, vector<8x8x8xf32>
    %21 = vector.shape_cast %20 : vector<8x8x8xf32> to vector<64x8xf32>
    %c0_31 = arith.constant 0 : index
    %c40 = arith.constant 40 : index
    %22 = vector.load %arg8[%c0_31, %c40] : memref<64x72xf32, #tpu.memory_space<vmem>>, vector<64x8xf32>
    tpu.vector_store %arg8[%c0_31, %c40], %21 {strides = array<i32>} : memref<64x72xf32, #tpu.memory_space<vmem>>, vector<64x8xf32>,
    %c2_32 = arith.constant 2 : index
    %c0_33 = arith.constant 0 : index
    %c0_34 = arith.constant 0 : index
    %23 = vector.load %arg7[%c2_32, %c0_33, %c0_34] : memref<10x10x8xf32, #tpu.memory_space<vmem>>, vector<8x8x8xf32>
    %24 = vector.shape_cast %23 : vector<8x8x8xf32> to vector<64x8xf32>
    %c0_35 = arith.constant 0 : index
    %c48 = arith.constant 48 : index
    %25 = vector.load %arg8[%c0_35, %c48] : memref<64x72xf32, #tpu.memory_space<vmem>>, vector<64x8xf32>
    tpu.vector_store %arg8[%c0_35, %c48], %24 {strides = array<i32>} : memref<64x72xf32, #tpu.memory_space<vmem>>, vector<64x8xf32>,
    %c2_36 = arith.constant 2 : index
    %c1_37 = arith.constant 1 : index
    %c0_38 = arith.constant 0 : index
    %26 = vector.load %arg7[%c2_36, %c1_37, %c0_38] : memref<10x10x8xf32, #tpu.memory_space<vmem>>, vector<8x8x8xf32>
    %27 = vector.shape_cast %26 : vector<8x8x8xf32> to vector<64x8xf32>
    %c0_39 = arith.constant 0 : index
    %c56 = arith.constant 56 : index
    %28 = vector.load %arg8[%c0_39, %c56] : memref<64x72xf32, #tpu.memory_space<vmem>>, vector<64x8xf32>
    tpu.vector_store %arg8[%c0_39, %c56], %27 {strides = array<i32>} : memref<64x72xf32, #tpu.memory_space<vmem>>, vector<64x8xf32>,
    %c2_40 = arith.constant 2 : index
    %c2_41 = arith.constant 2 : index
    %c0_42 = arith.constant 0 : index
    %29 = vector.load %arg7[%c2_40, %c2_41, %c0_42] : memref<10x10x8xf32, #tpu.memory_space<vmem>>, vector<8x8x8xf32>
    %30 = vector.shape_cast %29 : vector<8x8x8xf32> to vector<64x8xf32>
    %c0_43 = arith.constant 0 : index
    %c64 = arith.constant 64 : index
    %31 = vector.load %arg8[%c0_43, %c64] : memref<64x72xf32, #tpu.memory_space<vmem>>, vector<64x8xf32>
    tpu.vector_store %arg8[%c0_43, %c64], %30 {strides = array<i32>} : memref<64x72xf32, #tpu.memory_space<vmem>>, vector<64x8xf32>,
    %c0_44 = arith.constant 0 : index
    %c0_45 = arith.constant 0 : index
    %32 = vector.load %arg8[%c0_44, %c0_45] : memref<64x72xf32, #tpu.memory_space<vmem>>, vector<64x72xf32>
    %33 = arith.truncf %32 : vector<64x72xf32> to vector<64x72xbf16>
    %c0_46 = arith.constant 0 : index
    %c0_47 = arith.constant 0 : index
    %34 = vector.load %arg2[%c0_46, %c0_47] : memref<72x16xbf16, #tpu.memory_space<vmem>>, vector<72x16xbf16>
    %cst_48 = arith.constant dense<0.000000e+00> : vector<64x16xf32>
    %35 = tpu.matmul %33, %34, %cst_48 {dimension_numbers = #tpu.dot_dimension_numbers<[1], [0], [0], [1], [0, 0, 1, 1], [], []>} : vector<64x72xbf16>, vector<72x16xbf16>, vector<64x16xf32> -> vector<64x16xf32>
    %c0_49 = arith.constant 0 : index
    %c0_50 = arith.constant 0 : index
    %36 = vector.load %arg3[%c0_49, %c0_50] : memref<1x16xf32, #tpu.memory_space<vmem>>, vector<1x16xf32>
    %37 = vector.broadcast %36 : vector<1x16xf32> to vector<64x16xf32>
    %38 = arith.addf %35, %37 : vector<64x16xf32>
    %cst_51 = arith.constant 0.000000e+00 : f32
    %39 = vector.broadcast %cst_51 : f32 to vector<64x16xf32>
    %40 = arith.maximumf %38, %39 : vector<64x16xf32>
    %c0_52 = arith.constant 0 : index
    %c0_53 = arith.constant 0 : index
    %41 = vector.load %arg4[%c0_52, %c0_53] : memref<1x16xf32, #tpu.memory_space<vmem>>, vector<1x16xf32>
    %42 = vector.broadcast %41 : vector<1x16xf32> to vector<64x16xf32>
    %43 = arith.mulf %40, %42 : vector<64x16xf32>
    %c0_54 = arith.constant 0 : index
    %c0_55 = arith.constant 0 : index
    %44 = vector.load %arg5[%c0_54, %c0_55] : memref<1x16xf32, #tpu.memory_space<vmem>>, vector<1x16xf32>
    %45 = vector.broadcast %44 : vector<1x16xf32> to vector<64x16xf32>
    %46 = arith.addf %43, %45 : vector<64x16xf32>
    %47 = vector.shape_cast %46 : vector<64x16xf32> to vector<8x8x16xf32>
    %48 = vector.shape_cast %47 : vector<8x8x16xf32> to vector<1x8x8x16xf32>
    %c0_56 = arith.constant 0 : index
    %c0_57 = arith.constant 0 : index
    %c0_58 = arith.constant 0 : index
    %c0_59 = arith.constant 0 : index
    %49 = vector.load %arg6[%c0_56, %c0_57, %c0_58, %c0_59] : memref<1x8x8x16xf32, #tpu.memory_space<vmem>>, vector<1x8x8x16xf32>
    tpu.vector_store %arg6[%c0_56, %c0_57, %c0_58, %c0_59], %48 {strides = array<i32>} : memref<1x8x8x16xf32, #tpu.memory_space<vmem>>, vector<1x8x8x16xf32>,
    return
  }
  func.func @transform_0(%arg0: i32) -> (i32, i32, i32, i32) {
    %c0_i32 = arith.constant 0 : i32
    %c0_i32_0 = arith.constant 0 : i32
    %c0_i32_1 = arith.constant 0 : i32
    %c0_i32_2 = arith.constant 0 : i32
    return %arg0, %c0_i32, %c0_i32_0, %c0_i32_1 : i32, i32, i32, i32
  }
  func.func @transform_1(%arg0: i32) -> (i32, i32) {
    %c0_i32 = arith.constant 0 : i32
    %c0_i32_0 = arith.constant 0 : i32
    %c0_i32_1 = arith.constant 0 : i32
    return %c0_i32, %c0_i32_0 : i32, i32
  }
  func.func @transform_2(%arg0: i32) -> (i32, i32) {
    %c0_i32 = arith.constant 0 : i32
    %c0_i32_0 = arith.constant 0 : i32
    %c0_i32_1 = arith.constant 0 : i32
    return %c0_i32, %c0_i32_0 : i32, i32
  }
  func.func @transform_3(%arg0: i32) -> (i32, i32) {
    %c0_i32 = arith.constant 0 : i32
    %c0_i32_0 = arith.constant 0 : i32
    %c0_i32_1 = arith.constant 0 : i32
    return %c0_i32, %c0_i32_0 : i32, i32
  }
  func.func @transform_4(%arg0: i32) -> (i32, i32) {
    %c0_i32 = arith.constant 0 : i32
    %c0_i32_0 = arith.constant 0 : i32
    %c0_i32_1 = arith.constant 0 : i32
    return %c0_i32, %c0_i32_0 : i32, i32
  }
  func.func @transform_5(%arg0: i32) -> (i32, i32, i32, i32) {
    %c0_i32 = arith.constant 0 : i32
    %c0_i32_0 = arith.constant 0 : i32
    %c0_i32_1 = arith.constant 0 : i32
    %c0_i32_2 = arith.constant 0 : i32
    return %arg0, %c0_i32, %c0_i32_0, %c0_i32_1 : i32, i32, i32, i32
  }
}

module attributes {stable_mosaic.version = 11 : i64} {
  func.func @conv3x3_relu_bn_kernel(%arg0: i32, %arg1: memref<1x8x8x16xf32, #tpu.memory_space<vmem>>, %arg2: memref<144x16xbf16, #tpu.memory_space<vmem>>, %arg3: memref<1x16xf32, #tpu.memory_space<vmem>>, %arg4: memref<1x16xf32, #tpu.memory_space<vmem>>, %arg5: memref<1x16xf32, #tpu.memory_space<vmem>>, %arg6: memref<1x4x4x16xf32, #tpu.memory_space<vmem>>, %arg7: memref<10x10x16xf32, #tpu.memory_space<vmem>>, %arg8: memref<64x144xf32, #tpu.memory_space<vmem>>, %arg9: memref<8x8x16xf32, #tpu.memory_space<vmem>>, %arg10: memref<8x4x16xf32, #tpu.memory_space<vmem>>) attributes {dimension_semantics = [#tpu.dimension_semantics<parallel>], iteration_bounds = array<i64: 2>, scalar_prefetch = 0 : i64, scratch_operands = 4 : i64, tpu.core_type = #tpu.core_type<tc>, window_params = [{transform_indices = @transform_0, window_bounds = array<i64: 1, 8, 8, 16>}, {pipeline_mode = #tpu.pipeline_mode<synchronous>, transform_indices = @transform_1, window_bounds = array<i64: 144, 16>}, {pipeline_mode = #tpu.pipeline_mode<synchronous>, transform_indices = @transform_2, window_bounds = array<i64: 1, 16>}, {pipeline_mode = #tpu.pipeline_mode<synchronous>, transform_indices = @transform_3, window_bounds = array<i64: 1, 16>}, {pipeline_mode = #tpu.pipeline_mode<synchronous>, transform_indices = @transform_4, window_bounds = array<i64: 1, 16>}, {transform_indices = @transform_5, window_bounds = array<i64: 1, 4, 4, 16>}]} {
    %cst = arith.constant 0.000000e+00 : f32
    %0 = vector.broadcast %cst : f32 to vector<10x10x16xf32>
    %c0 = arith.constant 0 : index
    %c0_0 = arith.constant 0 : index
    %c0_1 = arith.constant 0 : index
    %1 = vector.load %arg7[%c0, %c0_0, %c0_1] : memref<10x10x16xf32, #tpu.memory_space<vmem>>, vector<10x10x16xf32>
    tpu.vector_store %arg7[%c0, %c0_0, %c0_1], %0 {strides = array<i32>} : memref<10x10x16xf32, #tpu.memory_space<vmem>>, vector<10x10x16xf32>,
    %c0_2 = arith.constant 0 : index
    %c0_3 = arith.constant 0 : index
    %c0_4 = arith.constant 0 : index
    %c0_5 = arith.constant 0 : index
    %2 = vector.load %arg1[%c0_2, %c0_3, %c0_4, %c0_5] : memref<1x8x8x16xf32, #tpu.memory_space<vmem>>, vector<1x8x8x16xf32>
    %3 = vector.shape_cast %2 : vector<1x8x8x16xf32> to vector<8x8x16xf32>
    %c1 = arith.constant 1 : index
    %c1_6 = arith.constant 1 : index
    %c0_7 = arith.constant 0 : index
    %4 = vector.load %arg7[%c1, %c1_6, %c0_7] : memref<10x10x16xf32, #tpu.memory_space<vmem>>, vector<8x8x16xf32>
    tpu.vector_store %arg7[%c1, %c1_6, %c0_7], %3 {strides = array<i32>} : memref<10x10x16xf32, #tpu.memory_space<vmem>>, vector<8x8x16xf32>,
    %c0_8 = arith.constant 0 : index
    %c0_9 = arith.constant 0 : index
    %c0_10 = arith.constant 0 : index
    %5 = vector.load %arg7[%c0_8, %c0_9, %c0_10] : memref<10x10x16xf32, #tpu.memory_space<vmem>>, vector<8x8x16xf32>
    %6 = vector.shape_cast %5 : vector<8x8x16xf32> to vector<64x16xf32>
    %c0_11 = arith.constant 0 : index
    %c0_12 = arith.constant 0 : index
    %7 = vector.load %arg8[%c0_11, %c0_12] : memref<64x144xf32, #tpu.memory_space<vmem>>, vector<64x16xf32>
    tpu.vector_store %arg8[%c0_11, %c0_12], %6 {strides = array<i32>} : memref<64x144xf32, #tpu.memory_space<vmem>>, vector<64x16xf32>,
    %c0_13 = arith.constant 0 : index
    %c1_14 = arith.constant 1 : index
    %c0_15 = arith.constant 0 : index
    %8 = vector.load %arg7[%c0_13, %c1_14, %c0_15] : memref<10x10x16xf32, #tpu.memory_space<vmem>>, vector<8x8x16xf32>
    %9 = vector.shape_cast %8 : vector<8x8x16xf32> to vector<64x16xf32>
    %c0_16 = arith.constant 0 : index
    %c16 = arith.constant 16 : index
    %10 = vector.load %arg8[%c0_16, %c16] : memref<64x144xf32, #tpu.memory_space<vmem>>, vector<64x16xf32>
    tpu.vector_store %arg8[%c0_16, %c16], %9 {strides = array<i32>} : memref<64x144xf32, #tpu.memory_space<vmem>>, vector<64x16xf32>,
    %c0_17 = arith.constant 0 : index
    %c2 = arith.constant 2 : index
    %c0_18 = arith.constant 0 : index
    %11 = vector.load %arg7[%c0_17, %c2, %c0_18] : memref<10x10x16xf32, #tpu.memory_space<vmem>>, vector<8x8x16xf32>
    %12 = vector.shape_cast %11 : vector<8x8x16xf32> to vector<64x16xf32>
    %c0_19 = arith.constant 0 : index
    %c32 = arith.constant 32 : index
    %13 = vector.load %arg8[%c0_19, %c32] : memref<64x144xf32, #tpu.memory_space<vmem>>, vector<64x16xf32>
    tpu.vector_store %arg8[%c0_19, %c32], %12 {strides = array<i32>} : memref<64x144xf32, #tpu.memory_space<vmem>>, vector<64x16xf32>,
    %c1_20 = arith.constant 1 : index
    %c0_21 = arith.constant 0 : index
    %c0_22 = arith.constant 0 : index
    %14 = vector.load %arg7[%c1_20, %c0_21, %c0_22] : memref<10x10x16xf32, #tpu.memory_space<vmem>>, vector<8x8x16xf32>
    %15 = vector.shape_cast %14 : vector<8x8x16xf32> to vector<64x16xf32>
    %c0_23 = arith.constant 0 : index
    %c48 = arith.constant 48 : index
    %16 = vector.load %arg8[%c0_23, %c48] : memref<64x144xf32, #tpu.memory_space<vmem>>, vector<64x16xf32>
    tpu.vector_store %arg8[%c0_23, %c48], %15 {strides = array<i32>} : memref<64x144xf32, #tpu.memory_space<vmem>>, vector<64x16xf32>,
    %c1_24 = arith.constant 1 : index
    %c1_25 = arith.constant 1 : index
    %c0_26 = arith.constant 0 : index
    %17 = vector.load %arg7[%c1_24, %c1_25, %c0_26] : memref<10x10x16xf32, #tpu.memory_space<vmem>>, vector<8x8x16xf32>
    %18 = vector.shape_cast %17 : vector<8x8x16xf32> to vector<64x16xf32>
    %c0_27 = arith.constant 0 : index
    %c64 = arith.constant 64 : index
    %19 = vector.load %arg8[%c0_27, %c64] : memref<64x144xf32, #tpu.memory_space<vmem>>, vector<64x16xf32>
    tpu.vector_store %arg8[%c0_27, %c64], %18 {strides = array<i32>} : memref<64x144xf32, #tpu.memory_space<vmem>>, vector<64x16xf32>,
    %c1_28 = arith.constant 1 : index
    %c2_29 = arith.constant 2 : index
    %c0_30 = arith.constant 0 : index
    %20 = vector.load %arg7[%c1_28, %c2_29, %c0_30] : memref<10x10x16xf32, #tpu.memory_space<vmem>>, vector<8x8x16xf32>
    %21 = vector.shape_cast %20 : vector<8x8x16xf32> to vector<64x16xf32>
    %c0_31 = arith.constant 0 : index
    %c80 = arith.constant 80 : index
    %22 = vector.load %arg8[%c0_31, %c80] : memref<64x144xf32, #tpu.memory_space<vmem>>, vector<64x16xf32>
    tpu.vector_store %arg8[%c0_31, %c80], %21 {strides = array<i32>} : memref<64x144xf32, #tpu.memory_space<vmem>>, vector<64x16xf32>,
    %c2_32 = arith.constant 2 : index
    %c0_33 = arith.constant 0 : index
    %c0_34 = arith.constant 0 : index
    %23 = vector.load %arg7[%c2_32, %c0_33, %c0_34] : memref<10x10x16xf32, #tpu.memory_space<vmem>>, vector<8x8x16xf32>
    %24 = vector.shape_cast %23 : vector<8x8x16xf32> to vector<64x16xf32>
    %c0_35 = arith.constant 0 : index
    %c96 = arith.constant 96 : index
    %25 = vector.load %arg8[%c0_35, %c96] : memref<64x144xf32, #tpu.memory_space<vmem>>, vector<64x16xf32>
    tpu.vector_store %arg8[%c0_35, %c96], %24 {strides = array<i32>} : memref<64x144xf32, #tpu.memory_space<vmem>>, vector<64x16xf32>,
    %c2_36 = arith.constant 2 : index
    %c1_37 = arith.constant 1 : index
    %c0_38 = arith.constant 0 : index
    %26 = vector.load %arg7[%c2_36, %c1_37, %c0_38] : memref<10x10x16xf32, #tpu.memory_space<vmem>>, vector<8x8x16xf32>
    %27 = vector.shape_cast %26 : vector<8x8x16xf32> to vector<64x16xf32>
    %c0_39 = arith.constant 0 : index
    %c112 = arith.constant 112 : index
    %28 = vector.load %arg8[%c0_39, %c112] : memref<64x144xf32, #tpu.memory_space<vmem>>, vector<64x16xf32>
    tpu.vector_store %arg8[%c0_39, %c112], %27 {strides = array<i32>} : memref<64x144xf32, #tpu.memory_space<vmem>>, vector<64x16xf32>,
    %c2_40 = arith.constant 2 : index
    %c2_41 = arith.constant 2 : index
    %c0_42 = arith.constant 0 : index
    %29 = vector.load %arg7[%c2_40, %c2_41, %c0_42] : memref<10x10x16xf32, #tpu.memory_space<vmem>>, vector<8x8x16xf32>
    %30 = vector.shape_cast %29 : vector<8x8x16xf32> to vector<64x16xf32>
    %c0_43 = arith.constant 0 : index
    %c128 = arith.constant 128 : index
    %31 = vector.load %arg8[%c0_43, %c128] : memref<64x144xf32, #tpu.memory_space<vmem>>, vector<64x16xf32>
    tpu.vector_store %arg8[%c0_43, %c128], %30 {strides = array<i32>} : memref<64x144xf32, #tpu.memory_space<vmem>>, vector<64x16xf32>,
    %c0_44 = arith.constant 0 : index
    %c0_45 = arith.constant 0 : index
    %32 = vector.load %arg8[%c0_44, %c0_45] : memref<64x144xf32, #tpu.memory_space<vmem>>, vector<64x144xf32>
    %33 = arith.truncf %32 : vector<64x144xf32> to vector<64x144xbf16>
    %c0_46 = arith.constant 0 : index
    %c0_47 = arith.constant 0 : index
    %34 = vector.load %arg2[%c0_46, %c0_47] : memref<144x16xbf16, #tpu.memory_space<vmem>>, vector<144x16xbf16>
    %cst_48 = arith.constant dense<0.000000e+00> : vector<64x16xf32>
    %35 = tpu.matmul %33, %34, %cst_48 {dimension_numbers = #tpu.dot_dimension_numbers<[1], [0], [0], [1], [0, 0, 1, 1], [], []>} : vector<64x144xbf16>, vector<144x16xbf16>, vector<64x16xf32> -> vector<64x16xf32>
    %c0_49 = arith.constant 0 : index
    %c0_50 = arith.constant 0 : index
    %36 = vector.load %arg3[%c0_49, %c0_50] : memref<1x16xf32, #tpu.memory_space<vmem>>, vector<1x16xf32>
    %37 = vector.broadcast %36 : vector<1x16xf32> to vector<64x16xf32>
    %38 = arith.addf %35, %37 : vector<64x16xf32>
    %cst_51 = arith.constant 0.000000e+00 : f32
    %39 = vector.broadcast %cst_51 : f32 to vector<64x16xf32>
    %40 = arith.maximumf %38, %39 : vector<64x16xf32>
    %c0_52 = arith.constant 0 : index
    %c0_53 = arith.constant 0 : index
    %41 = vector.load %arg4[%c0_52, %c0_53] : memref<1x16xf32, #tpu.memory_space<vmem>>, vector<1x16xf32>
    %42 = vector.broadcast %41 : vector<1x16xf32> to vector<64x16xf32>
    %43 = arith.mulf %40, %42 : vector<64x16xf32>
    %c0_54 = arith.constant 0 : index
    %c0_55 = arith.constant 0 : index
    %44 = vector.load %arg5[%c0_54, %c0_55] : memref<1x16xf32, #tpu.memory_space<vmem>>, vector<1x16xf32>
    %45 = vector.broadcast %44 : vector<1x16xf32> to vector<64x16xf32>
    %46 = arith.addf %43, %45 : vector<64x16xf32>
    %47 = vector.shape_cast %46 : vector<64x16xf32> to vector<8x8x16xf32>
    %c0_56 = arith.constant 0 : index
    %c0_57 = arith.constant 0 : index
    %c0_58 = arith.constant 0 : index
    %48 = vector.load %arg9[%c0_56, %c0_57, %c0_58] : memref<8x8x16xf32, #tpu.memory_space<vmem>>, vector<8x8x16xf32>
    tpu.vector_store %arg9[%c0_56, %c0_57, %c0_58], %47 {strides = array<i32>} : memref<8x8x16xf32, #tpu.memory_space<vmem>>, vector<8x8x16xf32>,
    %c0_59 = arith.constant 0 : index
    %c0_60 = arith.constant 0 : index
    %c0_61 = arith.constant 0 : index
    %49 = tpu.strided_load %arg9[%c0_59, %c0_60, %c0_61] {strides = array<i32: 1, 2, 1>} : memref<8x8x16xf32, #tpu.memory_space<vmem>>, vector<8x4x16xf32>
    %c0_62 = arith.constant 0 : index
    %c1_63 = arith.constant 1 : index
    %c0_64 = arith.constant 0 : index
    %50 = tpu.strided_load %arg9[%c0_62, %c1_63, %c0_64] {strides = array<i32: 1, 2, 1>} : memref<8x8x16xf32, #tpu.memory_space<vmem>>, vector<8x4x16xf32>
    %51 = arith.maximumf %49, %50 : vector<8x4x16xf32>
    %c0_65 = arith.constant 0 : index
    %c0_66 = arith.constant 0 : index
    %c0_67 = arith.constant 0 : index
    %52 = vector.load %arg10[%c0_65, %c0_66, %c0_67] : memref<8x4x16xf32, #tpu.memory_space<vmem>>, vector<8x4x16xf32>
    tpu.vector_store %arg10[%c0_65, %c0_66, %c0_67], %51 {strides = array<i32>} : memref<8x4x16xf32, #tpu.memory_space<vmem>>, vector<8x4x16xf32>,
    %c0_68 = arith.constant 0 : index
    %c0_69 = arith.constant 0 : index
    %c0_70 = arith.constant 0 : index
    %53 = tpu.strided_load %arg10[%c0_68, %c0_69, %c0_70] {strides = array<i32: 2, 1, 1>} : memref<8x4x16xf32, #tpu.memory_space<vmem>>, vector<4x4x16xf32>
    %c1_71 = arith.constant 1 : index
    %c0_72 = arith.constant 0 : index
    %c0_73 = arith.constant 0 : index
    %54 = tpu.strided_load %arg10[%c1_71, %c0_72, %c0_73] {strides = array<i32: 2, 1, 1>} : memref<8x4x16xf32, #tpu.memory_space<vmem>>, vector<4x4x16xf32>
    %55 = arith.maximumf %53, %54 : vector<4x4x16xf32>
    %56 = vector.shape_cast %55 : vector<4x4x16xf32> to vector<1x4x4x16xf32>
    %c0_74 = arith.constant 0 : index
    %c0_75 = arith.constant 0 : index
    %c0_76 = arith.constant 0 : index
    %c0_77 = arith.constant 0 : index
    %57 = vector.load %arg6[%c0_74, %c0_75, %c0_76, %c0_77] : memref<1x4x4x16xf32, #tpu.memory_space<vmem>>, vector<1x4x4x16xf32>
    tpu.vector_store %arg6[%c0_74, %c0_75, %c0_76, %c0_77], %56 {strides = array<i32>} : memref<1x4x4x16xf32, #tpu.memory_space<vmem>>, vector<1x4x4x16xf32>,
    return
  }
  func.func @transform_0(%arg0: i32) -> (i32, i32, i32, i32) {
    %c0_i32 = arith.constant 0 : i32
    %c0_i32_0 = arith.constant 0 : i32
    %c0_i32_1 = arith.constant 0 : i32
    %c0_i32_2 = arith.constant 0 : i32
    return %arg0, %c0_i32, %c0_i32_0, %c0_i32_1 : i32, i32, i32, i32
  }
  func.func @transform_1(%arg0: i32) -> (i32, i32) {
    %c0_i32 = arith.constant 0 : i32
    %c0_i32_0 = arith.constant 0 : i32
    %c0_i32_1 = arith.constant 0 : i32
    return %c0_i32, %c0_i32_0 : i32, i32
  }
  func.func @transform_2(%arg0: i32) -> (i32, i32) {
    %c0_i32 = arith.constant 0 : i32
    %c0_i32_0 = arith.constant 0 : i32
    %c0_i32_1 = arith.constant 0 : i32
    return %c0_i32, %c0_i32_0 : i32, i32
  }
  func.func @transform_3(%arg0: i32) -> (i32, i32) {
    %c0_i32 = arith.constant 0 : i32
    %c0_i32_0 = arith.constant 0 : i32
    %c0_i32_1 = arith.constant 0 : i32
    return %c0_i32, %c0_i32_0 : i32, i32
  }
  func.func @transform_4(%arg0: i32) -> (i32, i32) {
    %c0_i32 = arith.constant 0 : i32
    %c0_i32_0 = arith.constant 0 : i32
    %c0_i32_1 = arith.constant 0 : i32
    return %c0_i32, %c0_i32_0 : i32, i32
  }
  func.func @transform_5(%arg0: i32) -> (i32, i32, i32, i32) {
    %c0_i32 = arith.constant 0 : i32
    %c0_i32_0 = arith.constant 0 : i32
    %c0_i32_1 = arith.constant 0 : i32
    %c0_i32_2 = arith.constant 0 : i32
    return %arg0, %c0_i32, %c0_i32_0, %c0_i32_1 : i32, i32, i32, i32
  }
}

module attributes {stable_mosaic.version = 11 : i64} {
  func.func @linear_kernel(%arg0: i32, %arg1: i32, %arg2: memref<2x256xf32, #tpu.memory_space<vmem>>, %arg3: memref<256x512xbf16, #tpu.memory_space<vmem>>, %arg4: memref<1x512xf32, #tpu.memory_space<vmem>>, %arg5: memref<2x512xf32, #tpu.memory_space<vmem>>, %arg6: memref<2x512xf32, #tpu.memory_space<vmem>>) attributes {dimension_semantics = [#tpu.dimension_semantics<parallel>, #tpu.dimension_semantics<arbitrary>], iteration_bounds = array<i64: 2, 1>, scalar_prefetch = 0 : i64, scratch_operands = 1 : i64, tpu.core_type = #tpu.core_type<tc>, window_params = [{transform_indices = @transform_0, window_bounds = array<i64: 2, 256>}, {transform_indices = @transform_1, window_bounds = array<i64: 256, 512>}, {transform_indices = @transform_2, window_bounds = array<i64: 1, 512>}, {transform_indices = @transform_3, window_bounds = array<i64: 2, 512>}]} {
    %c0_i32 = arith.constant 0 : i32
    %0 = arith.cmpi eq, %arg1, %c0_i32 : i32
    %1 = arith.extui %0 : i1 to i32
    %c0_i32_0 = arith.constant 0 : i32
    %2 = arith.cmpi ne, %1, %c0_i32_0 : i32
    scf.if %2 {
      %cst_10 = arith.constant 0.000000e+00 : f32
      %13 = vector.broadcast %cst_10 : f32 to vector<2x512xf32>
      %c0_11 = arith.constant 0 : index
      %c0_12 = arith.constant 0 : index
      %14 = vector.load %arg6[%c0_11, %c0_12] : memref<2x512xf32, #tpu.memory_space<vmem>>, vector<2x512xf32>
      tpu.vector_store %arg6[%c0_11, %c0_12], %13 {strides = array<i32>} : memref<2x512xf32, #tpu.memory_space<vmem>>, vector<2x512xf32>,
    } else {
    }
    %c0 = arith.constant 0 : index
    %c0_1 = arith.constant 0 : index
    %3 = vector.load %arg6[%c0, %c0_1] : memref<2x512xf32, #tpu.memory_space<vmem>>, vector<2x512xf32>
    %c0_2 = arith.constant 0 : index
    %c0_3 = arith.constant 0 : index
    %4 = vector.load %arg2[%c0_2, %c0_3] : memref<2x256xf32, #tpu.memory_space<vmem>>, vector<2x256xf32>
    %5 = arith.truncf %4 : vector<2x256xf32> to vector<2x256xbf16>
    %c0_4 = arith.constant 0 : index
    %c0_5 = arith.constant 0 : index
    %6 = vector.load %arg3[%c0_4, %c0_5] : memref<256x512xbf16, #tpu.memory_space<vmem>>, vector<256x512xbf16>
    %cst = arith.constant dense<0.000000e+00> : vector<2x512xf32>
    %7 = tpu.matmul %5, %6, %cst {dimension_numbers = #tpu.dot_dimension_numbers<[1], [0], [0], [1], [0, 0, 1, 1], [], []>} : vector<2x256xbf16>, vector<256x512xbf16>, vector<2x512xf32> -> vector<2x512xf32>
    %8 = arith.addf %3, %7 : vector<2x512xf32>
    %c0_6 = arith.constant 0 : index
    %c0_7 = arith.constant 0 : index
    %9 = vector.load %arg6[%c0_6, %c0_7] : memref<2x512xf32, #tpu.memory_space<vmem>>, vector<2x512xf32>
    tpu.vector_store %arg6[%c0_6, %c0_7], %8 {strides = array<i32>} : memref<2x512xf32, #tpu.memory_space<vmem>>, vector<2x512xf32>,
    %c0_i32_8 = arith.constant 0 : i32
    %10 = arith.cmpi eq, %arg1, %c0_i32_8 : i32
    %11 = arith.extui %10 : i1 to i32
    %c0_i32_9 = arith.constant 0 : i32
    %12 = arith.cmpi ne, %11, %c0_i32_9 : i32
    scf.if %12 {
      %c0_10 = arith.constant 0 : index
      %c0_11 = arith.constant 0 : index
      %13 = vector.load %arg6[%c0_10, %c0_11] : memref<2x512xf32, #tpu.memory_space<vmem>>, vector<2x512xf32>
      %c0_12 = arith.constant 0 : index
      %c0_13 = arith.constant 0 : index
      %14 = vector.load %arg4[%c0_12, %c0_13] : memref<1x512xf32, #tpu.memory_space<vmem>>, vector<1x512xf32>
      %15 = vector.broadcast %14 : vector<1x512xf32> to vector<2x512xf32>
      %16 = arith.addf %13, %15 : vector<2x512xf32>
      %cst_14 = arith.constant 0.000000e+00 : f32
      %17 = vector.broadcast %cst_14 : f32 to vector<2x512xf32>
      %18 = arith.maximumf %16, %17 : vector<2x512xf32>
      %c0_15 = arith.constant 0 : index
      %c0_16 = arith.constant 0 : index
      %19 = vector.load %arg5[%c0_15, %c0_16] : memref<2x512xf32, #tpu.memory_space<vmem>>, vector<2x512xf32>
      tpu.vector_store %arg5[%c0_15, %c0_16], %18 {strides = array<i32>} : memref<2x512xf32, #tpu.memory_space<vmem>>, vector<2x512xf32>,
    } else {
    }
    return
  }
  func.func @transform_0(%arg0: i32, %arg1: i32) -> (i32, i32) {
    %c0_i32 = arith.constant 0 : i32
    %c0_i32_0 = arith.constant 0 : i32
    return %c0_i32, %arg1 : i32, i32
  }
  func.func @transform_1(%arg0: i32, %arg1: i32) -> (i32, i32) {
    %c0_i32 = arith.constant 0 : i32
    return %arg1, %arg0 : i32, i32
  }
  func.func @transform_2(%arg0: i32, %arg1: i32) -> (i32, i32) {
    %c0_i32 = arith.constant 0 : i32
    %c0_i32_0 = arith.constant 0 : i32
    return %c0_i32, %arg0 : i32, i32
  }
  func.func @transform_3(%arg0: i32, %arg1: i32) -> (i32, i32) {
    %c0_i32 = arith.constant 0 : i32
    %c0_i32_0 = arith.constant 0 : i32
    return %c0_i32, %arg0 : i32, i32
  }
}

module attributes {stable_mosaic.version = 11 : i64} {
  func.func @linear_kernel(%arg0: i32, %arg1: i32, %arg2: memref<2x256xf32, #tpu.memory_space<vmem>>, %arg3: memref<256x10xbf16, #tpu.memory_space<vmem>>, %arg4: memref<1x10xf32, #tpu.memory_space<vmem>>, %arg5: memref<2x10xf32, #tpu.memory_space<vmem>>, %arg6: memref<2x10xf32, #tpu.memory_space<vmem>>) attributes {dimension_semantics = [#tpu.dimension_semantics<parallel>, #tpu.dimension_semantics<arbitrary>], iteration_bounds = array<i64: 1, 4>, scalar_prefetch = 0 : i64, scratch_operands = 1 : i64, tpu.core_type = #tpu.core_type<tc>, window_params = [{transform_indices = @transform_0, window_bounds = array<i64: 2, 256>}, {transform_indices = @transform_1, window_bounds = array<i64: 256, 10>}, {transform_indices = @transform_2, window_bounds = array<i64: 1, 10>}, {transform_indices = @transform_3, window_bounds = array<i64: 2, 10>}]} {
    %c0_i32 = arith.constant 0 : i32
    %0 = arith.cmpi eq, %arg1, %c0_i32 : i32
    %1 = arith.extui %0 : i1 to i32
    %c0_i32_0 = arith.constant 0 : i32
    %2 = arith.cmpi ne, %1, %c0_i32_0 : i32
    scf.if %2 {
      %cst_9 = arith.constant 0.000000e+00 : f32
      %13 = vector.broadcast %cst_9 : f32 to vector<2x10xf32>
      %c0_10 = arith.constant 0 : index
      %c0_11 = arith.constant 0 : index
      %14 = vector.load %arg6[%c0_10, %c0_11] : memref<2x10xf32, #tpu.memory_space<vmem>>, vector<2x10xf32>
      tpu.vector_store %arg6[%c0_10, %c0_11], %13 {strides = array<i32>} : memref<2x10xf32, #tpu.memory_space<vmem>>, vector<2x10xf32>,
    } else {
    }
    %c0 = arith.constant 0 : index
    %c0_1 = arith.constant 0 : index
    %3 = vector.load %arg6[%c0, %c0_1] : memref<2x10xf32, #tpu.memory_space<vmem>>, vector<2x10xf32>
    %c0_2 = arith.constant 0 : index
    %c0_3 = arith.constant 0 : index
    %4 = vector.load %arg2[%c0_2, %c0_3] : memref<2x256xf32, #tpu.memory_space<vmem>>, vector<2x256xf32>
    %5 = arith.truncf %4 : vector<2x256xf32> to vector<2x256xbf16>
    %c0_4 = arith.constant 0 : index
    %c0_5 = arith.constant 0 : index
    %6 = vector.load %arg3[%c0_4, %c0_5] : memref<256x10xbf16, #tpu.memory_space<vmem>>, vector<256x10xbf16>
    %cst = arith.constant dense<0.000000e+00> : vector<2x10xf32>
    %7 = tpu.matmul %5, %6, %cst {dimension_numbers = #tpu.dot_dimension_numbers<[1], [0], [0], [1], [0, 0, 1, 1], [], []>} : vector<2x256xbf16>, vector<256x10xbf16>, vector<2x10xf32> -> vector<2x10xf32>
    %8 = arith.addf %3, %7 : vector<2x10xf32>
    %c0_6 = arith.constant 0 : index
    %c0_7 = arith.constant 0 : index
    %9 = vector.load %arg6[%c0_6, %c0_7] : memref<2x10xf32, #tpu.memory_space<vmem>>, vector<2x10xf32>
    tpu.vector_store %arg6[%c0_6, %c0_7], %8 {strides = array<i32>} : memref<2x10xf32, #tpu.memory_space<vmem>>, vector<2x10xf32>,
    %c3_i32 = arith.constant 3 : i32
    %10 = arith.cmpi eq, %arg1, %c3_i32 : i32
    %11 = arith.extui %10 : i1 to i32
    %c0_i32_8 = arith.constant 0 : i32
    %12 = arith.cmpi ne, %11, %c0_i32_8 : i32
    scf.if %12 {
      %c0_9 = arith.constant 0 : index
      %c0_10 = arith.constant 0 : index
      %13 = vector.load %arg6[%c0_9, %c0_10] : memref<2x10xf32, #tpu.memory_space<vmem>>, vector<2x10xf32>
      %c0_11 = arith.constant 0 : index
      %c0_12 = arith.constant 0 : index
      %14 = vector.load %arg4[%c0_11, %c0_12] : memref<1x10xf32, #tpu.memory_space<vmem>>, vector<1x10xf32>
      %15 = vector.broadcast %14 : vector<1x10xf32> to vector<2x10xf32>
      %16 = arith.addf %13, %15 : vector<2x10xf32>
      %c0_13 = arith.constant 0 : index
      %c0_14 = arith.constant 0 : index
      %17 = vector.load %arg5[%c0_13, %c0_14] : memref<2x10xf32, #tpu.memory_space<vmem>>, vector<2x10xf32>
      tpu.vector_store %arg5[%c0_13, %c0_14], %16 {strides = array<i32>} : memref<2x10xf32, #tpu.memory_space<vmem>>, vector<2x10xf32>,
    } else {
    }
    return
  }
  func.func @transform_0(%arg0: i32, %arg1: i32) -> (i32, i32) {
    %c0_i32 = arith.constant 0 : i32
    %c0_i32_0 = arith.constant 0 : i32
    return %c0_i32, %arg1 : i32, i32
  }
  func.func @transform_1(%arg0: i32, %arg1: i32) -> (i32, i32) {
    %c0_i32 = arith.constant 0 : i32
    return %arg1, %arg0 : i32, i32
  }
  func.func @transform_2(%arg0: i32, %arg1: i32) -> (i32, i32) {
    %c0_i32 = arith.constant 0 : i32
    %c0_i32_0 = arith.constant 0 : i32
    return %c0_i32, %arg0 : i32, i32
  }
  func.func @transform_3(%arg0: i32, %arg1: i32) -> (i32, i32) {
    %c0_i32 = arith.constant 0 : i32
    %c0_i32_0 = arith.constant 0 : i32
    return %c0_i32, %arg0 : i32, i32
  }
}

</mosaic_0001>

<bundles_post_ra>
// kernel: vgg_forward.8
= control target key start
LH: loop header
LB: loop body
LE: loop exit
PB: predicated region body
PF: predicated region fallthrough
CT: control target
= control target key end

     0   :  { %s1308_s12 = smov 0   ;;  %s1310_s13 = smov 0   ;;  %s1587_s0 = inlined_call_operand.vmem [shape: f32[2,256], index: 0, kind: input, shape index: {}]   ;;  %s1588_s1 = inlined_call_operand.vmem [shape: bf16[256,1024], index: 1, kind: input, shape index: {}]   ;;  %s1589_s2 = inlined_call_operand.vmem [shape: f32[1,1024], index: 2, kind: input, shape index: {}]   ;;  %s1590_s3 = inlined_call_operand.vmem [shape: f32[2,1024], index: 3, kind: output, shape index: {}]  }
   0x1   :  { %s1312_s14 = smov 0   ;;  %s1314_s15 = smov 0  }
   0x2   :  { %s1316_s16 = smov 0  }
   0x3 LB: > { %s25_s17 = sadd.s32 1, %s1281_s15  ;;  %p67_p1 = scmp.ne.s32.totalorder %s1273_s13, %s1269_s12  ;;  %s1285_s16 = sphi %s1316_s16, %s13_s16   ;;  %s1281_s15 = sphi %s1314_s15, %s1594_s15   ;;  %s1277_s14 = sphi %s1312_s14, %s1593_s14   ;;  %s1273_s13 = sphi %s1310_s13, %s1592_s13   ;;  %s1269_s12 = sphi %s1308_s12, %s1591_s12  }
   0x4   : > { %p27_p0 = scmp.ge.s32.totalorder %s25_s17, 2  ;;  %p68_p2 = scmp.eq.s32.totalorder %s1285_s16, 0 }
   0x5   : > { %s60_s19 = sadd.s32 1, %s1273_s13  ;;  %p1033_p5 = scmp.ge.s32.totalorder %s1285_s16, 2 }
   0x6   : > { %s1596_s17 = smov (%p27_p0, %s25_s17), 0  ;;  %p69_p3 = por %p68_p2, %p67_p1 }
   0x7   : > { %s56_s18 = ssub.s32 %s1281_s15, %s1596_s17  ;;  %154 = sbr.rel (%p1033_p5) target bundleno = 50 (0x32), region = 20 }
   0x8   : > { %p58_p4 = scmp.eq.s32.totalorder %s56_s18, 0 }
   0xa   : > { %s1343_s20 = scalar_select %p58_p4, %s1273_s13, %s60_s19  }
   0xe   : > { %157 = sbr.rel (!%p69_p3) target bundleno = 50 (0x32), region = 24  ;;  %s159_s21 = sand.u32 (%p69_p3), 1, %s1273_s13  }
   0xf   : > { %s1109_s22 = sshll.u32 (%p69_p3), %s1281_s15, 4  ;;  %s1034_s23 = sshll.u32 (%p69_p3), %s159_s21, 9 }
  0x10   : > { %s1351_s26 = scalar_lea.vmem (%p69_p3), %s1588_s1, %s1109_s22  ;;  %s1356_s27 = scalar_lea.vmem (%p69_p3), [#allocation3], %s1034_s23 }
  0x11   : > { %v180_v0 = vld [vmem:[%s1351_s26] sm:$0xff] (%p69_p3)  ;;  %v182_v1 = vld [vmem:[%s1351_s26 + $0x8] sm:$0xff] (%p69_p3) }
  0x12   : > { %v184_v2 = vld [vmem:[%s1351_s26 + $0x20] sm:$0xff] (%p69_p3)  ;;  %181 = vst [vmem:[%s1356_s27] sm:$0xff] (%p69_p3), %v180_v0  ;;  %183 = vst [vmem:[%s1356_s27 + $0x8] sm:$0xff] (%p69_p3), %v182_v1  ;;  %v186_v3 = vld [vmem:[%s1351_s26 + $0x28] sm:$0xff] (%p69_p3) }
  0x13   : > { %185 = vst [vmem:[%s1356_s27 + $0x10] sm:$0xff] (%p69_p3), %v184_v2  ;;  %v188_v4 = vld [vmem:[%s1351_s26 + $0x40] sm:$0xff] (%p69_p3)  ;;  %v190_v5 = vld [vmem:[%s1351_s26 + $0x48] sm:$0xff] (%p69_p3)  ;;  %187 = vst [vmem:[%s1356_s27 + $0x18] sm:$0xff] (%p69_p3), %v186_v3 }
  0x14   : > { %189 = vst [vmem:[%s1356_s27 + $0x20] sm:$0xff] (%p69_p3), %v188_v4  ;;  %191 = vst [vmem:[%s1356_s27 + $0x28] sm:$0xff] (%p69_p3), %v190_v5  ;;  %v192_v6 = vld [vmem:[%s1351_s26 + $0x60] sm:$0xff] (%p69_p3)  ;;  %v194_v7 = vld [vmem:[%s1351_s26 + $0x68] sm:$0xff] (%p69_p3) }
  0x15   : > { %v196_v8 = vld [vmem:[%s1351_s26 + $0x80] sm:$0xff]  ;;  %193 = vst [vmem:[%s1356_s27 + $0x30] sm:$0xff] %v192_v6  ;;  %195 = vst [vmem:[%s1356_s27 + $0x38] sm:$0xff] %v194_v7  ;;  %v198_v9 = vld [vmem:[%s1351_s26 + $0x88] sm:$0xff] }
  0x16   : > { %197 = vst [vmem:[%s1356_s27 + $0x40] sm:$0xff] %v196_v8  ;;  %v200_v10 = vld [vmem:[%s1351_s26 + $0xa0] sm:$0xff]  ;;  %v202_v11 = vld [vmem:[%s1351_s26 + $0xa8] sm:$0xff]  ;;  %199 = vst [vmem:[%s1356_s27 + $0x48] sm:$0xff] %v198_v9 }
  0x17   : > { %201 = vst [vmem:[%s1356_s27 + $0x50] sm:$0xff] %v200_v10  ;;  %203 = vst [vmem:[%s1356_s27 + $0x58] sm:$0xff] %v202_v11  ;;  %v204_v12 = vld [vmem:[%s1351_s26 + $0xc0] sm:$0xff]  ;;  %v206_v13 = vld [vmem:[%s1351_s26 + $0xc8] sm:$0xff] }
  0x18   : > { %v208_v14 = vld [vmem:[%s1351_s26 + $0xe0] sm:$0xff]  ;;  %205 = vst [vmem:[%s1356_s27 + $0x60] sm:$0xff] %v204_v12  ;;  %207 = vst [vmem:[%s1356_s27 + $0x68] sm:$0xff] %v206_v13  ;;  %v210_v15 = vld [vmem:[%s1351_s26 + $0xe8] sm:$0xff] }
  0x19   : > { %209 = vst [vmem:[%s1356_s27 + $0x70] sm:$0xff] %v208_v14  ;;  %v212_v16 = vld [vmem:[%s1351_s26 + $0x100] sm:$0xff]  ;;  %v214_v17 = vld [vmem:[%s1351_s26 + $0x108] sm:$0xff]  ;;  %211 = vst [vmem:[%s1356_s27 + $0x78] sm:$0xff] %v210_v15 }
  0x1a   : > { %213 = vst [vmem:[%s1356_s27 + $0x80] sm:$0xff] %v212_v16  ;;  %215 = vst [vmem:[%s1356_s27 + $0x88] sm:$0xff] %v214_v17  ;;  %v216_v18 = vld [vmem:[%s1351_s26 + $0x120] sm:$0xff]  ;;  %v218_v19 = vld [vmem:[%s1351_s26 + $0x128] sm:$0xff] }
  0x1b   : > { %v220_v20 = vld [vmem:[%s1351_s26 + $0x140] sm:$0xff]  ;;  %217 = vst [vmem:[%s1356_s27 + $0x90] sm:$0xff] %v216_v18  ;;  %219 = vst [vmem:[%s1356_s27 + $0x98] sm:$0xff] %v218_v19  ;;  %v222_v21 = vld [vmem:[%s1351_s26 + $0x148] sm:$0xff] }
  0x1c   : > { %221 = vst [vmem:[%s1356_s27 + $0xa0] sm:$0xff] %v220_v20  ;;  %v224_v22 = vld [vmem:[%s1351_s26 + $0x160] sm:$0xff]  ;;  %v226_v23 = vld [vmem:[%s1351_s26 + $0x168] sm:$0xff]  ;;  %223 = vst [vmem:[%s1356_s27 + $0xa8] sm:$0xff] %v222_v21 }
  0x1d   : > { %225 = vst [vmem:[%s1356_s27 + $0xb0] sm:$0xff] %v224_v22  ;;  %227 = vst [vmem:[%s1356_s27 + $0xb8] sm:$0xff] %v226_v23  ;;  %v228_v24 = vld [vmem:[%s1351_s26 + $0x180] sm:$0xff]  ;;  %v230_v25 = vld [vmem:[%s1351_s26 + $0x188] sm:$0xff] }
  0x1e   : > { %v232_v26 = vld [vmem:[%s1351_s26 + $0x1a0] sm:$0xff]  ;;  %229 = vst [vmem:[%s1356_s27 + $0xc0] sm:$0xff] %v228_v24  ;;  %231 = vst [vmem:[%s1356_s27 + $0xc8] sm:$0xff] %v230_v25  ;;  %v234_v27 = vld [vmem:[%s1351_s26 + $0x1a8] sm:$0xff] }
  0x1f   : > { %233 = vst [vmem:[%s1356_s27 + $0xd0] sm:$0xff] %v232_v26  ;;  %v236_v28 = vld [vmem:[%s1351_s26 + $0x1c0] sm:$0xff]  ;;  %v238_v29 = vld [vmem:[%s1351_s26 + $0x1c8] sm:$0xff]  ;;  %235 = vst [vmem:[%s1356_s27 + $0xd8] sm:$0xff] %v234_v27 }
  0x20   : > { %237 = vst [vmem:[%s1356_s27 + $0xe0] sm:$0xff] %v236_v28  ;;  %239 = vst [vmem:[%s1356_s27 + $0xe8] sm:$0xff] %v238_v29  ;;  %v240_v30 = vld [vmem:[%s1351_s26 + $0x1e0] sm:$0xff]  ;;  %v242_v31 = vld [vmem:[%s1351_s26 + $0x1e8] sm:$0xff] }
  0x21   : > { %v244_v32 = vld [vmem:[%s1351_s26 + $0x200] sm:$0xff]  ;;  %241 = vst [vmem:[%s1356_s27 + $0xf0] sm:$0xff] %v240_v30  ;;  %243 = vst [vmem:[%s1356_s27 + $0xf8] sm:$0xff] %v242_v31  ;;  %v246_v33 = vld [vmem:[%s1351_s26 + $0x208] sm:$0xff] }
  0x22   : > { %245 = vst [vmem:[%s1356_s27 + $0x100] sm:$0xff] %v244_v32  ;;  %v248_v34 = vld [vmem:[%s1351_s26 + $0x220] sm:$0xff]  ;;  %v250_v35 = vld [vmem:[%s1351_s26 + $0x228] sm:$0xff]  ;;  %247 = vst [vmem:[%s1356_s27 + $0x108] sm:$0xff] %v246_v33 }
  0x23   : > { %249 = vst [vmem:[%s1356_s27 + $0x110] sm:$0xff] %v248_v34  ;;  %251 = vst [vmem:[%s1356_s27 + $0x118] sm:$0xff] %v250_v35  ;;  %v252_v36 = vld [vmem:[%s1351_s26 + $0x240] sm:$0xff]  ;;  %v254_v37 = vld [vmem:[%s1351_s26 + $0x248] sm:$0xff] }
  0x24   : > { %v256_v38 = vld [vmem:[%s1351_s26 + $0x260] sm:$0xff]  ;;  %253 = vst [vmem:[%s1356_s27 + $0x120] sm:$0xff] %v252_v36  ;;  %255 = vst [vmem:[%s1356_s27 + $0x128] sm:$0xff] %v254_v37  ;;  %v258_v39 = vld [vmem:[%s1351_s26 + $0x268] sm:$0xff] }
  0x25   : > { %257 = vst [vmem:[%s1356_s27 + $0x130] sm:$0xff] %v256_v38  ;;  %v260_v40 = vld [vmem:[%s1351_s26 + $0x280] sm:$0xff]  ;;  %v262_v41 = vld [vmem:[%s1351_s26 + $0x288] sm:$0xff]  ;;  %259 = vst [vmem:[%s1356_s27 + $0x138] sm:$0xff] %v258_v39 }
  0x26   : > { %261 = vst [vmem:[%s1356_s27 + $0x140] sm:$0xff] %v260_v40  ;;  %263 = vst [vmem:[%s1356_s27 + $0x148] sm:$0xff] %v262_v41  ;;  %v264_v42 = vld [vmem:[%s1351_s26 + $0x2a0] sm:$0xff]  ;;  %v266_v43 = vld [vmem:[%s1351_s26 + $0x2a8] sm:$0xff] }
  0x27   : > { %v268_v44 = vld [vmem:[%s1351_s26 + $0x2c0] sm:$0xff]  ;;  %265 = vst [vmem:[%s1356_s27 + $0x150] sm:$0xff] %v264_v42  ;;  %267 = vst [vmem:[%s1356_s27 + $0x158] sm:$0xff] %v266_v43  ;;  %v270_v45 = vld [vmem:[%s1351_s26 + $0x2c8] sm:$0xff] }
  0x28   : > { %269 = vst [vmem:[%s1356_s27 + $0x160] sm:$0xff] %v268_v44  ;;  %v272_v46 = vld [vmem:[%s1351_s26 + $0x2e0] sm:$0xff]  ;;  %v274_v47 = vld [vmem:[%s1351_s26 + $0x2e8] sm:$0xff]  ;;  %271 = vst [vmem:[%s1356_s27 + $0x168] sm:$0xff] %v270_v45 }
  0x29   : > { %273 = vst [vmem:[%s1356_s27 + $0x170] sm:$0xff] %v272_v46  ;;  %275 = vst [vmem:[%s1356_s27 + $0x178] sm:$0xff] %v274_v47  ;;  %v276_v48 = vld [vmem:[%s1351_s26 + $0x300] sm:$0xff]  ;;  %v278_v49 = vld [vmem:[%s1351_s26 + $0x308] sm:$0xff] }
  0x2a   : > { %v280_v50 = vld [vmem:[%s1351_s26 + $0x320] sm:$0xff]  ;;  %277 = vst [vmem:[%s1356_s27 + $0x180] sm:$0xff] %v276_v48  ;;  %279 = vst [vmem:[%s1356_s27 + $0x188] sm:$0xff] %v278_v49  ;;  %v282_v51 = vld [vmem:[%s1351_s26 + $0x328] sm:$0xff] }
  0x2b   : > { %281 = vst [vmem:[%s1356_s27 + $0x190] sm:$0xff] %v280_v50  ;;  %v284_v52 = vld [vmem:[%s1351_s26 + $0x340] sm:$0xff]  ;;  %v286_v53 = vld [vmem:[%s1351_s26 + $0x348] sm:$0xff]  ;;  %283 = vst [vmem:[%s1356_s27 + $0x198] sm:$0xff] %v282_v51 }
  0x2c   : > { %285 = vst [vmem:[%s1356_s27 + $0x1a0] sm:$0xff] %v284_v52  ;;  %287 = vst [vmem:[%s1356_s27 + $0x1a8] sm:$0xff] %v286_v53  ;;  %v288_v54 = vld [vmem:[%s1351_s26 + $0x360] sm:$0xff]  ;;  %v290_v55 = vld [vmem:[%s1351_s26 + $0x368] sm:$0xff] }
  0x2d   : > { %v292_v56 = vld [vmem:[%s1351_s26 + $0x380] sm:$0xff]  ;;  %289 = vst [vmem:[%s1356_s27 + $0x1b0] sm:$0xff] %v288_v54  ;;  %291 = vst [vmem:[%s1356_s27 + $0x1b8] sm:$0xff] %v290_v55  ;;  %v294_v57 = vld [vmem:[%s1351_s26 + $0x388] sm:$0xff] }
  0x2e   : > { %293 = vst [vmem:[%s1356_s27 + $0x1c0] sm:$0xff] %v292_v56  ;;  %v296_v58 = vld [vmem:[%s1351_s26 + $0x3a0] sm:$0xff]  ;;  %v298_v59 = vld [vmem:[%s1351_s26 + $0x3a8] sm:$0xff]  ;;  %295 = vst [vmem:[%s1356_s27 + $0x1c8] sm:$0xff] %v294_v57 }
  0x2f   : > { %297 = vst [vmem:[%s1356_s27 + $0x1d0] sm:$0xff] %v296_v58  ;;  %299 = vst [vmem:[%s1356_s27 + $0x1d8] sm:$0xff] %v298_v59  ;;  %v300_v60 = vld [vmem:[%s1351_s26 + $0x3c0] sm:$0xff]  ;;  %v302_v61 = vld [vmem:[%s1351_s26 + $0x3c8] sm:$0xff] }
  0x30   : > { %v304_v62 = vld [vmem:[%s1351_s26 + $0x3e0] sm:$0xff]  ;;  %301 = vst [vmem:[%s1356_s27 + $0x1e0] sm:$0xff] %v300_v60  ;;  %303 = vst [vmem:[%s1356_s27 + $0x1e8] sm:$0xff] %v302_v61  ;;  %v306_v63 = vld [vmem:[%s1351_s26 + $0x3e8] sm:$0xff] }
  0x31   : > { %305 = vst [vmem:[%s1356_s27 + $0x1f0] sm:$0xff] %v304_v62  ;;  %307 = vst [vmem:[%s1356_s27 + $0x1f8] sm:$0xff] %v306_v63 }
  0x32 PF: > { %p1037_p6 = scmp.ge.s32.totalorder %s1285_s16, 1  ;;  %p320_p7 = scmp.lt.s32.totalorder %s1285_s16, 3 }
  0x34   : > { %p321_p8 = pnand %p1037_p6, %p320_p7 }
  0x35   : > { %s327_s28 = sand.u32 (!%p321_p8), 1, %s1269_s12   ;;  %v1489_v0 = vld.sshfl [vmem:[%s1587_s0] sm:$0x33 pattern:$0x76325410] (!%p321_p8)  ;;  %s1039_s6 = sshll.u32 (!%p321_p8), %s1277_s14, 2 }
  0x36   : > { %324 = sbr.rel (%p321_p8) target bundleno = 346 (0x15a), region = 51  ;;  %s1038_s4 = sshll.u32 (!%p321_p8), %s327_s28, 9  ;;  %v393_v1 = vcombine.high (!%p321_p8), %v1489_v0, %v1489_v0 }
  0x37   : > { %s1493_s5 = scalar_lea.vmem (!%p321_p8), [#allocation3], %s1038_s4  ;;  %p368_p9 = scmp.lt.s32.totalorder (!%p321_p8), %s1039_s6, 7 }
  0x38   : > { %v1151_v2 = vld [vmem:[%s1493_s5 + $0x4] ss:$16 sps:$4 sm:$0xff] (!%p321_p8)   ;;  %v397_v3 = vpack.c.bf16 (!%p321_p8), %v393_v1, %v393_v1  ;;  %v1153_v4 = vld [vmem:[%s1493_s5 + $0xc] ss:$16 sps:$4 sm:$0xff] (!%p321_p8)   ;;  %v1155_v5 = vld [vmem:[%s1493_s5] ss:$16 sps:$4 sm:$0xff] (!%p321_p8)  }
  0x39   : > { %782 = vmatprep.subr.bf16.mxu0 (!%p321_p8), %v1151_v2  ;;  %v1156_v6 = vld [vmem:[%s1493_s5 + $0x8] ss:$16 sps:$4 sm:$0xff] (!%p321_p8)   ;;  %823 = vmatprep.subr.bf16.mxu1 (!%p321_p8), %v1153_v4  ;;  %v1157_v7 = vld [vmem:[%s1493_s5 + $0x24] ss:$16 sps:$4 sm:$0xff] (!%p321_p8)   ;;  %v1159_v8 = vld [vmem:[%s1493_s5 + $0x2c] ss:$16 sps:$4 sm:$0xff] (!%p321_p8)   ;;  %v396_v4 = vpack.c.bf16 (!%p321_p8), %v1489_v0, %v1489_v0 }
  0x3a   : > { %814 = vmatprep.mubr.bf16.mxu0 (!%p321_p8), %v397_v3  ;;  %855 = vmatprep.mubr.bf16.mxu1 (!%p321_p8), %v397_v3  ;;  %v1161_v9 = vld [vmem:[%s1493_s5 + $0x20] ss:$16 sps:$4 sm:$0xff] (!%p321_p8)   ;;  %v1162_v10 = vld [vmem:[%s1493_s5 + $0x28] ss:$16 sps:$4 sm:$0xff] (!%p321_p8)   ;;  %v1163_v11 = vld [vmem:[%s1493_s5 + $0x44] ss:$16 sps:$4 sm:$0xff] (!%p321_p8)  }
  0x3b   : > { %783 = vmatpush1.bf16.msra.mxu0 (!%p321_p8), %v1155_v5  ;;  %824 = vmatpush1.bf16.msra.mxu1 (!%p321_p8), %v1156_v6  ;;  %v1165_v12 = vld [vmem:[%s1493_s5 + $0x4c] ss:$16 sps:$4 sm:$0xff] (!%p321_p8)   ;;  %v1167_v13 = vld [vmem:[%s1493_s5 + $0x40] ss:$16 sps:$4 sm:$0xff] (!%p321_p8)   ;;  %v1168_v14 = vld [vmem:[%s1493_s5 + $0x48] ss:$16 sps:$4 sm:$0xff] (!%p321_p8)   ;;  %v873_v5 = vlaneseq (!%p321_p8) }
  0x3c   : > { %784 = vmatprep.subr.bf16.mxu0 (!%p321_p8), %v1157_v7  ;;  %825 = vmatprep.subr.bf16.mxu1 (!%p321_p8), %v1159_v8  ;;  %v1169_v15 = vld [vmem:[%s1493_s5 + $0x64] ss:$16 sps:$4 sm:$0xff] (!%p321_p8)   ;;  %v1171_v16 = vld [vmem:[%s1493_s5 + $0x6c] ss:$16 sps:$4 sm:$0xff] (!%p321_p8)   ;;  %v1173_v17 = vld [vmem:[%s1493_s5 + $0x60] ss:$16 sps:$4 sm:$0xff] (!%p321_p8)  }
  0x3d   : > { %v1174_v18 = vld [vmem:[%s1493_s5 + $0x68] ss:$16 sps:$4 sm:$0xff]   ;;  %v1175_v19 = vld [vmem:[%s1493_s5 + $0x84] ss:$16 sps:$4 sm:$0xff]   ;;  %v1177_v20 = vld [vmem:[%s1493_s5 + $0x8c] ss:$16 sps:$4 sm:$0xff]  }
  0x3e   : > { %v1179_v21 = vld [vmem:[%s1493_s5 + $0x80] ss:$16 sps:$4 sm:$0xff]   ;;  %v1180_v22 = vld [vmem:[%s1493_s5 + $0x88] ss:$16 sps:$4 sm:$0xff]   ;;  %v1181_v23 = vld [vmem:[%s1493_s5 + $0xa4] ss:$16 sps:$4 sm:$0xff]  }
  0x3f   : > { %785 = vmatpush1.bf16.msra.mxu0 %v1161_v9  ;;  %826 = vmatpush1.bf16.msra.mxu1 %v1162_v10  ;;  %v1183_v24 = vld [vmem:[%s1493_s5 + $0xac] ss:$16 sps:$4 sm:$0xff]   ;;  %v1185_v25 = vld [vmem:[%s1493_s5 + $0xa0] ss:$16 sps:$4 sm:$0xff]   ;;  %v1186_v26 = vld [vmem:[%s1493_s5 + $0xa8] ss:$16 sps:$4 sm:$0xff]  }
  0x40   : > { %786 = vmatprep.subr.bf16.mxu0 %v1163_v11  ;;  %827 = vmatprep.subr.bf16.mxu1 %v1165_v12  ;;  %v1187_v27 = vld [vmem:[%s1493_s5 + $0xc4] ss:$16 sps:$4 sm:$0xff]   ;;  %v1189_v28 = vld [vmem:[%s1493_s5 + $0xcc] ss:$16 sps:$4 sm:$0xff]   ;;  %v1191_v29 = vld [vmem:[%s1493_s5 + $0xc0] ss:$16 sps:$4 sm:$0xff]  }
  0x41   : > { %v1192_v30 = vld [vmem:[%s1493_s5 + $0xc8] ss:$16 sps:$4 sm:$0xff]   ;;  %v1193_v31 = vld [vmem:[%s1493_s5 + $0xe4] ss:$16 sps:$4 sm:$0xff]   ;;  %v1195_v32 = vld [vmem:[%s1493_s5 + $0xec] ss:$16 sps:$4 sm:$0xff]  }
  0x42   : > { %v1197_v33 = vld [vmem:[%s1493_s5 + $0xe0] ss:$16 sps:$4 sm:$0xff]   ;;  %v1198_v34 = vld [vmem:[%s1493_s5 + $0xe8] ss:$16 sps:$4 sm:$0xff]   ;;  %v1199_v35 = vld [vmem:[%s1493_s5 + $0x104] ss:$16 sps:$4 sm:$0xff]  }
  0x43   : > { %787 = vmatpush1.bf16.msra.mxu0 %v1167_v13  ;;  %828 = vmatpush1.bf16.msra.mxu1 %v1168_v14  ;;  %v1201_v36 = vld [vmem:[%s1493_s5 + $0x10c] ss:$16 sps:$4 sm:$0xff]   ;;  %v1203_v37 = vld [vmem:[%s1493_s5 + $0x100] ss:$16 sps:$4 sm:$0xff]   ;;  %v1204_v38 = vld [vmem:[%s1493_s5 + $0x108] ss:$16 sps:$4 sm:$0xff]  }
  0x44   : > { %788 = vmatprep.subr.bf16.mxu0 %v1169_v15  ;;  %829 = vmatprep.subr.bf16.mxu1 %v1171_v16  ;;  %v1205_v39 = vld [vmem:[%s1493_s5 + $0x124] ss:$16 sps:$4 sm:$0xff]   ;;  %v1207_v40 = vld [vmem:[%s1493_s5 + $0x12c] ss:$16 sps:$4 sm:$0xff]   ;;  %v1209_v41 = vld [vmem:[%s1493_s5 + $0x120] ss:$16 sps:$4 sm:$0xff]  }
  0x45   : > { %v1210_v42 = vld [vmem:[%s1493_s5 + $0x128] ss:$16 sps:$4 sm:$0xff]   ;;  %v1211_v43 = vld [vmem:[%s1493_s5 + $0x144] ss:$16 sps:$4 sm:$0xff]   ;;  %v1213_v44 = vld [vmem:[%s1493_s5 + $0x14c] ss:$16 sps:$4 sm:$0xff]  }
  0x46   : > { %v1215_v45 = vld [vmem:[%s1493_s5 + $0x140] ss:$16 sps:$4 sm:$0xff]   ;;  %v1216_v46 = vld [vmem:[%s1493_s5 + $0x148] ss:$16 sps:$4 sm:$0xff]   ;;  %v1217_v47 = vld [vmem:[%s1493_s5 + $0x164] ss:$16 sps:$4 sm:$0xff]  }
  0x47   : > { %789 = vmatpush1.bf16.msra.mxu0 %v1173_v17  ;;  %830 = vmatpush1.bf16.msra.mxu1 %v1174_v18  ;;  %v1219_v48 = vld [vmem:[%s1493_s5 + $0x16c] ss:$16 sps:$4 sm:$0xff]   ;;  %v1221_v49 = vld [vmem:[%s1493_s5 + $0x160] ss:$16 sps:$4 sm:$0xff]   ;;  %v1222_v50 = vld [vmem:[%s1493_s5 + $0x168] ss:$16 sps:$4 sm:$0xff]  }
  0x48   : > { %790 = vmatprep.subr.bf16.mxu0 %v1175_v19  ;;  %831 = vmatprep.subr.bf16.mxu1 %v1177_v20  ;;  %v1223_v51 = vld [vmem:[%s1493_s5 + $0x184] ss:$16 sps:$4 sm:$0xff]   ;;  %v1225_v52 = vld [vmem:[%s1493_s5 + $0x18c] ss:$16 sps:$4 sm:$0xff]   ;;  %v1227_v53 = vld [vmem:[%s1493_s5 + $0x180] ss:$16 sps:$4 sm:$0xff]  }
  0x49   : > { %v1228_v54 = vld [vmem:[%s1493_s5 + $0x188] ss:$16 sps:$4 sm:$0xff]   ;;  %v1229_v55 = vld [vmem:[%s1493_s5 + $0x1a4] ss:$16 sps:$4 sm:$0xff]   ;;  %v1231_v56 = vld [vmem:[%s1493_s5 + $0x1ac] ss:$16 sps:$4 sm:$0xff]  }
  0x4a   : > { %v1233_v57 = vld [vmem:[%s1493_s5 + $0x1a0] ss:$16 sps:$4 sm:$0xff]   ;;  %v1234_v58 = vld [vmem:[%s1493_s5 + $0x1a8] ss:$16 sps:$4 sm:$0xff]   ;;  %v1235_v59 = vld [vmem:[%s1493_s5 + $0x1c4] ss:$16 sps:$4 sm:$0xff]  }
  0x4b   : > { %791 = vmatpush1.bf16.msra.mxu0 %v1179_v21  ;;  %832 = vmatpush1.bf16.msra.mxu1 %v1180_v22  ;;  %v1237_v60 = vld [vmem:[%s1493_s5 + $0x1cc] ss:$16 sps:$4 sm:$0xff]   ;;  %v1239_v61 = vld [vmem:[%s1493_s5 + $0x1c0] ss:$16 sps:$4 sm:$0xff]   ;;  %v1240_v62 = vld [vmem:[%s1493_s5 + $0x1c8] ss:$16 sps:$4 sm:$0xff]  }
  0x4c   : > { %792 = vmatprep.subr.bf16.mxu0 %v1181_v23  ;;  %833 = vmatprep.subr.bf16.mxu1 %v1183_v24  ;;  %v1241_v63 = vld [vmem:[%s1493_s5 + $0x1e4] ss:$16 sps:$4 sm:$0xff]   ;;  %v1243_v1 = vld [vmem:[%s1493_s5 + $0x1ec] ss:$16 sps:$4 sm:$0xff]   ;;  %v1245_v2 = vld [vmem:[%s1493_s5 + $0x1e0] ss:$16 sps:$4 sm:$0xff]  }
  0x4d   : > { %v1246_v3 = vld [vmem:[%s1493_s5 + $0x1e8] ss:$16 sps:$4 sm:$0xff]   ;;  %s1598_s6 = smov (!%p368_p9, %s1039_s6), 7  ;;  %v874_v6 = vshrl.u32 %v873_v5, 7  ;;  %v1287_v7 = vmov 1983009808  }
  0x4e   : > { %s370_s9 = scalar_lea.vmem %s1589_s2, %s1598_s6  ;;  %v871_v8 = vunpack.c.l.s4 %v1287_v7  ;;  %s1041_s10 = sshll.u32 %s1598_s6, 1 }
  0x4f   : > { %793 = vmatpush1.bf16.msra.mxu0 %v1185_v25  ;;  %834 = vmatpush1.bf16.msra.mxu1 %v1186_v26  ;;  %v896_v9 = vsub.s32 0, %v874_v6  ;;  %v900_v10 = vsub.s32 1, %v874_v6  ;;  %v904_v0 = vsub.s32 2, %v874_v6  ;;  %v908_v11 = vsub.s32 3, %v874_v6  ;;  %v892_v12 = vld [vmem:[%s370_s9] sm:$0xf]  ;;  %s376_s14 = scalar_lea.vmem %s1590_s3, %s1041_s10 }
  0x50   : > { %794 = vmatprep.subr.bf16.mxu0 %v1187_v27  ;;  %835 = vmatprep.subr.bf16.mxu1 %v1189_v28  ;;  %v872_v13 = vunpack.c.0.s8 %v871_v8 }
  0x51   : > { %v897_v14 = vrot.slane %v892_v12, %v896_v9  ;;  %v901_v15 = vrot.slane %v892_v12, %v900_v10  ;;  %v905_v16 = vrot.slane %v892_v12, %v904_v0  ;;  %v909_v17 = vrot.slane %v892_v12, %v908_v11 }
  0x52   : > { %v875_v18 = vsub.s32 %v872_v13, %v874_v6 }
  0x53   : > { %795 = vmatpush1.bf16.msra.mxu0 %v1191_v29  ;;  %836 = vmatpush1.bf16.msra.mxu1 %v1192_v30  ;;  %v910_v19 = vcombine.low %v897_v14, %v901_v15  ;;  %v911_v20 = vcombine.low %v905_v16, %v909_v17 }
  0x54   : > { %796 = vmatprep.subr.bf16.mxu0 %v1193_v31  ;;  %837 = vmatprep.subr.bf16.mxu1 %v1195_v32 }
  0x55   : > { %v918_v23 = vrot.slane %v910_v19, %v875_v18  ;;  %v925_v24 = vrot.slane %v911_v20, %v875_v18 }
  0x57   : > { %797 = vmatpush1.bf16.msra.mxu0 %v1197_v33  ;;  %838 = vmatpush1.bf16.msra.mxu1 %v1198_v34 }
  0x58   : > { %798 = vmatprep.subr.bf16.mxu0 %v1199_v35  ;;  %839 = vmatprep.subr.bf16.mxu1 %v1201_v36  ;;  %v926_v35 = vcombine.low %v918_v23, %v925_v24 }
  0x5b   : > { %799 = vmatpush1.bf16.msra.mxu0 %v1203_v37  ;;  %840 = vmatpush1.bf16.msra.mxu1 %v1204_v38 }
  0x5c   : > { %800 = vmatprep.subr.bf16.mxu0 %v1205_v39  ;;  %841 = vmatprep.subr.bf16.mxu1 %v1207_v40 }
  0x5f   : > { %801 = vmatpush1.bf16.msra.mxu0 %v1209_v41  ;;  %842 = vmatpush1.bf16.msra.mxu1 %v1210_v42 }
  0x60   : > { %802 = vmatprep.subr.bf16.mxu0 %v1211_v43  ;;  %843 = vmatprep.subr.bf16.mxu1 %v1213_v44 }
  0x63   : > { %803 = vmatpush1.bf16.msra.mxu0 %v1215_v45  ;;  %844 = vmatpush1.bf16.msra.mxu1 %v1216_v46 }
  0x64   : > { %804 = vmatprep.subr.bf16.mxu0 %v1217_v47  ;;  %845 = vmatprep.subr.bf16.mxu1 %v1219_v48 }
  0x67   : > { %805 = vmatpush1.bf16.msra.mxu0 %v1221_v49  ;;  %846 = vmatpush1.bf16.msra.mxu1 %v1222_v50 }
  0x68   : > { %806 = vmatprep.subr.bf16.mxu0 %v1223_v51  ;;  %847 = vmatprep.subr.bf16.mxu1 %v1225_v52 }
  0x6b   : > { %807 = vmatpush1.bf16.msra.mxu0 %v1227_v53  ;;  %848 = vmatpush1.bf16.msra.mxu1 %v1228_v54 }
  0x6c   : > { %808 = vmatprep.subr.bf16.mxu0 %v1229_v55  ;;  %849 = vmatprep.subr.bf16.mxu1 %v1231_v56 }
  0x6f   : > { %809 = vmatpush1.bf16.msra.mxu0 %v1233_v57  ;;  %850 = vmatpush1.bf16.msra.mxu1 %v1234_v58 }
  0x70   : > { %810 = vmatprep.subr.bf16.mxu0 %v1235_v59  ;;  %851 = vmatprep.subr.bf16.mxu1 %v1237_v60 }
  0x73   : > { %811 = vmatpush1.bf16.msra.mxu0 %v1239_v61  ;;  %852 = vmatpush1.bf16.msra.mxu1 %v1240_v62 }
  0x74   : > { %812 = vmatprep.subr.bf16.mxu0 %v1241_v63  ;;  %853 = vmatprep.subr.bf16.mxu1 %v1243_v1 }
  0x77   : > { %813 = vmatpush1.bf16.msra.mxu0 %v1245_v2  ;;  %854 = vmatpush1.bf16.msra.mxu1 %v1246_v3 }
  0x7a   : > { %815 = vmatmul.mubr.bf16.vlgmr.msra.gmra.mrb[0].mxu0 %v396_v4  ;;  %856 = vmatmul.mubr.bf16.vlgmr.msra.gmra.mrb[0].mxu1 %v396_v4 }
 0x14d   : > { %v816_v21 = vpop.f32.mrb[0].mxu0  ;;  %v857_v22 = vpop.f32.mrb[0].mxu1 }
 0x14e   : > { %v818_v25 = vpop.f32.mrb[1].mxu0  ;;  %v859_v26 = vpop.f32.mrb[1].mxu1 }
 0x14f   : > { %v868_v27 = vcombine.low %v816_v21, %v818_v25  ;;  %v869_v28 = vcombine.low %v857_v22, %v859_v26  ;;  %v820_v29 = vpop.f32.mrb[2].mxu0  ;;  %v861_v30 = vpop.f32.mrb[2].mxu1 }
 0x150   : > { %v821_v31 = vpop.f32.mrb[3].mxu0  ;;  %v862_v32 = vpop.f32.mrb[3].mxu1 }
 0x151   : > { %v876_v33 = vrot.slane %v868_v27, %v875_v18  ;;  %v883_v34 = vrot.slane %v869_v28, %v875_v18 }
 0x153   : > { %v884_v36 = vcombine.low %v876_v33, %v883_v34 }
 0x155   : > { %v928_v37 = vadd.f32 %v926_v35, %v884_v36 }
 0x157   : > { %v929_v38 = vmax.f32 %v928_v37, 0.0 }
 0x159   : > { %930 = vst [vmem:[%s376_s14] sm:$0xff] %v929_v38 }
 0x15a PF: > { %s13_s16 = sadd.s32 1, %s1285_s16   ;;  %s1591_s12 = smov %s1273_s13 }
 0x15b   : > { %p10_p10 = scmp.ge.s32.totalorder %s13_s16, 4   ;;  %s1592_s13 = smov %s1343_s20 }
 0x15c   : > { %s1593_s14 = smov %s1281_s15  ;;  %s1594_s15 = smov %s1596_s17 }
 0x15d   :  { %12 = sbr.rel (!%p10_p10) target bundleno = 3 (0x3), region = 104 }

// kernel: vgg_forward.6
= control target key start
LH: loop header
LB: loop body
LE: loop exit
PB: predicated region body
PF: predicated region fallthrough
CT: control target
= control target key end

     0   :  { %s1046_s18 = smov 0   ;;  %s1322_s0 = inlined_call_operand.vmem [shape: f32[2,8,8,8], index: 0, kind: input, shape index: {}]   ;;  %s1323_s1 = inlined_call_operand.vmem [shape: bf16[72,16], index: 1, kind: input, shape index: {}]   ;;  %s1324_s2 = inlined_call_operand.vmem [shape: f32[1,16], index: 2, kind: input, shape index: {}]   ;;  %s1325_s3 = inlined_call_operand.vmem [shape: f32[1,16], index: 3, kind: input, shape index: {}]   ;;  %s1326_s4 = inlined_call_operand.vmem [shape: f32[1,16], index: 4, kind: input, shape index: {}]   ;;  %s1327_s5 = inlined_call_operand.vmem [shape: f32[2,8,8,16], index: 5, kind: output, shape index: {}]  }
   0x1 LB: > { %s913_s19 = sadd.s32 4294967295, %s1005_s18   ;;  %p917_p0 = scmp.ge.s32.totalorder %s1005_s18, 1  ;;  %s1005_s18 = sphi %s1046_s18, %s15_s18  }
   0x2   : > { %p187_p1 = scmp.lt.s32.totalorder %s1005_s18, 3 }
   0x4   : > { %p188_p2 = pnand %p917_p0, %p187_p1 }
   0x5   : > { %vm226_vm0 = vcmask (!%p188_p2), 64512   ;;  %vm228_vm1 = vcmask (!%p188_p2), 58368   ;;  %p1054_p3 = scmp.lt.s32.totalorder (!%p188_p2), %s913_s19, 1  ;;  %v1007_v0 = vmov (!%p188_p2), 0.0   ;;  %s1008_s25 = smov (!%p188_p2), 8   ;;  %v994_v37 = vld [vmem:[%s1323_s1] sm:$0xff] (!%p188_p2)  }
   0x6   : > { %191 = sbr.rel (%p188_p2) target bundleno = 498 (0x1f2), region = 40  ;;  %227 = vst.msk [vmem:[#allocation2] sm:$0xff] (!%p188_p2), %vm226_vm0, %v1007_v0  ;;  %230 = vst.msk [vmem:[#allocation2 + $0x10] sm:$0xff] (!%p188_p2), %vm226_vm0, %v1007_v0  ;;  %s1009_s26 = smov (!%p188_p2), 16   ;;  %947 = vmatprep.subr.bf16.mxu0 (!%p188_p2), %v994_v37  ;;  %965 = vmatprep.subr.bf16.mxu1 (!%p188_p2), %v994_v37  ;;  %v995_v38 = vld [vmem:[%s1323_s1 + $0x8] sm:$0xff] (!%p188_p2)   ;;  %v996_v39 = vld [vmem:[%s1323_s1 + $0x10] sm:$0xff] (!%p188_p2)  }
   0x7   : > { %229 = vst.msk [vmem:[#allocation2 + $0x8] sm:$0x3] (!%p188_p2), %vm228_vm1, %v1007_v0  ;;  %231 = vst.msk [vmem:[#allocation2 + $0x18] sm:$0x3] (!%p188_p2), %vm228_vm1, %v1007_v0  ;;  %s1010_s27 = smov (!%p188_p2), 24   ;;  %s1011_s28 = smov (!%p188_p2), 32   ;;  %948 = vmatpush3.bf16.msra.mxu0 (!%p188_p2), %v994_v37  ;;  %970 = vmatpush3.bf16.msra.mxu1 (!%p188_p2), %v994_v37 }
   0x8   : > { %232 = vst.msk [vmem:[#allocation2 + $0x20] sm:$0xff] (!%p188_p2), %vm226_vm0, %v1007_v0  ;;  %234 = vst.msk [vmem:[#allocation2 + $0x30] sm:$0xff] (!%p188_p2), %vm226_vm0, %v1007_v0  ;;  %s1012_s29 = smov (!%p188_p2), 40   ;;  %s1013_s30 = smov (!%p188_p2), 48   ;;  %949 = vmatprep.subr.bf16.mxu0 (!%p188_p2), %v995_v38  ;;  %966 = vmatprep.subr.bf16.mxu1 (!%p188_p2), %v995_v38  ;;  %vm321_vm2 = vcmask (!%p188_p2), 130112   ;;  %v997_v41 = vld [vmem:[%s1323_s1 + $0x18] sm:$0xff] (!%p188_p2)  }
   0x9   : > { %233 = vst.msk [vmem:[#allocation2 + $0x28] sm:$0x3] (!%p188_p2), %vm228_vm1, %v1007_v0  ;;  %235 = vst.msk [vmem:[#allocation2 + $0x38] sm:$0x3] (!%p188_p2), %vm228_vm1, %v1007_v0  ;;  %s1014_s6 = smov (!%p188_p2), 56   ;;  %s1015_s15 = smov (!%p188_p2), 64  }
   0xa   : > { %236 = vst.msk [vmem:[#allocation2 + $0x40] sm:$0xff] (!%p188_p2), %vm226_vm0, %v1007_v0  ;;  %238 = vst.msk [vmem:[#allocation2 + $0x50] sm:$0xff] (!%p188_p2), %vm226_vm0, %v1007_v0  ;;  %v998_v43 = vld [vmem:[%s1323_s1 + $0x20] ss:$0 sps:$4 sm:$0xff] (!%p188_p2)   ;;  %vm742_vm3 = vcmask (!%p188_p2), 1043456   ;;  %vm370_vm4 = vcmask (!%p188_p2), 195712  }
   0xb   : > { %237 = vst.msk [vmem:[#allocation2 + $0x48] sm:$0x3] (!%p188_p2), %vm228_vm1, %v1007_v0  ;;  %239 = vst.msk [vmem:[#allocation2 + $0x58] sm:$0x3] (!%p188_p2), %vm228_vm1, %v1007_v0  ;;  %950 = vmatpush3.bf16.msra.mxu0 (!%p188_p2), %v995_v38  ;;  %971 = vmatpush3.bf16.msra.mxu1 (!%p188_p2), %v995_v38  ;;  %v744_v44 = vsel (!%p188_p2), %vm742_vm3, %v998_v43, 0  ;;  %vm419_vm5 = vcmask (!%p188_p2), 261312  }
   0xc   : > { %240 = vst.msk [vmem:[#allocation2 + $0x60] sm:$0xff] (!%p188_p2), %vm226_vm0, %v1007_v0  ;;  %242 = vst.msk [vmem:[#allocation2 + $0x70] sm:$0xff] (!%p188_p2), %vm226_vm0, %v1007_v0  ;;  %951 = vmatprep.subr.bf16.mxu0 (!%p188_p2), %v996_v39  ;;  %967 = vmatprep.subr.bf16.mxu1 (!%p188_p2), %v996_v39  ;;  %vm468_vm6 = vcmask (!%p188_p2), 326912   ;;  %vm517_vm7 = vcmask (!%p188_p2), 392512   ;;  %vm567_vm8 = vcmask (!%p188_p2), 458112   ;;  %vm616_vm9 = vcmask (!%p188_p2), 523712  }
   0xd   : > { %241 = vst.msk [vmem:[#allocation2 + $0x68] sm:$0x3] %vm228_vm1, %v1007_v0  ;;  %243 = vst.msk [vmem:[#allocation2 + $0x78] sm:$0x3] %vm228_vm1, %v1007_v0  ;;  %s1330_s19 = smov (!%p1054_p3, %s913_s19), 1  ;;  %v265_v10 = vld [vmem:[#allocation2] sm:$0xff] }
   0xe   : > { %244 = vst.msk [vmem:[#allocation2 + $0x80] sm:$0xff] %vm226_vm0, %v1007_v0  ;;  %246 = vst.msk [vmem:[#allocation2 + $0x90] sm:$0xff] %vm226_vm0, %v1007_v0  ;;  %s936_s21 = sshll.u32 %s1330_s19, 6  ;;  %v281_v7 = vld [vmem:[#allocation2 + $0x1] sm:$0xff]  ;;  %vm665_vm10 = vcmask 589312   ;;  %vm729_vm11 = vcmask 588800  }
   0xf   : > { %245 = vst.msk [vmem:[#allocation2 + $0x88] sm:$0x3] %vm228_vm1, %v1007_v0  ;;  %247 = vst.msk [vmem:[#allocation2 + $0x98] sm:$0x3] %vm228_vm1, %v1007_v0  ;;  %s219_s24 = scalar_lea.vmem %s1322_s0, %s936_s21  ;;  %297 = vrot.lane.b32.xlu0 %v281_v7, %s1008_s25  ;;  %v330_v25 = vld [vmem:[#allocation2 + $0x2] sm:$0xff]  ;;  %952 = vmatpush3.bf16.msra.mxu0 %v996_v39  ;;  %vm849_vm12 = vcmask 130048  }
  0x10   : > { %v251_v1 = vld [vmem:[%s219_s24 + $0x18] sm:$0xff]  ;;  %v252_v2 = vld [vmem:[%s219_s24 + $0x20] sm:$0xff]  ;;  %v250_v4 = vld [vmem:[%s219_s24 + $0x10] sm:$0xff]  ;;  %273 = vst.msk [vmem:[#allocation3] sm:$0xff] %vm226_vm0, %v265_v10  ;;  %972 = vmatpush3.bf16.msra.mxu1 %v996_v39  ;;  %953 = vmatprep.subr.bf16.mxu0 %v997_v41 }
  0x11   : > { %v248_v3 = vld [vmem:[%s219_s24] sm:$0xff]  ;;  %260 = vst.msk [vmem:[#allocation2 + $0x41] sm:$0xff] %vm226_vm0, %v251_v1  ;;  %261 = vst.msk [vmem:[#allocation2 + $0x51] sm:$0xff] %vm226_vm0, %v252_v2  ;;  %v249_v5 = vld [vmem:[%s219_s24 + $0x8] sm:$0xff]  ;;  %968 = vmatprep.subr.bf16.mxu1 %v997_v41 }
  0x12   : > { %257 = vst.msk [vmem:[#allocation2 + $0x11] sm:$0xff] %vm226_vm0, %v248_v3  ;;  %v254_v6 = vld [vmem:[%s219_s24 + $0x30] sm:$0xff]  ;;  %259 = vst.msk [vmem:[#allocation2 + $0x31] sm:$0xff] %vm226_vm0, %v250_v4  ;;  %v253_v8 = vld [vmem:[%s219_s24 + $0x28] sm:$0xff] }
  0x13   : > { %258 = vst.msk [vmem:[#allocation2 + $0x21] sm:$0xff] %vm226_vm0, %v249_v5  ;;  %263 = vst.msk [vmem:[#allocation2 + $0x71] sm:$0xff] %vm226_vm0, %v254_v6  ;;  %v255_v9 = vld [vmem:[%s219_s24 + $0x38] sm:$0xff]  ;;  %954 = vmatpush3.bf16.msra.mxu0 %v997_v41 }
  0x14   : > { %262 = vst.msk [vmem:[#allocation2 + $0x61] sm:$0xff] %vm226_vm0, %v253_v8  ;;  %264 = vst.msk [vmem:[#allocation2 + $0x81] sm:$0xff] %vm226_vm0, %v255_v9  ;;  %973 = vmatpush3.bf16.msra.mxu1 %v997_v41  ;;  %975 = vmatprep.subr.msk.bf16.mxu0 %vm742_vm3, %v998_v43 }
  0x15   : > { %v534_v36 = vld [vmem:[#allocation2 + $0x90] sm:$0xff]  ;;  %976 = vmatprep.subr.msk.bf16.mxu1 %vm742_vm3, %v998_v43 }
  0x16   : > { %v583_v40 = vld [vmem:[#allocation2 + $0x91] sm:$0xff] }
  0x17   : > { %956 = vmatpush3.bf16.msra.mxu0 %v744_v44  ;;  %v632_v49 = vld [vmem:[#allocation2 + $0x92] sm:$0xff] }
  0x18   : > { %v1098_v11 = vld [vmem:[#allocation2 + $0x41] sm:$0xff]  ;;  %v1103_v13 = vld [vmem:[#allocation2 + $0x51] sm:$0xff]  ;;  %974 = vmatpush3.bf16.msra.mxu1 %v744_v44 }
  0x19   : > { %v282_v12 = vld [vmem:[#allocation2 + $0x11] sm:$0xff]  ;;  %305 = vrot.lane.b32.xlu1 %v1098_v11, %s1008_s25  ;;  %v1123_v21 = vld [vmem:[#allocation2 + $0x40] sm:$0xff] }
  0x1a   : > { %299 = vrot.lane.b32.xlu0 %v282_v12, %s1008_s25  ;;  %v1105_v14 = vld [vmem:[#allocation2 + $0x21] sm:$0xff]  ;;  %v1107_v15 = vld [vmem:[#allocation2 + $0x31] sm:$0xff]  ;;  %277 = vst.msk [vmem:[#allocation3 + $0x20] sm:$0xff] %vm226_vm0, %v1123_v21 }
  0x1b   : > { %v1109_v16 = vld [vmem:[#allocation2 + $0x20] sm:$0xff]  ;;  %v379_v17 = vld [vmem:[#allocation2 + $0x10] sm:$0xff] }
  0x1c   : > { %v1115_v18 = vld [vmem:[#allocation2 + $0x60] sm:$0xff]  ;;  %v1117_v19 = vld [vmem:[#allocation2 + $0x50] sm:$0xff]  ;;  %275 = vst.msk [vmem:[#allocation3 + $0x10] sm:$0xff] %vm226_vm0, %v1109_v16  ;;  %274 = vst.msk [vmem:[#allocation3 + $0x8] sm:$0xff] %vm226_vm0, %v379_v17 }
  0x1d   : > { %307 = vrot.lane.b32.xlu1 %v1103_v13, %s1008_s25  ;;  %v1121_v20 = vld [vmem:[#allocation2 + $0x61] sm:$0xff]  ;;  %v381_v22 = vld [vmem:[#allocation2 + $0x30] sm:$0xff]  ;;  %278 = vst.msk [vmem:[#allocation3 + $0x28] sm:$0xff] %vm226_vm0, %v1117_v19  ;;  %279 = vst.msk [vmem:[#allocation3 + $0x30] sm:$0xff] %vm226_vm0, %v1115_v18 }
  0x1e   : > { %301 = vrot.lane.b32.xlu0 %v1105_v14, %s1008_s25  ;;  %v385_v23 = vld [vmem:[#allocation2 + $0x70] sm:$0xff]  ;;  %276 = vst.msk [vmem:[#allocation3 + $0x18] sm:$0xff] %vm226_vm0, %v381_v22  ;;  %v1142_v27 = vld [vmem:[#allocation2 + $0x42] sm:$0xff] }
  0x1f   : > { %280 = vst.msk [vmem:[#allocation3 + $0x38] sm:$0xff] %vm226_vm0, %v385_v23  ;;  %v1138_v24 = vld [vmem:[#allocation2 + $0x71] sm:$0xff]  ;;  %v1147_v29 = vld [vmem:[#allocation2 + $0x22] sm:$0xff] }
  0x20   : > { %v331_v26 = vld [vmem:[#allocation2 + $0x12] sm:$0xff]  ;;  %v1153_v31 = vld [vmem:[#allocation2 + $0x62] sm:$0xff] }
  0x21   : > { %303 = vrot.lane.b32.xlu1 %v1107_v15, %s1008_s25  ;;  %v1145_v28 = vld [vmem:[#allocation2 + $0x52] sm:$0xff]  ;;  %v386_v33 = vld [vmem:[#allocation2 + $0x80] sm:$0xff] }
  0x22   : > { %309 = vrot.lane.b32.xlu0 %v1121_v20, %s1008_s25  ;;  %v1151_v30 = vld [vmem:[#allocation2 + $0x32] sm:$0xff]  ;;  %v435_v34 = vld [vmem:[#allocation2 + $0x81] sm:$0xff] }
  0x23   : > { %v1157_v32 = vld [vmem:[#allocation2 + $0x72] sm:$0xff]  ;;  %v1176_v35 = vld [vmem:[#allocation2 + $0x82] sm:$0xff] }
  0x25   : > { %311 = vrot.lane.b32.xlu1 %v1138_v24, %s1008_s25 }
  0x26   : > { %346 = vrot.lane.b32.xlu0 %v330_v25, %s1009_s26 }
  0x29   : > { %348 = vrot.lane.b32.xlu1 %v331_v26, %s1009_s26 }
  0x2a   : > { %354 = vrot.lane.b32.xlu0 %v1142_v27, %s1009_s26 }
  0x2d   : > { %356 = vrot.lane.b32.xlu1 %v1145_v28, %s1009_s26 }
  0x2e   : > { %350 = vrot.lane.b32.xlu0 %v1147_v29, %s1009_s26 }
  0x31   : > { %352 = vrot.lane.b32.xlu1 %v1151_v30, %s1009_s26 }
  0x32   : > { %358 = vrot.lane.b32.xlu0 %v1153_v31, %s1009_s26 }
  0x35   : > { %360 = vrot.lane.b32.xlu1 %v1157_v32, %s1009_s26 }
  0x36   : > { %395 = vrot.lane.b32.xlu0 %v379_v17, %s1010_s27 }
  0x39   : > { %397 = vrot.lane.b32.xlu1 %v1109_v16, %s1010_s27 }
  0x3a   : > { %403 = vrot.lane.b32.xlu0 %v1117_v19, %s1010_s27 }
  0x3d   : > { %405 = vrot.lane.b32.xlu1 %v1115_v18, %s1010_s27 }
  0x3e   : > { %399 = vrot.lane.b32.xlu0 %v381_v22, %s1010_s27 }
  0x41   : > { %401 = vrot.lane.b32.xlu1 %v1123_v21, %s1010_s27 }
  0x42   : > { %407 = vrot.lane.b32.xlu0 %v385_v23, %s1010_s27 }
  0x45   : > { %409 = vrot.lane.b32.xlu1 %v386_v33, %s1010_s27 }
  0x46   : > { %444 = vrot.lane.b32.xlu0 %v282_v12, %s1011_s28 }
  0x49   : > { %446 = vrot.lane.b32.xlu1 %v1105_v14, %s1011_s28 }
  0x4a   : > { %452 = vrot.lane.b32.xlu0 %v1103_v13, %s1011_s28 }
  0x4d   : > { %454 = vrot.lane.b32.xlu1 %v1121_v20, %s1011_s28 }
  0x4e   : > { %448 = vrot.lane.b32.xlu0 %v1107_v15, %s1011_s28 }
  0x51   : > { %450 = vrot.lane.b32.xlu1 %v1098_v11, %s1011_s28 }
  0x52   : > { %456 = vrot.lane.b32.xlu0 %v1138_v24, %s1011_s28 }
  0x55   : > { %458 = vrot.lane.b32.xlu1 %v435_v34, %s1011_s28 }
  0x56   : > { %493 = vrot.lane.b32.xlu0 %v331_v26, %s1012_s29 }
  0x59   : > { %495 = vrot.lane.b32.xlu1 %v1147_v29, %s1012_s29 }
  0x5a   : > { %501 = vrot.lane.b32.xlu0 %v1145_v28, %s1012_s29 }
  0x5d   : > { %503 = vrot.lane.b32.xlu1 %v1153_v31, %s1012_s29 }
  0x5e   : > { %497 = vrot.lane.b32.xlu0 %v1151_v30, %s1012_s29 }
  0x61   : > { %499 = vrot.lane.b32.xlu1 %v1142_v27, %s1012_s29 }
  0x62   : > { %505 = vrot.lane.b32.xlu0 %v1157_v32, %s1012_s29 }
  0x65   : > { %507 = vrot.lane.b32.xlu1 %v1176_v35, %s1012_s29  ;;  %s1301_s29 = scalar_lea.vmem %s1327_s5, %s936_s21 }
  0x66   : > { %543 = vrot.lane.b32.xlu0 %v1109_v16, %s1013_s30 }
  0x69   : > { %545 = vrot.lane.b32.xlu1 %v381_v22, %s1013_s30 }
  0x6a   : > { %551 = vrot.lane.b32.xlu0 %v1115_v18, %s1013_s30 }
  0x6d   : > { %553 = vrot.lane.b32.xlu1 %v385_v23, %s1013_s30 }
  0x6e   : > { %547 = vrot.lane.b32.xlu0 %v1123_v21, %s1013_s30 }
  0x71   : > { %549 = vrot.lane.b32.xlu1 %v1117_v19, %s1013_s30 }
  0x72   : > { %555 = vrot.lane.b32.xlu0 %v386_v33, %s1013_s30 }
  0x75   : > { %557 = vrot.lane.b32.xlu1 %v534_v36, %s1013_s30 }
  0x76   : > { %592 = vrot.lane.b32.xlu0 %v1105_v14, %s1014_s6 }
  0x79   : > { %594 = vrot.lane.b32.xlu1 %v1107_v15, %s1014_s6 }
  0x7a   : > { %600 = vrot.lane.b32.xlu0 %v1121_v20, %s1014_s6 }
  0x7d   : > { %602 = vrot.lane.b32.xlu1 %v1138_v24, %s1014_s6 }
  0x7e   : > { %596 = vrot.lane.b32.xlu0 %v1098_v11, %s1014_s6 }
  0x81   : > { %598 = vrot.lane.b32.xlu1 %v1103_v13, %s1014_s6  ;;  %v298_v42 = vpop.permute.xlu0 %297 }
  0x82   : > { %604 = vrot.lane.b32.xlu0 %v435_v34, %s1014_s6  ;;  %322 = vst.msk [vmem:[#allocation3] sm:$0xff] %vm321_vm2, %v298_v42 }
  0x85   : > { %606 = vrot.lane.b32.xlu1 %v583_v40, %s1014_s6 }
  0x86   : > { %641 = vrot.lane.b32.xlu0 %v1147_v29, %s1015_s15 }
  0x89   : > { %643 = vrot.lane.b32.xlu1 %v1151_v30, %s1015_s15 }
  0x8a   : > { %649 = vrot.lane.b32.xlu0 %v1153_v31, %s1015_s15 }
  0x8b   : > { %v306_v45 = vpop.permute.xlu1 %305 }
  0x8c   : > { %v300_v46 = vpop.permute.xlu0 %299  ;;  %326 = vst.msk [vmem:[#allocation3 + $0x20] sm:$0xff] %vm321_vm2, %v306_v45 }
  0x8d   : > { %323 = vst.msk [vmem:[#allocation3 + $0x8] sm:$0xff] %vm321_vm2, %v300_v46  ;;  %651 = vrot.lane.b32.xlu1 %v1157_v32, %s1015_s15 }
  0x8e   : > { %645 = vrot.lane.b32.xlu0 %v1142_v27, %s1015_s15 }
  0x8f   : > { %v308_v47 = vpop.permute.xlu1 %307 }
  0x90   : > { %v302_v48 = vpop.permute.xlu0 %301  ;;  %327 = vst.msk [vmem:[#allocation3 + $0x28] sm:$0xff] %vm321_vm2, %v308_v47 }
  0x91   : > { %324 = vst.msk [vmem:[#allocation3 + $0x10] sm:$0xff] %vm321_vm2, %v302_v48  ;;  %647 = vrot.lane.b32.xlu1 %v1145_v28, %s1015_s15 }
  0x92   : > { %653 = vrot.lane.b32.xlu0 %v1176_v35, %s1015_s15 }
  0x93   : > { %v304_v50 = vpop.permute.xlu1 %303 }
  0x94   : > { %v310_v51 = vpop.permute.xlu0 %309  ;;  %325 = vst.msk [vmem:[#allocation3 + $0x18] sm:$0xff] %vm321_vm2, %v304_v50 }
  0x95   : > { %328 = vst.msk [vmem:[#allocation3 + $0x30] sm:$0xff] %vm321_vm2, %v310_v51  ;;  %655 = vrot.lane.b32.xlu1 %v632_v49, %s1015_s15 }
  0x97   : > { %v312_v52 = vpop.permute.xlu1 %311 }
  0x98   : > { %v347_v53 = vpop.permute.xlu0 %346  ;;  %329 = vst.msk [vmem:[#allocation3 + $0x38] sm:$0xff] %vm321_vm2, %v312_v52 }
  0x99   : > { %371 = vst.msk [vmem:[#allocation3] sm:$0xff] %vm370_vm4, %v347_v53 }
  0x9b   : > { %v349_v54 = vpop.permute.xlu1 %348 }
  0x9c   : > { %v355_v55 = vpop.permute.xlu0 %354  ;;  %372 = vst.msk [vmem:[#allocation3 + $0x8] sm:$0xff] %vm370_vm4, %v349_v54 }
  0x9d   : > { %375 = vst.msk [vmem:[#allocation3 + $0x20] sm:$0xff] %vm370_vm4, %v355_v55 }
  0x9f   : > { %v357_v56 = vpop.permute.xlu1 %356 }
  0xa0   : > { %v351_v57 = vpop.permute.xlu0 %350  ;;  %376 = vst.msk [vmem:[#allocation3 + $0x28] sm:$0xff] %vm370_vm4, %v357_v56 }
  0xa1   : > { %373 = vst.msk [vmem:[#allocation3 + $0x10] sm:$0xff] %vm370_vm4, %v351_v57  ;;  %v922_v57 = vld [vmem:[%s1324_s2] ss:$0 sm:$0xff] }
  0xa3   : > { %v353_v58 = vpop.permute.xlu1 %352 }
  0xa4   : > { %v359_v59 = vpop.permute.xlu0 %358  ;;  %374 = vst.msk [vmem:[#allocation3 + $0x18] sm:$0xff] %vm370_vm4, %v353_v58 }
  0xa5   : > { %377 = vst.msk [vmem:[#allocation3 + $0x30] sm:$0xff] %vm370_vm4, %v359_v59 }
  0xa7   : > { %v361_v60 = vpop.permute.xlu1 %360 }
  0xa8   : > { %v396_v61 = vpop.permute.xlu0 %395  ;;  %378 = vst.msk [vmem:[#allocation3 + $0x38] sm:$0xff] %vm370_vm4, %v361_v60 }
  0xa9   : > { %420 = vst.msk [vmem:[#allocation3] sm:$0xff] %vm419_vm5, %v396_v61  ;;  %v932_v61 = vld [vmem:[%s1325_s3] ss:$0 sm:$0xff] }
  0xab   : > { %v398_v62 = vpop.permute.xlu1 %397 }
  0xac   : > { %v404_v63 = vpop.permute.xlu0 %403  ;;  %421 = vst.msk [vmem:[#allocation3 + $0x8] sm:$0xff] %vm419_vm5, %v398_v62 }
  0xad   : > { %424 = vst.msk [vmem:[#allocation3 + $0x20] sm:$0xff] %vm419_vm5, %v404_v63 }
  0xaf   : > { %v406_v0 = vpop.permute.xlu1 %405 }
  0xb0   : > { %v400_v1 = vpop.permute.xlu0 %399  ;;  %425 = vst.msk [vmem:[#allocation3 + $0x28] sm:$0xff] %vm419_vm5, %v406_v0 }
  0xb1   : > { %422 = vst.msk [vmem:[#allocation3 + $0x10] sm:$0xff] %vm419_vm5, %v400_v1 }
  0xb3   : > { %v402_v2 = vpop.permute.xlu1 %401 }
  0xb4   : > { %v408_v3 = vpop.permute.xlu0 %407  ;;  %423 = vst.msk [vmem:[#allocation3 + $0x18] sm:$0xff] %vm419_vm5, %v402_v2 }
  0xb5   : > { %426 = vst.msk [vmem:[#allocation3 + $0x30] sm:$0xff] %vm419_vm5, %v408_v3  ;;  %v933_v3 = vld [vmem:[%s1326_s4] ss:$0 sm:$0xff] }
  0xb7   : > { %v410_v4 = vpop.permute.xlu1 %409 }
  0xb8   : > { %v445_v5 = vpop.permute.xlu0 %444  ;;  %427 = vst.msk [vmem:[#allocation3 + $0x38] sm:$0xff] %vm419_vm5, %v410_v4 }
  0xb9   : > { %469 = vst.msk [vmem:[#allocation3] sm:$0xff] %vm468_vm6, %v445_v5 }
  0xbb   : > { %v447_v6 = vpop.permute.xlu1 %446 }
  0xbc   : > { %v453_v7 = vpop.permute.xlu0 %452  ;;  %470 = vst.msk [vmem:[#allocation3 + $0x8] sm:$0xff] %vm468_vm6, %v447_v6 }
  0xbd   : > { %473 = vst.msk [vmem:[#allocation3 + $0x20] sm:$0xff] %vm468_vm6, %v453_v7 }
  0xbf   : > { %v455_v8 = vpop.permute.xlu1 %454 }
  0xc0   : > { %v449_v9 = vpop.permute.xlu0 %448  ;;  %474 = vst.msk [vmem:[#allocation3 + $0x28] sm:$0xff] %vm468_vm6, %v455_v8 }
  0xc1   : > { %471 = vst.msk [vmem:[#allocation3 + $0x10] sm:$0xff] %vm468_vm6, %v449_v9 }
  0xc3   : > { %v451_v10 = vpop.permute.xlu1 %450 }
  0xc4   : > { %v457_v11 = vpop.permute.xlu0 %456  ;;  %472 = vst.msk [vmem:[#allocation3 + $0x18] sm:$0xff] %vm468_vm6, %v451_v10 }
  0xc5   : > { %475 = vst.msk [vmem:[#allocation3 + $0x30] sm:$0xff] %vm468_vm6, %v457_v11 }
  0xc7   : > { %v459_v12 = vpop.permute.xlu1 %458 }
  0xc8   : > { %v494_v13 = vpop.permute.xlu0 %493  ;;  %476 = vst.msk [vmem:[#allocation3 + $0x38] sm:$0xff] %vm468_vm6, %v459_v12 }
  0xc9   : > { %518 = vst.msk [vmem:[#allocation3] sm:$0xff] %vm517_vm7, %v494_v13 }
  0xcb   : > { %v496_v14 = vpop.permute.xlu1 %495 }
  0xcc   : > { %v502_v15 = vpop.permute.xlu0 %501  ;;  %519 = vst.msk [vmem:[#allocation3 + $0x8] sm:$0xff] %vm517_vm7, %v496_v14 }
  0xcd   : > { %522 = vst.msk [vmem:[#allocation3 + $0x20] sm:$0xff] %vm517_vm7, %v502_v15 }
  0xcf   : > { %v504_v16 = vpop.permute.xlu1 %503 }
  0xd0   : > { %v498_v17 = vpop.permute.xlu0 %497  ;;  %523 = vst.msk [vmem:[#allocation3 + $0x28] sm:$0xff] %vm517_vm7, %v504_v16 }
  0xd1   : > { %520 = vst.msk [vmem:[#allocation3 + $0x10] sm:$0xff] %vm517_vm7, %v498_v17 }
  0xd3   : > { %v500_v18 = vpop.permute.xlu1 %499 }
  0xd4   : > { %v506_v19 = vpop.permute.xlu0 %505  ;;  %521 = vst.msk [vmem:[#allocation3 + $0x18] sm:$0xff] %vm517_vm7, %v500_v18 }
  0xd5   : > { %524 = vst.msk [vmem:[#allocation3 + $0x30] sm:$0xff] %vm517_vm7, %v506_v19 }
  0xd7   : > { %v508_v20 = vpop.permute.xlu1 %507 }
  0xd8   : > { %v544_v21 = vpop.permute.xlu0 %543  ;;  %525 = vst.msk [vmem:[#allocation3 + $0x38] sm:$0xff] %vm517_vm7, %v508_v20 }
  0xd9   : > { %568 = vst.msk [vmem:[#allocation3] sm:$0xff] %vm567_vm8, %v544_v21 }
  0xdb   : > { %v546_v22 = vpop.permute.xlu1 %545 }
  0xdc   : > { %v552_v23 = vpop.permute.xlu0 %551  ;;  %569 = vst.msk [vmem:[#allocation3 + $0x8] sm:$0xff] %vm567_vm8, %v546_v22 }
  0xdd   : > { %572 = vst.msk [vmem:[#allocation3 + $0x20] sm:$0xff] %vm567_vm8, %v552_v23 }
  0xdf   : > { %v554_v24 = vpop.permute.xlu1 %553 }
  0xe0   : > { %v548_v25 = vpop.permute.xlu0 %547  ;;  %573 = vst.msk [vmem:[#allocation3 + $0x28] sm:$0xff] %vm567_vm8, %v554_v24 }
  0xe1   : > { %570 = vst.msk [vmem:[#allocation3 + $0x10] sm:$0xff] %vm567_vm8, %v548_v25 }
  0xe3   : > { %v550_v26 = vpop.permute.xlu1 %549 }
  0xe4   : > { %v556_v27 = vpop.permute.xlu0 %555  ;;  %571 = vst.msk [vmem:[#allocation3 + $0x18] sm:$0xff] %vm567_vm8, %v550_v26 }
  0xe5   : > { %574 = vst.msk [vmem:[#allocation3 + $0x30] sm:$0xff] %vm567_vm8, %v556_v27 }
  0xe7   : > { %v558_v28 = vpop.permute.xlu1 %557 }
  0xe8   : > { %v593_v29 = vpop.permute.xlu0 %592  ;;  %575 = vst.msk [vmem:[#allocation3 + $0x38] sm:$0xff] %vm567_vm8, %v558_v28 }
  0xe9   : > { %617 = vst.msk [vmem:[#allocation3] sm:$0xff] %vm616_vm9, %v593_v29 }
  0xeb   : > { %v595_v30 = vpop.permute.xlu1 %594 }
  0xec   : > { %v601_v31 = vpop.permute.xlu0 %600  ;;  %618 = vst.msk [vmem:[#allocation3 + $0x8] sm:$0xff] %vm616_vm9, %v595_v30 }
  0xed   : > { %621 = vst.msk [vmem:[#allocation3 + $0x20] sm:$0xff] %vm616_vm9, %v601_v31 }
  0xef   : > { %v603_v32 = vpop.permute.xlu1 %602 }
  0xf0   : > { %v597_v33 = vpop.permute.xlu0 %596  ;;  %622 = vst.msk [vmem:[#allocation3 + $0x28] sm:$0xff] %vm616_vm9, %v603_v32 }
  0xf1   : > { %619 = vst.msk [vmem:[#allocation3 + $0x10] sm:$0xff] %vm616_vm9, %v597_v33 }
  0xf3   : > { %v599_v34 = vpop.permute.xlu1 %598 }
  0xf4   : > { %v605_v35 = vpop.permute.xlu0 %604  ;;  %620 = vst.msk [vmem:[#allocation3 + $0x18] sm:$0xff] %vm616_vm9, %v599_v34 }
  0xf5   : > { %623 = vst.msk [vmem:[#allocation3 + $0x30] sm:$0xff] %vm616_vm9, %v605_v35 }
  0xf7   : > { %v607_v36 = vpop.permute.xlu1 %606 }
  0xf8   : > { %v642_v37 = vpop.permute.xlu0 %641  ;;  %624 = vst.msk [vmem:[#allocation3 + $0x38] sm:$0xff] %vm616_vm9, %v607_v36 }
  0xf9   : > { %666 = vst.msk [vmem:[#allocation3] sm:$0xff] %vm665_vm10, %v642_v37 }
  0xfb   : > { %v644_v38 = vpop.permute.xlu1 %643 }
  0xfc   : > { %v650_v39 = vpop.permute.xlu0 %649  ;;  %667 = vst.msk [vmem:[#allocation3 + $0x8] sm:$0xff] %vm665_vm10, %v644_v38 }
  0xfd   : > { %670 = vst.msk [vmem:[#allocation3 + $0x20] sm:$0xff] %vm665_vm10, %v650_v39 }
  0xff   : > { %v652_v40 = vpop.permute.xlu1 %651 }
 0x100   : > { %v646_v41 = vpop.permute.xlu0 %645  ;;  %671 = vst.msk [vmem:[#allocation3 + $0x28] sm:$0xff] %vm665_vm10, %v652_v40  ;;  %v674_v42 = vld [vmem:[#allocation3] sm:$0xff] }
 0x101   : > { %668 = vst.msk [vmem:[#allocation3 + $0x10] sm:$0xff] %vm665_vm10, %v646_v41 }
 0x103   : > { %v648_v43 = vpop.permute.xlu1 %647  ;;  %v675_v44 = vld [vmem:[#allocation3 + $0x8] sm:$0xff] }
 0x104   : > { %v654_v45 = vpop.permute.xlu0 %653  ;;  %669 = vst.msk [vmem:[#allocation3 + $0x18] sm:$0xff] %vm665_vm10, %v648_v43  ;;  %v682_v46 = vpack.c.bf16 %v675_v44, %v674_v42  ;;  %v678_v47 = vld [vmem:[#allocation3 + $0x20] sm:$0xff] }
 0x105   : > { %672 = vst.msk [vmem:[#allocation3 + $0x30] sm:$0xff] %vm665_vm10, %v654_v45 }
 0x106   : > { %957 = vmatprep.mubr.msk.bf16.mxu0 %vm729_vm11, %v682_v46 }
 0x107   : > { %v656_v48 = vpop.permute.xlu1 %655  ;;  %v679_v49 = vld [vmem:[#allocation3 + $0x28] sm:$0xff] }
 0x108   : > { %673 = vst.msk [vmem:[#allocation3 + $0x38] sm:$0xff] %vm665_vm10, %v656_v48  ;;  %v684_v50 = vpack.c.bf16 %v679_v49, %v678_v47  ;;  %v676_v51 = vld [vmem:[#allocation3 + $0x10] sm:$0xff] }
 0x10a   : > { %961 = vmatprep.mubr.msk.bf16.mxu1 %vm729_vm11, %v684_v50 }
 0x10b   : > { %v677_v52 = vld [vmem:[#allocation3 + $0x18] sm:$0xff] }
 0x10c   : > { %v683_v53 = vpack.c.bf16 %v677_v52, %v676_v51  ;;  %v680_v54 = vld [vmem:[#allocation3 + $0x30] sm:$0xff] }
 0x10e   : > { %958 = vmatmul.mubr.msk.bf16.vlgmr.msra.gmra.mrb[0].mxu0 %vm729_vm11, %v683_v53 }
 0x10f   : > { %v681_v55 = vld [vmem:[#allocation3 + $0x38] sm:$0xff] }
 0x110   : > { %v685_v56 = vpack.c.bf16 %v681_v55, %v680_v54 }
 0x112   : > { %962 = vmatmul.mubr.msk.bf16.vlgmr.msra.gmra.mrb[0].mxu1 %vm729_vm11, %v685_v56 }
 0x1e1   : > { %v959_v58 = vpop.f32.mrb[0].mxu0 }
 0x1e2   : > { %v789_v59 = vadd.f32 %v959_v58, %v922_v57  ;;  %v780_v60 = vpop.f32.mrb[1].mxu0 }
 0x1e3   : > { %v781_v62 = vadd.f32 %v922_v57, %v780_v60  ;;  %v960_v63 = vpop.f32.mrb[2].mxu0 }
 0x1e4   : > { %v813_v0 = vmax.f32 %v789_v59, 0.0  ;;  %v792_v1 = vadd.f32 %v960_v63, %v922_v57  ;;  %v783_v2 = vpop.f32.mrb[3].mxu0 }
 0x1e5   : > { %v811_v4 = vmax.f32 %v781_v62, 0.0  ;;  %v784_v5 = vadd.f32 %v922_v57, %v783_v2  ;;  %v963_v6 = vpop.f32.mrb[0].mxu1 }
 0x1e6   : > { %v828_v7 = vmul.f32 %v932_v61, %v813_v0  ;;  %v814_v8 = vmax.f32 %v792_v1, 0.0  ;;  %v805_v9 = vadd.f32 %v963_v6, %v922_v57  ;;  %v796_v10 = vpop.f32.mrb[1].mxu1 }
 0x1e7   : > { %v826_v11 = vmul.f32 %v932_v61, %v811_v4  ;;  %v812_v12 = vmax.f32 %v784_v5, 0.0  ;;  %v797_v13 = vadd.f32 %v922_v57, %v796_v10  ;;  %v964_v14 = vpop.f32.mrb[2].mxu1 }
 0x1e8   : > { %v843_v15 = vadd.f32 %v933_v3, %v828_v7  ;;  %v829_v16 = vmul.f32 %v932_v61, %v814_v8  ;;  %v817_v17 = vmax.f32 %v805_v9, 0.0  ;;  %v808_v18 = vadd.f32 %v964_v14, %v922_v57  ;;  %v799_v19 = vpop.f32.mrb[3].mxu1 }
 0x1e9   : > { %v841_v20 = vadd.f32 %v933_v3, %v826_v11  ;;  %v827_v21 = vmul.f32 %v932_v61, %v812_v12  ;;  %v815_v22 = vmax.f32 %v797_v13, 0.0  ;;  %v800_v23 = vadd.f32 %v922_v57, %v799_v19 }
 0x1ea   : > { %852 = vst.msk [vmem:[%s1301_s29 + $0x10] sm:$0xff] %vm849_vm12, %v843_v15  ;;  %v844_v24 = vadd.f32 %v933_v3, %v829_v16  ;;  %v832_v25 = vmul.f32 %v932_v61, %v817_v17  ;;  %v818_v26 = vmax.f32 %v808_v18, 0.0 }
 0x1eb   : > { %850 = vst.msk [vmem:[%s1301_s29] sm:$0xff] %vm849_vm12, %v841_v20  ;;  %v842_v27 = vadd.f32 %v933_v3, %v827_v21  ;;  %v830_v28 = vmul.f32 %v932_v61, %v815_v22  ;;  %v816_v29 = vmax.f32 %v800_v23, 0.0 }
 0x1ec   : > { %853 = vst.msk [vmem:[%s1301_s29 + $0x18] sm:$0xff] %vm849_vm12, %v844_v24  ;;  %v847_v30 = vadd.f32 %v933_v3, %v832_v25  ;;  %v833_v31 = vmul.f32 %v932_v61, %v818_v26 }
 0x1ed   : > { %851 = vst.msk [vmem:[%s1301_s29 + $0x8] sm:$0xff] %vm849_vm12, %v842_v27  ;;  %v845_v32 = vadd.f32 %v933_v3, %v830_v28  ;;  %v831_v33 = vmul.f32 %v932_v61, %v816_v29 }
 0x1ee   : > { %856 = vst.msk [vmem:[%s1301_s29 + $0x30] sm:$0xff] %vm849_vm12, %v847_v30  ;;  %v848_v34 = vadd.f32 %v933_v3, %v833_v31 }
 0x1ef   : > { %854 = vst.msk [vmem:[%s1301_s29 + $0x20] sm:$0xff] %vm849_vm12, %v845_v32  ;;  %v846_v35 = vadd.f32 %v933_v3, %v831_v33 }
 0x1f0   : > { %857 = vst.msk [vmem:[%s1301_s29 + $0x38] sm:$0xff] %vm849_vm12, %v848_v34 }
 0x1f1   : > { %855 = vst.msk [vmem:[%s1301_s29 + $0x28] sm:$0xff] %vm849_vm12, %v846_v35 }
 0x1f2 PF: > { %s15_s18 = sadd.s32 1, %s1005_s18  }
 0x1f3   : > { %p12_p4 = scmp.ge.s32.totalorder %s15_s18, 4  }
 0x1f5   :  { %14 = sbr.rel (!%p12_p4) target bundleno = 1 (0x1), region = 72 }

// kernel: vgg_forward.7
= control target key start
LH: loop header
LB: loop body
LE: loop exit
PB: predicated region body
PF: predicated region fallthrough
CT: control target
= control target key end

     0   :  { %s1107_s18 = smov 0   ;;  %s1478_s0 = inlined_call_operand.vmem [shape: f32[2,8,8,16], index: 0, kind: input, shape index: {}]   ;;  %s1479_s1 = inlined_call_operand.vmem [shape: bf16[144,16], index: 1, kind: input, shape index: {}]   ;;  %s1480_s2 = inlined_call_operand.vmem [shape: f32[1,16], index: 2, kind: input, shape index: {}]   ;;  %s1481_s3 = inlined_call_operand.vmem [shape: f32[1,16], index: 3, kind: input, shape index: {}]   ;;  %s1482_s4 = inlined_call_operand.vmem [shape: f32[1,16], index: 4, kind: input, shape index: {}]   ;;  %s1483_s5 = inlined_call_operand.vmem [shape: f32[2,4,4,16], index: 5, kind: output, shape index: {}]  }
   0x1 LB: > { %s987_s19 = sadd.s32 4294967295, %s1066_s18   ;;  %p991_p0 = scmp.ge.s32.totalorder %s1066_s18, 1  ;;  %s1066_s18 = sphi %s1107_s18, %s15_s18  }
   0x2   : > { %p187_p1 = scmp.lt.s32.totalorder %s1066_s18, 3 }
   0x4   : > { %p188_p2 = pnand %p991_p0, %p187_p1 }
   0x5   : > { %vm226_vm0 = vcmask (!%p188_p2), 130048   ;;  %vm228_vm1 = vcmask (!%p188_p2), 123904   ;;  %p1115_p3 = scmp.lt.s32.totalorder (!%p188_p2), %s987_s19, 1  ;;  %v1068_v0 = vmov (!%p188_p2), 0.0   ;;  %s1069_s25 = smov (!%p188_p2), 16   ;;  %v1051_v30 = vld [vmem:[%s1479_s1] sm:$0xff] (!%p188_p2)  }
   0x6   : > { %191 = sbr.rel (%p188_p2) target bundleno = 501 (0x1f5), region = 40  ;;  %227 = vst.msk [vmem:[#allocation2] sm:$0xff] (!%p188_p2), %vm226_vm0, %v1068_v0  ;;  %230 = vst.msk [vmem:[#allocation2 + $0x10] sm:$0xff] (!%p188_p2), %vm226_vm0, %v1068_v0  ;;  %s1070_s26 = smov (!%p188_p2), 32   ;;  %v1071_v31 = vmov (!%p188_p2), 0   ;;  %v1052_v32 = vld [vmem:[%s1479_s1 + $0x8] sm:$0xff] (!%p188_p2)  }
   0x7   : > { %229 = vst.msk [vmem:[#allocation2 + $0x8] sm:$0x3] (!%p188_p2), %vm228_vm1, %v1068_v0  ;;  %231 = vst.msk [vmem:[#allocation2 + $0x18] sm:$0x3] (!%p188_p2), %vm228_vm1, %v1068_v0  ;;  %756 = vmatprep.subr.bf16.mxu0 (!%p188_p2), %v1071_v31  ;;  %1016 = vmatprep.subr.bf16.mxu1 (!%p188_p2), %v1071_v31  ;;  %s1072_s29 = smov (!%p188_p2), 48   ;;  %v1053_v33 = vld [vmem:[%s1479_s1 + $0x10] sm:$0xff] (!%p188_p2)  }
   0x8   : > { %232 = vst.msk [vmem:[#allocation2 + $0x20] sm:$0xff] (!%p188_p2), %vm226_vm0, %v1068_v0  ;;  %234 = vst.msk [vmem:[#allocation2 + $0x30] sm:$0xff] (!%p188_p2), %vm226_vm0, %v1068_v0  ;;  %757 = vmatpush1.bf16.msra.mxu0 (!%p188_p2), %v1051_v30  ;;  %1025 = vmatpush1.bf16.msra.mxu1 (!%p188_p2), %v1051_v30  ;;  %s1073_s9 = smov (!%p188_p2), 64   ;;  %v1054_v34 = vld [vmem:[%s1479_s1 + $0x18] sm:$0xff] (!%p188_p2)   ;;  %v1055_v36 = vld [vmem:[%s1479_s1 + $0x20] sm:$0xff] (!%p188_p2)   ;;  %s1074_s14 = smov (!%p188_p2), 80  }
   0x9   : > { %233 = vst.msk [vmem:[#allocation2 + $0x28] sm:$0x3] (!%p188_p2), %vm228_vm1, %v1068_v0  ;;  %235 = vst.msk [vmem:[#allocation2 + $0x38] sm:$0x3] (!%p188_p2), %vm228_vm1, %v1068_v0  ;;  %758 = vmatprep.subr.bf16.mxu0 (!%p188_p2), %v1071_v31  ;;  %1017 = vmatprep.subr.bf16.mxu1 (!%p188_p2), %v1071_v31  ;;  %v1056_v38 = vld [vmem:[%s1479_s1 + $0x28] sm:$0xff] (!%p188_p2)   ;;  %v1057_v39 = vld [vmem:[%s1479_s1 + $0x30] sm:$0xff] (!%p188_p2)  }
   0xa   : > { %236 = vst.msk [vmem:[#allocation2 + $0x40] sm:$0xff] (!%p188_p2), %vm226_vm0, %v1068_v0  ;;  %238 = vst.msk [vmem:[#allocation2 + $0x50] sm:$0xff] (!%p188_p2), %vm226_vm0, %v1068_v0  ;;  %v1058_v40 = vld [vmem:[%s1479_s1 + $0x38] sm:$0xff] (!%p188_p2)   ;;  %v1059_v41 = vld [vmem:[%s1479_s1 + $0x40] sm:$0xff] (!%p188_p2)   ;;  %s1076_s28 = smov (!%p188_p2), 112   ;;  %vm321_vm2 = vcmask (!%p188_p2), 261248  }
   0xb   : > { %237 = vst.msk [vmem:[#allocation2 + $0x48] sm:$0x3] (!%p188_p2), %vm228_vm1, %v1068_v0  ;;  %239 = vst.msk [vmem:[#allocation2 + $0x58] sm:$0x3] (!%p188_p2), %vm228_vm1, %v1068_v0  ;;  %vm370_vm3 = vcmask (!%p188_p2), 392448   ;;  %vm419_vm4 = vcmask (!%p188_p2), 523648  }
   0xc   : > { %240 = vst.msk [vmem:[#allocation2 + $0x60] sm:$0xff] (!%p188_p2), %vm226_vm0, %v1068_v0  ;;  %242 = vst.msk [vmem:[#allocation2 + $0x70] sm:$0xff] (!%p188_p2), %vm226_vm0, %v1068_v0  ;;  %759 = vmatpush1.bf16.msra.mxu0 (!%p188_p2), %v1052_v32  ;;  %1026 = vmatpush1.bf16.msra.mxu1 (!%p188_p2), %v1052_v32  ;;  %vm468_vm5 = vcmask (!%p188_p2), 654848   ;;  %vm517_vm6 = vcmask (!%p188_p2), 786048   ;;  %vm567_vm7 = vcmask (!%p188_p2), 917248   ;;  %vm616_vm8 = vcmask (!%p188_p2), 1048448  }
   0xd   : > { %241 = vst.msk [vmem:[#allocation2 + $0x68] sm:$0x3] %vm228_vm1, %v1068_v0  ;;  %243 = vst.msk [vmem:[#allocation2 + $0x78] sm:$0x3] %vm228_vm1, %v1068_v0  ;;  %s1486_s19 = smov (!%p1115_p3, %s987_s19), 1  ;;  %v265_v11 = vld [vmem:[#allocation2] sm:$0xff]  ;;  %760 = vmatprep.subr.bf16.mxu0 %v1071_v31  ;;  %1018 = vmatprep.subr.bf16.mxu1 %v1071_v31 }
   0xe   : > { %244 = vst.msk [vmem:[#allocation2 + $0x80] sm:$0xff] %vm226_vm0, %v1068_v0  ;;  %246 = vst.msk [vmem:[#allocation2 + $0x90] sm:$0xff] %vm226_vm0, %v1068_v0  ;;  %s1014_s21 = sshll.u32 %s1486_s19, 6  ;;  %v281_v7 = vld [vmem:[#allocation2 + $0x1] sm:$0xff]  ;;  %vm906_vm9 = vcmask 125952   ;;  %s1015_s8 = sshll.u32 %s1486_s19, 4 }
   0xf   : > { %245 = vst.msk [vmem:[#allocation2 + $0x88] sm:$0x3] %vm228_vm1, %v1068_v0  ;;  %247 = vst.msk [vmem:[#allocation2 + $0x98] sm:$0x3] %vm228_vm1, %v1068_v0  ;;  %s219_s24 = scalar_lea.vmem %s1478_s0, %s1014_s21  ;;  %297 = vrot.lane.b32.xlu0 %v281_v7, %s1069_s25  ;;  %v330_v9 = vld [vmem:[#allocation2 + $0x2] sm:$0xff]  ;;  %s1075_s21 = smov 96  }
  0x10   : > { %v251_v1 = vld [vmem:[%s219_s24 + $0x18] sm:$0xff]  ;;  %v252_v2 = vld [vmem:[%s219_s24 + $0x20] sm:$0xff]  ;;  %v249_v4 = vld [vmem:[%s219_s24 + $0x8] sm:$0xff]  ;;  %273 = vst.msk [vmem:[#allocation3] sm:$0xff] %vm226_vm0, %v265_v11  ;;  %761 = vmatpush1.bf16.msra.mxu0 %v1053_v33  ;;  %1027 = vmatpush1.bf16.msra.mxu1 %v1053_v33  ;;  %s1445_s11 = scalar_lea.vmem %s1483_s5, %s1015_s8 }
  0x11   : > { %v248_v3 = vld [vmem:[%s219_s24] sm:$0xff]  ;;  %260 = vst.msk [vmem:[#allocation2 + $0x41] sm:$0xff] %vm226_vm0, %v251_v1  ;;  %261 = vst.msk [vmem:[#allocation2 + $0x51] sm:$0xff] %vm226_vm0, %v252_v2  ;;  %v253_v5 = vld [vmem:[%s219_s24 + $0x28] sm:$0xff]  ;;  %762 = vmatprep.subr.bf16.mxu0 %v1071_v31  ;;  %1019 = vmatprep.subr.bf16.mxu1 %v1071_v31 }
  0x12   : > { %257 = vst.msk [vmem:[#allocation2 + $0x11] sm:$0xff] %vm226_vm0, %v248_v3  ;;  %v250_v6 = vld [vmem:[%s219_s24 + $0x10] sm:$0xff]  ;;  %258 = vst.msk [vmem:[#allocation2 + $0x21] sm:$0xff] %vm226_vm0, %v249_v4  ;;  %v255_v10 = vld [vmem:[%s219_s24 + $0x38] sm:$0xff] }
  0x13   : > { %262 = vst.msk [vmem:[#allocation2 + $0x61] sm:$0xff] %vm226_vm0, %v253_v5  ;;  %259 = vst.msk [vmem:[#allocation2 + $0x31] sm:$0xff] %vm226_vm0, %v250_v6  ;;  %v254_v8 = vld [vmem:[%s219_s24 + $0x30] sm:$0xff]  ;;  %346 = vrot.lane.b32.xlu0 %v330_v9, %s1070_s26 }
  0x14   : > { %263 = vst.msk [vmem:[#allocation2 + $0x71] sm:$0xff] %vm226_vm0, %v254_v8  ;;  %264 = vst.msk [vmem:[#allocation2 + $0x81] sm:$0xff] %vm226_vm0, %v255_v10  ;;  %763 = vmatpush1.bf16.msra.mxu0 %v1054_v34  ;;  %1028 = vmatpush1.bf16.msra.mxu1 %v1054_v34 }
  0x15   : > { %764 = vmatprep.subr.bf16.mxu0 %v1071_v31  ;;  %1020 = vmatprep.subr.bf16.mxu1 %v1071_v31  ;;  %v534_v53 = vld [vmem:[#allocation2 + $0x90] sm:$0xff] }
  0x16   : > { %v632_v52 = vld [vmem:[#allocation2 + $0x92] sm:$0xff] }
  0x17   : > { %640 = vst.msk [vmem:[#allocation3 + $0x78] sm:$0xff] %vm226_vm0, %v632_v52  ;;  %v583_v54 = vld [vmem:[#allocation2 + $0x91] sm:$0xff] }
  0x18   : > { %v1158_v12 = vld [vmem:[#allocation2 + $0x41] sm:$0xff]  ;;  %v1162_v14 = vld [vmem:[#allocation2 + $0x51] sm:$0xff]  ;;  %765 = vmatpush1.bf16.msra.mxu0 %v1055_v36  ;;  %1029 = vmatpush1.bf16.msra.mxu1 %v1055_v36 }
  0x19   : > { %v282_v13 = vld [vmem:[#allocation2 + $0x11] sm:$0xff]  ;;  %305 = vrot.lane.b32.xlu1 %v1158_v12, %s1069_s25  ;;  %v1166_v16 = vld [vmem:[#allocation2 + $0x42] sm:$0xff]  ;;  %766 = vmatprep.subr.bf16.mxu0 %v1071_v31 }
  0x1a   : > { %v1164_v15 = vld [vmem:[#allocation2 + $0x52] sm:$0xff]  ;;  %v1168_v17 = vld [vmem:[#allocation2 + $0x20] sm:$0xff]  ;;  %635 = vst.msk [vmem:[#allocation3 + $0x28] sm:$0xff] %vm226_vm0, %v1166_v16  ;;  %299 = vrot.lane.b32.xlu0 %v282_v13, %s1069_s25  ;;  %1021 = vmatprep.subr.bf16.mxu1 %v1071_v31 }
  0x1b   : > { %v379_v18 = vld [vmem:[#allocation2 + $0x10] sm:$0xff]  ;;  %v1170_v19 = vld [vmem:[#allocation2 + $0x60] sm:$0xff]  ;;  %636 = vst.msk [vmem:[#allocation3 + $0x38] sm:$0xff] %vm226_vm0, %v1164_v15  ;;  %275 = vst.msk [vmem:[#allocation3 + $0x20] sm:$0xff] %vm226_vm0, %v1168_v17 }
  0x1c   : > { %v1177_v20 = vld [vmem:[#allocation2 + $0x50] sm:$0xff]  ;;  %274 = vst.msk [vmem:[#allocation3 + $0x10] sm:$0xff] %vm226_vm0, %v379_v18  ;;  %279 = vst.msk [vmem:[#allocation3 + $0x60] sm:$0xff] %vm226_vm0, %v1170_v19  ;;  %v1184_v21 = vld [vmem:[#allocation2 + $0x22] sm:$0xff]  ;;  %767 = vmatpush1.bf16.msra.mxu0 %v1056_v38  ;;  %1030 = vmatpush1.bf16.msra.mxu1 %v1056_v38 }
  0x1d   : > { %v1186_v22 = vld [vmem:[#allocation2 + $0x62] sm:$0xff]  ;;  %v1188_v23 = vld [vmem:[#allocation2 + $0x30] sm:$0xff]  ;;  %278 = vst.msk [vmem:[#allocation3 + $0x50] sm:$0xff] %vm226_vm0, %v1177_v20  ;;  %307 = vrot.lane.b32.xlu1 %v1162_v14, %s1069_s25  ;;  %633 = vst.msk [vmem:[#allocation3 + $0x8] sm:$0xff] %vm226_vm0, %v1184_v21  ;;  %768 = vmatprep.subr.bf16.mxu0 %v1071_v31 }
  0x1e   : > { %v331_v24 = vld [vmem:[#allocation2 + $0x12] sm:$0xff]  ;;  %276 = vst.msk [vmem:[#allocation3 + $0x30] sm:$0xff] %vm226_vm0, %v1188_v23  ;;  %637 = vst.msk [vmem:[#allocation3 + $0x48] sm:$0xff] %vm226_vm0, %v1186_v22  ;;  %v1206_v28 = vld [vmem:[#allocation2 + $0x40] sm:$0xff]  ;;  %354 = vrot.lane.b32.xlu0 %v1166_v16, %s1070_s26  ;;  %1022 = vmatprep.subr.bf16.mxu1 %v1071_v31 }
  0x1f   : > { %v1194_v25 = vld [vmem:[#allocation2 + $0x70] sm:$0xff]  ;;  %v1212_v29 = vld [vmem:[#allocation2 + $0x82] sm:$0xff]  ;;  %277 = vst.msk [vmem:[#allocation3 + $0x40] sm:$0xff] %vm226_vm0, %v1206_v28 }
  0x20   : > { %v1202_v26 = vld [vmem:[#allocation2 + $0x32] sm:$0xff]  ;;  %280 = vst.msk [vmem:[#allocation3 + $0x70] sm:$0xff] %vm226_vm0, %v1194_v25  ;;  %639 = vst.msk [vmem:[#allocation3 + $0x68] sm:$0xff] %vm226_vm0, %v1212_v29  ;;  %v429_v35 = vld [vmem:[#allocation2 + $0x21] sm:$0xff]  ;;  %769 = vmatpush1.bf16.msra.mxu0 %v1057_v39  ;;  %1031 = vmatpush1.bf16.msra.mxu1 %v1057_v39 }
  0x21   : > { %v1204_v27 = vld [vmem:[#allocation2 + $0x72] sm:$0xff]  ;;  %634 = vst.msk [vmem:[#allocation3 + $0x18] sm:$0xff] %vm226_vm0, %v1202_v26  ;;  %348 = vrot.lane.b32.xlu1 %v331_v24, %s1070_s26  ;;  %v433_v37 = vld [vmem:[#allocation2 + $0x61] sm:$0xff]  ;;  %770 = vmatprep.subr.bf16.mxu0 %v1071_v31 }
  0x22   : > { %638 = vst.msk [vmem:[#allocation3 + $0x58] sm:$0xff] %vm226_vm0, %v1204_v27  ;;  %395 = vrot.lane.b32.xlu0 %v379_v18, %s1072_s29  ;;  %1023 = vmatprep.subr.bf16.mxu1 %v1071_v31  ;;  %v577_v45 = vld [vmem:[#allocation2 + $0x31] sm:$0xff]  ;;  %v386_v50 = vld [vmem:[#allocation2 + $0x80] sm:$0xff] }
  0x23   : > { %v581_v49 = vld [vmem:[#allocation2 + $0x71] sm:$0xff]  ;;  %v435_v51 = vld [vmem:[#allocation2 + $0x81] sm:$0xff] }
  0x24   : > { %771 = vmatpush1.bf16.msra.mxu0 %v1058_v40  ;;  %1032 = vmatpush1.bf16.msra.mxu1 %v1058_v40  ;;  %v642_v42 = vld [vmem:[#allocation3 + $0x8] sm:$0xff] }
  0x25   : > { %356 = vrot.lane.b32.xlu1 %v1164_v15, %s1070_s26  ;;  %772 = vmatprep.subr.bf16.mxu0 %v1071_v31  ;;  %v650_v46 = vld [vmem:[#allocation3 + $0x48] sm:$0xff] }
  0x26   : > { %403 = vrot.lane.b32.xlu0 %v1177_v20, %s1072_s29  ;;  %1024 = vmatprep.subr.bf16.mxu1 %v1071_v31 }
  0x28   : > { %773 = vmatpush1.bf16.msra.mxu0 %v1059_v41  ;;  %v644_v43 = vld [vmem:[#allocation3 + $0x18] sm:$0xff]  ;;  %1033 = vmatpush1.bf16.msra.mxu1 %v1059_v41 }
  0x29   : > { %397 = vrot.lane.b32.xlu1 %v1168_v17, %s1072_s29  ;;  %v658_v44 = vpack.c.bf16 %v644_v43, %v642_v42  ;;  %v652_v47 = vld [vmem:[#allocation3 + $0x58] sm:$0xff] }
  0x2a   : > { %444 = vrot.lane.b32.xlu0 %v282_v13, %s1073_s9  ;;  %v662_v48 = vpack.c.bf16 %v652_v47, %v650_v46 }
  0x2b   : > { %1006 = vmatprep.mubr.msk.bf16.mxu0 %vm226_vm0, %v658_v44 }
  0x2c   : > { %1008 = vmatprep.mubr.msk.bf16.mxu1 %vm226_vm0, %v662_v48 }
  0x2d   : > { %405 = vrot.lane.b32.xlu1 %v1170_v19, %s1072_s29 }
  0x2e   : > { %452 = vrot.lane.b32.xlu0 %v1162_v14, %s1073_s9 }
  0x31   : > { %446 = vrot.lane.b32.xlu1 %v429_v35, %s1073_s9 }
  0x32   : > { %493 = vrot.lane.b32.xlu0 %v331_v24, %s1074_s14 }
  0x35   : > { %454 = vrot.lane.b32.xlu1 %v433_v37, %s1073_s9 }
  0x36   : > { %501 = vrot.lane.b32.xlu0 %v1164_v15, %s1074_s14 }
  0x39   : > { %495 = vrot.lane.b32.xlu1 %v1184_v21, %s1074_s14 }
  0x3a   : > { %543 = vrot.lane.b32.xlu0 %v1168_v17, %s1075_s21 }
  0x3d   : > { %503 = vrot.lane.b32.xlu1 %v1186_v22, %s1074_s14 }
  0x3e   : > { %551 = vrot.lane.b32.xlu0 %v1170_v19, %s1075_s21 }
  0x41   : > { %545 = vrot.lane.b32.xlu1 %v1188_v23, %s1075_s21 }
  0x42   : > { %592 = vrot.lane.b32.xlu0 %v429_v35, %s1076_s28 }
  0x45   : > { %553 = vrot.lane.b32.xlu1 %v1194_v25, %s1075_s21 }
  0x46   : > { %600 = vrot.lane.b32.xlu0 %v433_v37, %s1076_s28 }
  0x49   : > { %594 = vrot.lane.b32.xlu1 %v577_v45, %s1076_s28 }
  0x4a   : > { %301 = vrot.lane.b32.xlu0 %v429_v35, %s1069_s25 }
  0x4d   : > { %602 = vrot.lane.b32.xlu1 %v581_v49, %s1076_s28 }
  0x4e   : > { %309 = vrot.lane.b32.xlu0 %v433_v37, %s1069_s25 }
  0x51   : > { %303 = vrot.lane.b32.xlu1 %v577_v45, %s1069_s25 }
  0x52   : > { %350 = vrot.lane.b32.xlu0 %v1184_v21, %s1070_s26  ;;  %v648_v21 = vld [vmem:[#allocation3 + $0x38] sm:$0xff] }
  0x55   : > { %311 = vrot.lane.b32.xlu1 %v581_v49, %s1069_s25 }
  0x56   : > { %358 = vrot.lane.b32.xlu0 %v1186_v22, %s1070_s26 }
  0x59   : > { %352 = vrot.lane.b32.xlu1 %v1202_v26, %s1070_s26 }
  0x5a   : > { %399 = vrot.lane.b32.xlu0 %v1188_v23, %s1072_s29 }
  0x5d   : > { %360 = vrot.lane.b32.xlu1 %v1204_v27, %s1070_s26 }
  0x5e   : > { %407 = vrot.lane.b32.xlu0 %v1194_v25, %s1072_s29 }
  0x61   : > { %401 = vrot.lane.b32.xlu1 %v1206_v28, %s1072_s29 }
  0x62   : > { %448 = vrot.lane.b32.xlu0 %v577_v45, %s1073_s9 }
  0x65   : > { %409 = vrot.lane.b32.xlu1 %v386_v50, %s1072_s29 }
  0x66   : > { %456 = vrot.lane.b32.xlu0 %v581_v49, %s1073_s9 }
  0x69   : > { %450 = vrot.lane.b32.xlu1 %v1158_v12, %s1073_s9 }
  0x6a   : > { %497 = vrot.lane.b32.xlu0 %v1202_v26, %s1074_s14 }
  0x6d   : > { %458 = vrot.lane.b32.xlu1 %v435_v51, %s1073_s9 }
  0x6e   : > { %505 = vrot.lane.b32.xlu0 %v1204_v27, %s1074_s14 }
  0x71   : > { %499 = vrot.lane.b32.xlu1 %v1166_v16, %s1074_s14 }
  0x72   : > { %547 = vrot.lane.b32.xlu0 %v1206_v28, %s1075_s21  ;;  %v654_v28 = vld [vmem:[#allocation3 + $0x68] sm:$0xff] }
  0x75   : > { %507 = vrot.lane.b32.xlu1 %v1212_v29, %s1074_s14  ;;  %v656_v29 = vld [vmem:[#allocation3 + $0x78] sm:$0xff] }
  0x76   : > { %555 = vrot.lane.b32.xlu0 %v386_v50, %s1075_s21  ;;  %v664_v34 = vpack.c.bf16 %v656_v29, %v654_v28 }
  0x79   : > { %549 = vrot.lane.b32.xlu1 %v1177_v20, %s1075_s21  ;;  %v646_v20 = vld [vmem:[#allocation3 + $0x28] sm:$0xff] }
  0x7a   : > { %596 = vrot.lane.b32.xlu0 %v1158_v12, %s1076_s28  ;;  %v660_v26 = vpack.c.bf16 %v648_v21, %v646_v20 }
  0x7d   : > { %557 = vrot.lane.b32.xlu1 %v534_v53, %s1075_s21 }
  0x7e   : > { %604 = vrot.lane.b32.xlu0 %v435_v51, %s1076_s28 }
  0x81   : > { %598 = vrot.lane.b32.xlu1 %v1162_v14, %s1076_s28  ;;  %v298_v55 = vpop.permute.xlu0 %297 }
  0x82   : > { %322 = vst.msk [vmem:[#allocation3] sm:$0xff] %vm321_vm2, %v298_v55 }
  0x85   : > { %606 = vrot.lane.b32.xlu1 %v583_v54, %s1076_s28  ;;  %v347_v56 = vpop.permute.xlu0 %346 }
  0x86   : > { %371 = vst.msk [vmem:[#allocation3] sm:$0xff] %vm370_vm3, %v347_v56 }
  0x8b   : > { %v306_v57 = vpop.permute.xlu1 %305 }
  0x8c   : > { %326 = vst.msk [vmem:[#allocation3 + $0x40] sm:$0xff] %vm321_vm2, %v306_v57  ;;  %v300_v58 = vpop.permute.xlu0 %299 }
  0x8d   : > { %323 = vst.msk [vmem:[#allocation3 + $0x10] sm:$0xff] %vm321_vm2, %v300_v58 }
  0x8f   : > { %v308_v59 = vpop.permute.xlu1 %307 }
  0x90   : > { %327 = vst.msk [vmem:[#allocation3 + $0x50] sm:$0xff] %vm321_vm2, %v308_v59  ;;  %v355_v60 = vpop.permute.xlu0 %354 }
  0x91   : > { %375 = vst.msk [vmem:[#allocation3 + $0x40] sm:$0xff] %vm370_vm3, %v355_v60 }
  0x93   : > { %v349_v61 = vpop.permute.xlu1 %348 }
  0x94   : > { %372 = vst.msk [vmem:[#allocation3 + $0x10] sm:$0xff] %vm370_vm3, %v349_v61  ;;  %v396_v62 = vpop.permute.xlu0 %395 }
  0x95   : > { %420 = vst.msk [vmem:[#allocation3] sm:$0xff] %vm419_vm4, %v396_v62 }
  0x97   : > { %v357_v63 = vpop.permute.xlu1 %356 }
  0x98   : > { %376 = vst.msk [vmem:[#allocation3 + $0x50] sm:$0xff] %vm370_vm3, %v357_v63  ;;  %v404_v0 = vpop.permute.xlu0 %403 }
  0x99   : > { %424 = vst.msk [vmem:[#allocation3 + $0x40] sm:$0xff] %vm419_vm4, %v404_v0 }
  0x9b   : > { %v398_v1 = vpop.permute.xlu1 %397 }
  0x9c   : > { %421 = vst.msk [vmem:[#allocation3 + $0x10] sm:$0xff] %vm419_vm4, %v398_v1  ;;  %v445_v2 = vpop.permute.xlu0 %444  ;;  %v1409_v1 = vld [vmem:[%s1480_s2] ss:$0 sm:$0xff] }
  0x9d   : > { %469 = vst.msk [vmem:[#allocation3] sm:$0xff] %vm468_vm5, %v445_v2 }
  0x9f   : > { %v406_v3 = vpop.permute.xlu1 %405 }
  0xa0   : > { %425 = vst.msk [vmem:[#allocation3 + $0x50] sm:$0xff] %vm419_vm4, %v406_v3  ;;  %v453_v4 = vpop.permute.xlu0 %452 }
  0xa1   : > { %473 = vst.msk [vmem:[#allocation3 + $0x40] sm:$0xff] %vm468_vm5, %v453_v4 }
  0xa3   : > { %v447_v5 = vpop.permute.xlu1 %446 }
  0xa4   : > { %470 = vst.msk [vmem:[#allocation3 + $0x10] sm:$0xff] %vm468_vm5, %v447_v5  ;;  %v494_v6 = vpop.permute.xlu0 %493  ;;  %v1415_v5 = vld [vmem:[%s1481_s3] ss:$0 sm:$0xff] }
  0xa5   : > { %518 = vst.msk [vmem:[#allocation3] sm:$0xff] %vm517_vm6, %v494_v6 }
  0xa7   : > { %v455_v7 = vpop.permute.xlu1 %454 }
  0xa8   : > { %474 = vst.msk [vmem:[#allocation3 + $0x50] sm:$0xff] %vm468_vm5, %v455_v7  ;;  %v502_v8 = vpop.permute.xlu0 %501 }
  0xa9   : > { %522 = vst.msk [vmem:[#allocation3 + $0x40] sm:$0xff] %vm517_vm6, %v502_v8 }
  0xab   : > { %v496_v9 = vpop.permute.xlu1 %495 }
  0xac   : > { %519 = vst.msk [vmem:[#allocation3 + $0x10] sm:$0xff] %vm517_vm6, %v496_v9  ;;  %v544_v10 = vpop.permute.xlu0 %543 }
  0xad   : > { %568 = vst.msk [vmem:[#allocation3] sm:$0xff] %vm567_vm7, %v544_v10  ;;  %v1421_v10 = vld [vmem:[%s1482_s4] ss:$0 sm:$0xff] }
  0xaf   : > { %v504_v11 = vpop.permute.xlu1 %503 }
  0xb0   : > { %523 = vst.msk [vmem:[#allocation3 + $0x50] sm:$0xff] %vm517_vm6, %v504_v11  ;;  %v552_v12 = vpop.permute.xlu0 %551 }
  0xb1   : > { %572 = vst.msk [vmem:[#allocation3 + $0x40] sm:$0xff] %vm567_vm7, %v552_v12 }
  0xb3   : > { %v546_v13 = vpop.permute.xlu1 %545 }
  0xb4   : > { %569 = vst.msk [vmem:[#allocation3 + $0x10] sm:$0xff] %vm567_vm7, %v546_v13  ;;  %v593_v14 = vpop.permute.xlu0 %592 }
  0xb5   : > { %617 = vst.msk [vmem:[#allocation3] sm:$0xff] %vm616_vm8, %v593_v14 }
  0xb7   : > { %v554_v15 = vpop.permute.xlu1 %553 }
  0xb8   : > { %573 = vst.msk [vmem:[#allocation3 + $0x50] sm:$0xff] %vm567_vm7, %v554_v15  ;;  %v601_v16 = vpop.permute.xlu0 %600 }
  0xb9   : > { %621 = vst.msk [vmem:[#allocation3 + $0x40] sm:$0xff] %vm616_vm8, %v601_v16 }
  0xbb   : > { %v595_v17 = vpop.permute.xlu1 %594 }
  0xbc   : > { %618 = vst.msk [vmem:[#allocation3 + $0x10] sm:$0xff] %vm616_vm8, %v595_v17  ;;  %v302_v18 = vpop.permute.xlu0 %301  ;;  %v641_v22 = vld [vmem:[#allocation3] sm:$0xff] }
  0xbd   : > { %324 = vst.msk [vmem:[#allocation3 + $0x20] sm:$0xff] %vm321_vm2, %v302_v18 }
  0xbf   : > { %v603_v19 = vpop.permute.xlu1 %602 }
  0xc0   : > { %622 = vst.msk [vmem:[#allocation3 + $0x50] sm:$0xff] %vm616_vm8, %v603_v19  ;;  %v310_v23 = vpop.permute.xlu0 %309  ;;  %v649_v30 = vld [vmem:[#allocation3 + $0x40] sm:$0xff] }
  0xc1   : > { %328 = vst.msk [vmem:[#allocation3 + $0x60] sm:$0xff] %vm321_vm2, %v310_v23 }
  0xc3   : > { %v304_v24 = vpop.permute.xlu1 %303  ;;  %v643_v25 = vld [vmem:[#allocation3 + $0x10] sm:$0xff] }
  0xc4   : > { %325 = vst.msk [vmem:[#allocation3 + $0x30] sm:$0xff] %vm321_vm2, %v304_v24  ;;  %v657_v27 = vpack.c.bf16 %v643_v25, %v641_v22  ;;  %v351_v31 = vpop.permute.xlu0 %350 }
  0xc5   : > { %373 = vst.msk [vmem:[#allocation3 + $0x20] sm:$0xff] %vm370_vm3, %v351_v31 }
  0xc6   : > { %789 = vmatmul.mubr.bf16.vlgmr.msra.gmra.mrb[0].mxu0 %v657_v27 }
  0xc7   : > { %v312_v32 = vpop.permute.xlu1 %311  ;;  %v651_v33 = vld [vmem:[#allocation3 + $0x50] sm:$0xff]  ;;  %1007 = vmatprep.mubr.msk.bf16.mxu0 %vm226_vm0, %v660_v26 }
  0xc8   : > { %329 = vst.msk [vmem:[#allocation3 + $0x70] sm:$0xff] %vm321_vm2, %v312_v32  ;;  %v661_v35 = vpack.c.bf16 %v651_v33, %v649_v30  ;;  %v359_v36 = vpop.permute.xlu0 %358 }
  0xc9   : > { %377 = vst.msk [vmem:[#allocation3 + $0x60] sm:$0xff] %vm370_vm3, %v359_v36 }
  0xca   : > { %805 = vmatmul.mubr.bf16.vlgmr.msra.gmra.mrb[0].mxu1 %v661_v35 }
  0xcb   : > { %v353_v37 = vpop.permute.xlu1 %352  ;;  %1009 = vmatprep.mubr.msk.bf16.mxu1 %vm226_vm0, %v664_v34 }
  0xcc   : > { %374 = vst.msk [vmem:[#allocation3 + $0x30] sm:$0xff] %vm370_vm3, %v353_v37  ;;  %v400_v38 = vpop.permute.xlu0 %399 }
  0xcd   : > { %422 = vst.msk [vmem:[#allocation3 + $0x20] sm:$0xff] %vm419_vm4, %v400_v38 }
  0xcf   : > { %v361_v39 = vpop.permute.xlu1 %360 }
  0xd0   : > { %378 = vst.msk [vmem:[#allocation3 + $0x70] sm:$0xff] %vm370_vm3, %v361_v39  ;;  %v408_v40 = vpop.permute.xlu0 %407 }
  0xd1   : > { %426 = vst.msk [vmem:[#allocation3 + $0x60] sm:$0xff] %vm419_vm4, %v408_v40 }
  0xd3   : > { %v402_v41 = vpop.permute.xlu1 %401 }
  0xd4   : > { %423 = vst.msk [vmem:[#allocation3 + $0x30] sm:$0xff] %vm419_vm4, %v402_v41  ;;  %v449_v42 = vpop.permute.xlu0 %448 }
  0xd5   : > { %471 = vst.msk [vmem:[#allocation3 + $0x20] sm:$0xff] %vm468_vm5, %v449_v42 }
  0xd7   : > { %v410_v43 = vpop.permute.xlu1 %409 }
  0xd8   : > { %427 = vst.msk [vmem:[#allocation3 + $0x70] sm:$0xff] %vm419_vm4, %v410_v43  ;;  %v457_v44 = vpop.permute.xlu0 %456 }
  0xd9   : > { %475 = vst.msk [vmem:[#allocation3 + $0x60] sm:$0xff] %vm468_vm5, %v457_v44 }
  0xdb   : > { %v451_v45 = vpop.permute.xlu1 %450 }
  0xdc   : > { %472 = vst.msk [vmem:[#allocation3 + $0x30] sm:$0xff] %vm468_vm5, %v451_v45  ;;  %v498_v46 = vpop.permute.xlu0 %497 }
  0xdd   : > { %520 = vst.msk [vmem:[#allocation3 + $0x20] sm:$0xff] %vm517_vm6, %v498_v46 }
  0xdf   : > { %v459_v47 = vpop.permute.xlu1 %458 }
  0xe0   : > { %476 = vst.msk [vmem:[#allocation3 + $0x70] sm:$0xff] %vm468_vm5, %v459_v47  ;;  %v506_v48 = vpop.permute.xlu0 %505 }
  0xe1   : > { %524 = vst.msk [vmem:[#allocation3 + $0x60] sm:$0xff] %vm517_vm6, %v506_v48 }
  0xe3   : > { %v500_v49 = vpop.permute.xlu1 %499 }
  0xe4   : > { %521 = vst.msk [vmem:[#allocation3 + $0x30] sm:$0xff] %vm517_vm6, %v500_v49  ;;  %v548_v50 = vpop.permute.xlu0 %547 }
  0xe5   : > { %570 = vst.msk [vmem:[#allocation3 + $0x20] sm:$0xff] %vm567_vm7, %v548_v50 }
  0xe7   : > { %v508_v51 = vpop.permute.xlu1 %507 }
  0xe8   : > { %525 = vst.msk [vmem:[#allocation3 + $0x70] sm:$0xff] %vm517_vm6, %v508_v51  ;;  %v556_v52 = vpop.permute.xlu0 %555 }
  0xe9   : > { %574 = vst.msk [vmem:[#allocation3 + $0x60] sm:$0xff] %vm567_vm7, %v556_v52 }
  0xeb   : > { %v550_v53 = vpop.permute.xlu1 %549 }
  0xec   : > { %571 = vst.msk [vmem:[#allocation3 + $0x30] sm:$0xff] %vm567_vm7, %v550_v53  ;;  %v597_v54 = vpop.permute.xlu0 %596 }
  0xed   : > { %619 = vst.msk [vmem:[#allocation3 + $0x20] sm:$0xff] %vm616_vm8, %v597_v54 }
  0xef   : > { %v558_v55 = vpop.permute.xlu1 %557 }
  0xf0   : > { %575 = vst.msk [vmem:[#allocation3 + $0x70] sm:$0xff] %vm567_vm7, %v558_v55  ;;  %v605_v56 = vpop.permute.xlu0 %604 }
  0xf1   : > { %623 = vst.msk [vmem:[#allocation3 + $0x60] sm:$0xff] %vm616_vm8, %v605_v56 }
  0xf3   : > { %v599_v57 = vpop.permute.xlu1 %598 }
  0xf4   : > { %620 = vst.msk [vmem:[#allocation3 + $0x30] sm:$0xff] %vm616_vm8, %v599_v57  ;;  %v645_v59 = vld [vmem:[#allocation3 + $0x20] sm:$0xff] }
  0xf7   : > { %v607_v58 = vpop.permute.xlu1 %606 }
  0xf8   : > { %624 = vst.msk [vmem:[#allocation3 + $0x70] sm:$0xff] %vm616_vm8, %v607_v58  ;;  %v653_v62 = vld [vmem:[#allocation3 + $0x60] sm:$0xff] }
  0xfb   : > { %v647_v60 = vld [vmem:[#allocation3 + $0x30] sm:$0xff] }
  0xfc   : > { %v659_v61 = vpack.c.bf16 %v647_v60, %v645_v59 }
  0xfe   : > { %797 = vmatmul.mubr.bf16.gmra.mrb[4].mxu0 %v659_v61 }
  0xff   : > { %v655_v63 = vld [vmem:[#allocation3 + $0x70] sm:$0xff] }
 0x100   : > { %v663_v0 = vpack.c.bf16 %v655_v63, %v653_v62 }
 0x102   : > { %813 = vmatmul.mubr.bf16.gmra.mrb[4].mxu1 %v663_v0 }
 0x199   : > { %v790_v2 = vpop.f32.mrb[0].mxu0 }
 0x19a   : > { %v791_v3 = vadd.f32 %v1409_v1, %v790_v2  ;;  %v792_v4 = vpop.f32.mrb[1].mxu0 }
 0x19b   : > { %v793_v6 = vpop.f32.mrb[2].mxu0 }
 0x19c   : > { %v821_v7 = vmax.f32 %v791_v3, 0.0  ;;  %v794_v8 = vadd.f32 %v1409_v1, %v793_v6  ;;  %v795_v9 = vpop.f32.mrb[3].mxu0 }
 0x19d   : > { %v806_v11 = vpop.f32.mrb[0].mxu1 }
 0x19e   : > { %v836_v12 = vmul.f32 %v1415_v5, %v821_v7  ;;  %v822_v13 = vmax.f32 %v794_v8, 0.0  ;;  %v807_v14 = vadd.f32 %v1409_v1, %v806_v11  ;;  %v808_v15 = vpop.f32.mrb[1].mxu1 }
 0x19f   : > { %v809_v16 = vpop.f32.mrb[2].mxu1 }
 0x1a0   : > { %v851_v17 = vadd.f32 %v1421_v10, %v836_v12  ;;  %v837_v18 = vmul.f32 %v1415_v5, %v822_v13  ;;  %v825_v19 = vmax.f32 %v807_v14, 0.0  ;;  %v810_v20 = vadd.f32 %v1409_v1, %v809_v16  ;;  %v811_v21 = vpop.f32.mrb[3].mxu1 }
 0x1a2   : > { %859 = vst.msk [vmem:[#allocation4] sm:$0xff] %vm226_vm0, %v851_v17  ;;  %v852_v22 = vadd.f32 %v1421_v10, %v837_v18  ;;  %v840_v23 = vmul.f32 %v1415_v5, %v825_v19  ;;  %v826_v24 = vmax.f32 %v810_v20, 0.0 }
 0x1a4   : > { %860 = vst.msk [vmem:[#allocation4 + $0x8] sm:$0xff] %vm226_vm0, %v852_v22  ;;  %v855_v25 = vadd.f32 %v1421_v10, %v840_v23  ;;  %v841_v26 = vmul.f32 %v1415_v5, %v826_v24 }
 0x1a6   : > { %863 = vst.msk [vmem:[#allocation4 + $0x20] sm:$0xff] %vm226_vm0, %v855_v25  ;;  %v856_v27 = vadd.f32 %v1421_v10, %v841_v26 }
 0x1a8   : > { %864 = vst.msk [vmem:[#allocation4 + $0x28] sm:$0xff] %vm226_vm0, %v856_v27 }
 0x1a9   : > { %v867_v28 = vld [vmem:[#allocation4] ss:$2 sm:$0xf]  ;;  %v883_v29 = vld [vmem:[#allocation4 + $0x1] ss:$2 sm:$0xf] }
 0x1aa   : > { %v898_v30 = vmax.f32 %v867_v28, %v883_v29 }
 0x1ab   : > { %v869_v31 = vld [vmem:[#allocation4 + $0x8] ss:$2 sm:$0xf]  ;;  %v885_v32 = vld [vmem:[#allocation4 + $0x9] ss:$2 sm:$0xf] }
 0x1ac   : > { %907 = vst.msk [vmem:[#allocation5] sm:$0xf] %vm906_vm9, %v898_v30  ;;  %v899_v33 = vmax.f32 %v869_v31, %v885_v32 }
 0x1ad   : > { %v875_v34 = vld [vmem:[#allocation4 + $0x20] ss:$2 sm:$0xf]  ;;  %v891_v35 = vld [vmem:[#allocation4 + $0x21] ss:$2 sm:$0xf] }
 0x1ae   : > { %908 = vst.msk [vmem:[#allocation5 + $0x4] sm:$0xf] %vm906_vm9, %v899_v33  ;;  %v902_v36 = vmax.f32 %v875_v34, %v891_v35 }
 0x1af   : > { %v877_v37 = vld [vmem:[#allocation4 + $0x28] ss:$2 sm:$0xf]  ;;  %v893_v38 = vld [vmem:[#allocation4 + $0x29] ss:$2 sm:$0xf] }
 0x1b0   : > { %911 = vst.msk [vmem:[#allocation5 + $0x10] sm:$0xf] %vm906_vm9, %v902_v36  ;;  %v903_v39 = vmax.f32 %v877_v37, %v893_v38 }
 0x1b2   : > { %912 = vst.msk [vmem:[#allocation5 + $0x14] sm:$0xf] %vm906_vm9, %v903_v39 }
 0x1b3   : > { %v915_v40 = vld [vmem:[#allocation5] sm:$0xf] }
 0x1b5   : > { %v920_v41 = vld [vmem:[#allocation5 + $0x4] sm:$0xf] }
 0x1b6   : > { %v924_v42 = vmax.f32 %v915_v40, %v920_v41 }
 0x1b7   : > { %v917_v43 = vld [vmem:[#allocation5 + $0x10] sm:$0xf] }
 0x1b8   : > { %928 = vst.msk [vmem:[%s1445_s11] sm:$0xf] %vm906_vm9, %v924_v42 }
 0x1b9   : > { %v922_v44 = vld [vmem:[#allocation5 + $0x14] sm:$0xf] }
 0x1ba   : > { %v926_v45 = vmax.f32 %v917_v43, %v922_v44 }
 0x1bc   : > { %930 = vst.msk [vmem:[%s1445_s11 + $0x8] sm:$0xf] %vm906_vm9, %v926_v45 }
 0x1d1   : > { %v798_v46 = vpop.f32.mrb[4].mxu0 }
 0x1d2   : > { %v799_v47 = vadd.f32 %v1409_v1, %v798_v46  ;;  %v800_v48 = vpop.f32.mrb[5].mxu0 }
 0x1d3   : > { %v801_v49 = vpop.f32.mrb[6].mxu0 }
 0x1d4   : > { %v823_v50 = vmax.f32 %v799_v47, 0.0  ;;  %v802_v51 = vadd.f32 %v1409_v1, %v801_v49  ;;  %v803_v52 = vpop.f32.mrb[7].mxu0 }
 0x1d5   : > { %v814_v53 = vpop.f32.mrb[4].mxu1 }
 0x1d6   : > { %v838_v54 = vmul.f32 %v1415_v5, %v823_v50  ;;  %v824_v55 = vmax.f32 %v802_v51, 0.0  ;;  %v815_v56 = vadd.f32 %v1409_v1, %v814_v53  ;;  %v816_v57 = vpop.f32.mrb[5].mxu1 }
 0x1d7   : > { %v817_v58 = vpop.f32.mrb[6].mxu1 }
 0x1d8   : > { %v853_v59 = vadd.f32 %v1421_v10, %v838_v54  ;;  %v839_v60 = vmul.f32 %v1415_v5, %v824_v55  ;;  %v827_v61 = vmax.f32 %v815_v56, 0.0  ;;  %v818_v62 = vadd.f32 %v1409_v1, %v817_v58  ;;  %v819_v63 = vpop.f32.mrb[7].mxu1 }
 0x1da   : > { %861 = vst.msk [vmem:[#allocation4 + $0x10] sm:$0xff] %vm226_vm0, %v853_v59  ;;  %v854_v0 = vadd.f32 %v1421_v10, %v839_v60  ;;  %v842_v2 = vmul.f32 %v1415_v5, %v827_v61  ;;  %v828_v3 = vmax.f32 %v818_v62, 0.0 }
 0x1dc   : > { %862 = vst.msk [vmem:[#allocation4 + $0x18] sm:$0xff] %vm226_vm0, %v854_v0  ;;  %v857_v4 = vadd.f32 %v1421_v10, %v842_v2  ;;  %v843_v6 = vmul.f32 %v1415_v5, %v828_v3 }
 0x1de   : > { %865 = vst.msk [vmem:[#allocation4 + $0x30] sm:$0xff] %vm226_vm0, %v857_v4  ;;  %v858_v7 = vadd.f32 %v1421_v10, %v843_v6 }
 0x1e0   : > { %866 = vst.msk [vmem:[#allocation4 + $0x38] sm:$0xff] %vm226_vm0, %v858_v7 }
 0x1e1   : > { %v871_v1 = vld [vmem:[#allocation4 + $0x10] ss:$2 sm:$0xf]  ;;  %v887_v8 = vld [vmem:[#allocation4 + $0x11] ss:$2 sm:$0xf] }
 0x1e2   : > { %v900_v9 = vmax.f32 %v871_v1, %v887_v8 }
 0x1e3   : > { %v873_v11 = vld [vmem:[#allocation4 + $0x18] ss:$2 sm:$0xf]  ;;  %v889_v12 = vld [vmem:[#allocation4 + $0x19] ss:$2 sm:$0xf] }
 0x1e4   : > { %909 = vst.msk [vmem:[#allocation5 + $0x8] sm:$0xf] %vm906_vm9, %v900_v9  ;;  %v901_v13 = vmax.f32 %v873_v11, %v889_v12 }
 0x1e5   : > { %v879_v14 = vld [vmem:[#allocation4 + $0x30] ss:$2 sm:$0xf]  ;;  %v895_v15 = vld [vmem:[#allocation4 + $0x31] ss:$2 sm:$0xf] }
 0x1e6   : > { %910 = vst.msk [vmem:[#allocation5 + $0xc] sm:$0xf] %vm906_vm9, %v901_v13  ;;  %v904_v5 = vmax.f32 %v879_v14, %v895_v15 }
 0x1e7   : > { %v881_v16 = vld [vmem:[#allocation4 + $0x38] ss:$2 sm:$0xf]  ;;  %v897_v17 = vld [vmem:[#allocation4 + $0x39] ss:$2 sm:$0xf] }
 0x1e8   : > { %913 = vst.msk [vmem:[#allocation5 + $0x18] sm:$0xf] %vm906_vm9, %v904_v5  ;;  %v905_v10 = vmax.f32 %v881_v16, %v897_v17 }
 0x1ea   : > { %914 = vst.msk [vmem:[#allocation5 + $0x1c] sm:$0xf] %vm906_vm9, %v905_v10 }
 0x1eb   : > { %v916_v18 = vld [vmem:[#allocation5 + $0x8] sm:$0xf] }
 0x1ed   : > { %v921_v19 = vld [vmem:[#allocation5 + $0xc] sm:$0xf] }
 0x1ee   : > { %v925_v20 = vmax.f32 %v916_v18, %v921_v19 }
 0x1ef   : > { %v918_v21 = vld [vmem:[#allocation5 + $0x18] sm:$0xf] }
 0x1f0   : > { %929 = vst.msk [vmem:[%s1445_s11 + $0x4] sm:$0xf] %vm906_vm9, %v925_v20 }
 0x1f1   : > { %v923_v22 = vld [vmem:[#allocation5 + $0x1c] sm:$0xf] }
 0x1f2   : > { %v927_v23 = vmax.f32 %v918_v21, %v923_v22 }
 0x1f4   : > { %931 = vst.msk [vmem:[%s1445_s11 + $0xc] sm:$0xf] %vm906_vm9, %v927_v23 }
 0x1f5 PF: > { %s15_s18 = sadd.s32 1, %s1066_s18  }
 0x1f6   : > { %p12_p4 = scmp.ge.s32.totalorder %s15_s18, 4  }
 0x1f8   :  { %14 = sbr.rel (!%p12_p4) target bundleno = 1 (0x1), region = 88 }

// kernel: vgg_forward.9
= control target key start
LH: loop header
LB: loop body
LE: loop exit
PB: predicated region body
PF: predicated region fallthrough
CT: control target
= control target key end

     0   :  { %8 = vsyncpa [#allocation4], 0  ;;  %s695_s12 = smov 0   ;;  %s697_s13 = smov 0   ;;  %s784_s0 = inlined_call_operand.vmem [shape: f32[2,1024], index: 0, kind: input, shape index: {}]   ;;  %s785_s1 = inlined_call_operand.vmem [shape: bf16[1024,10], index: 1, kind: input, shape index: {}]   ;;  %s786_s2 = inlined_call_operand.vmem [shape: f32[1,10], index: 2, kind: input, shape index: {}]   ;;  %s787_s3 = inlined_call_operand.hbm [shape: f32[2,10], index: 3, kind: output, shape index: {}]  }
   0x1   :  { %s699_s14 = smov 0  }
   0x2 LB: > { %s516_s15 = sadd.s32 4294967295, %s671_s14   ;;  %s23_s16 = sadd.s32 1, %s667_s13  ;;  %s671_s14 = sphi %s699_s14, %s14_s14   ;;  %s667_s13 = sphi %s697_s13, %s790_s13   ;;  %s663_s12 = sphi %s695_s12, %s789_s12  }
   0x3   : > { %p24_p0 = scmp.ge.s32.totalorder %s23_s16, 4  ;;  %p520_p1 = scmp.ge.s32.totalorder %s671_s14, 1 }
   0x4   : > { %p175_p2 = scmp.lt.s32.totalorder %s671_s14, 5 }
   0x5   : > { %s792_s16 = smov (%p24_p0, %s23_s16), 0 }
   0x6   : > { %p176_p3 = pnand %p520_p1, %p175_p2 }
   0x7   : > { %s521_s17 = sshll.u32 (!%p176_p3), %s663_s12, 1  ;;  %s523_s18 = sshll.u32 (!%p176_p3), %s663_s12, 5 }
   0x8   : > { %179 = sbr.rel (%p176_p3) target bundleno = 311 (0x137), region = 32  ;;  %p206_p4 = scmp.lt.s32.totalorder (!%p176_p3), %s521_s17, 7 }
   0x9   : > { %p212_p5 = scmp.lt.s32.totalorder (!%p176_p3), %s523_s18, 127  ;;  %p525_p6 = scmp.ne.s32.totalorder (!%p176_p3), %s663_s12, 0 }
   0xf   : > { %s794_s17 = smov (!%p206_p4, %s521_s17), 7  ;;  %s796_s18 = smov (!%p212_p5, %s523_s18), 127 }
  0x10   : > { %s522_s19 = sshll.u32 %s794_s17, 1  ;;  %s524_s23 = sshll.u32 %s796_s18, 2  ;;  %vm228_vm0 = vcmask (!%p525_p6), 74752   ;;  %v673_v0 = vmov (!%p525_p6), 0.0  }
  0x11   : > { %s209_s22 = scalar_lea.vmem %s784_s0, %s522_s19  ;;  %s724_s26 = scalar_lea.vmem %s785_s1, %s524_s23  ;;  %229 = vst.msk [vmem:[#allocation2] sm:$0x3] (!%p525_p6), %vm228_vm0, %v673_v0 }
  0x12   : > { %227 = sbr.rel (%p525_p6) target bundleno = 25 (0x19), region = 36 }
  0x19 PF: > { %v603_v1 = vld [vmem:[%s724_s26 + $0x40] sm:$0xff]   ;;  %v605_v3 = vld [vmem:[%s724_s26 + $0x48] sm:$0xff]   ;;  %v607_v5 = vld [vmem:[%s724_s26 + $0x50] sm:$0xff]   ;;  %vm414_vm1 = vcmask 74752   ;;  %p543_p7 = scmp.ne.s32.totalorder %s663_s12, 3 }
  0x1a   : > { %v604_v2 = vld [vmem:[%s724_s26] sm:$0xff]   ;;  %549 = vmatprep.subr.bf16.mxu0 %v603_v1  ;;  %v606_v4 = vld [vmem:[%s724_s26 + $0x8] sm:$0xff]   ;;  %v608_v6 = vld [vmem:[%s724_s26 + $0x10] sm:$0xff]  }
  0x1b   : > { %550 = vmatpush3.bf16.msra.mxu0 %v604_v2  ;;  %v609_v7 = vld [vmem:[%s724_s26 + $0x58] sm:$0xff]   ;;  %v611_v9 = vld [vmem:[%s724_s26 + $0x60] sm:$0xff]   ;;  %v613_v11 = vld [vmem:[%s724_s26 + $0x68] sm:$0xff]  }
  0x1c   : > { %551 = vmatprep.subr.bf16.mxu0 %v605_v3  ;;  %v610_v8 = vld [vmem:[%s724_s26 + $0x18] sm:$0xff]   ;;  %v612_v10 = vld [vmem:[%s724_s26 + $0x20] sm:$0xff]   ;;  %v614_v14 = vld [vmem:[%s724_s26 + $0x28] sm:$0xff]  }
  0x1d   : > { %v526_v12 = vld.sshfl [vmem:[%s209_s22] sm:$0x33 pattern:$0x76325410]  ;;  %v615_v16 = vld [vmem:[%s724_s26 + $0x70] sm:$0xff]   ;;  %v617_v18 = vld [vmem:[%s724_s26 + $0x78] sm:$0xff]  }
  0x1e   : > { %v240_v13 = vcombine.high %v526_v12, %v526_v12  ;;  %v616_v17 = vld [vmem:[%s724_s26 + $0x30] sm:$0xff]   ;;  %v618_v19 = vld [vmem:[%s724_s26 + $0x38] sm:$0xff]   ;;  %v243_v20 = vpack.c.bf16 %v526_v12, %v526_v12  ;;  %v230_v22 = vld [vmem:[#allocation2] sm:$0x3] }
  0x1f   : > { %552 = vmatpush3.bf16.msra.mxu0 %v606_v4  ;;  %v544_v29 = vld [vmem:[%s786_s2] ss:$0 sm:$0xff] (!%p543_p7) }
  0x20   : > { %553 = vmatprep.subr.bf16.mxu0 %v607_v5  ;;  %v244_v15 = vpack.c.bf16 %v240_v13, %v240_v13 }
  0x22   : > { %405 = vmatprep.mubr.bf16.mxu0 %v244_v15 }
  0x23   : > { %554 = vmatpush3.bf16.msra.mxu0 %v608_v6 }
  0x24   : > { %555 = vmatprep.subr.bf16.mxu0 %v609_v7 }
  0x27   : > { %556 = vmatpush3.bf16.msra.mxu0 %v610_v8 }
  0x28   : > { %557 = vmatprep.subr.bf16.mxu0 %v611_v9 }
  0x2b   : > { %558 = vmatpush3.bf16.msra.mxu0 %v612_v10 }
  0x2c   : > { %559 = vmatprep.subr.bf16.mxu0 %v613_v11 }
  0x2f   : > { %560 = vmatpush3.bf16.msra.mxu0 %v614_v14 }
  0x30   : > { %561 = vmatprep.subr.bf16.mxu0 %v615_v16 }
  0x33   : > { %562 = vmatpush3.bf16.msra.mxu0 %v616_v17 }
  0x34   : > { %563 = vmatprep.subr.bf16.mxu0 %v617_v18 }
  0x37   : > { %564 = vmatpush3.bf16.msra.mxu0 %v618_v19 }
  0x3a   : > { %406 = vmatmul.mubr.bf16.vlgmr.msra.gmra.mrb[0].mxu0 %v243_v20 }
 0x10d   : > { %v565_v21 = vpop.f32.mrb[0].mxu0  ;;  %419 = sbr.rel (%p543_p7) target bundleno = 286 (0x11e), region = 40 }
 0x10e   : > { %v566_v23 = vpop.f32.mrb[1].mxu0 }
 0x10f   : > { %v567_v24 = vadd.f32 %v566_v23, %v565_v21  ;;  %v568_v25 = vpop.f32.mrb[2].mxu0 }
 0x110   : > { %v569_v26 = vpop.f32.mrb[3].mxu0 }
 0x111   : > { %v413_v27 = vadd.f32 %v567_v24, %v230_v22 }
 0x113   : > { %415 = vst.msk [vmem:[#allocation2] sm:$0x3] %vm414_vm1, %v413_v27 }
 0x11a   : > { %v420_v28 = vld [vmem:[#allocation2] sm:$0x3] }
 0x11b   : > { %v428_v30 = vadd.f32 %v544_v29, %v420_v28 }
 0x11d   : > { %429 = vst.msk [vmem:[#allocation3] sm:$0x3] %vm414_vm1, %v428_v30 }
 0x11e PF: > { %p749_p8 = scmp.eq.s32.totalorder %s516_s15, 3  ;;  %s674_s30 = smov [#allocation3]  }
 0x11f   : > { %s439_s4 = sshll.u32 %s674_s30, 4  ;;  %s440_s4 = int_to_ptr.vmem [resolvable:$true] %s439_s4 }
 0x120   : > { %s619_s5 = scalar_lea.vmem %s440_s4, 32  ;;  %p626_p12 = scmp.lt.s32.totalorder %s440_s4, %s440_s4 }
 0x121   : > { %p620_p9 = scmp.ne.s32.totalorder %s440_s4, %s619_s5  ;;  %p627_p13 = scmp.lt.s32.totalorder %s619_s5, %s619_s5 }
 0x123   : > { %p621_p10 = pnand %p620_p9, %p749_p8  ;;  %p628_p0 = por %p627_p13, %p626_p12 }
 0x125   : > { %p622_p11 = pneg %p621_p10 }
 0x127   : > { %p629_p1 = pnand %p628_p0, %p622_p11 }
 0x129   : > { %632 = shalt.err (!%p629_p1)
}
 0x12a   : > { %s633_s8 = scalar_lea.hbm %s787_s3, 32 }
 0x12b   : > { %p634_p2 = scmp.ne.s32.totalorder %s787_s3, %s633_s8  ;;  %p639_p5 = scmp.lt.u32.totalorder %s633_s8, %s787_s3 }
 0x12d   : > { %p635_p3 = pnand %p634_p2, %p749_p8 }
 0x12f   : > { %p636_p4 = pneg %p635_p3 }
 0x131   : > { %p641_p6 = pnand %p639_p5, %p636_p4 }
 0x133   : > { %644 = shalt.err (!%p641_p6)
}
 0x134   : > { %572 = dma.vmem_to_hbm [thread:$0]  (%p749_p8), %s440_s4, 32, %s787_s3, [#allocation4]  }
 0x135   : > { %658 = dma.done.wait (%p749_p8), [#allocation4], 32  }
 0x136   : > { %660 = vsyncadd (%p749_p8), [#allocation4], 4294967264 }
 0x137 PF: > { %s14_s14 = sadd.s32 1, %s671_s14   ;;  %s789_s12 = smov %s667_s13 }
 0x138   : > { %p11_p7 = scmp.ge.s32.totalorder %s14_s14, 6   ;;  %s790_s13 = smov %s792_s16 }
 0x13a   :  { %13 = sbr.rel (!%p11_p7) target bundleno = 2 (0x2), region = 74 }
 0x141   :  { %452 = vsyncpa [#allocation4], 1 }
 0x142   :  { %454 = vsyncpa [#allocation4 + $0x1], 1 }

// kernel: vgg_forward.5
= control target key start
LH: loop header
LB: loop body
LE: loop exit
PB: predicated region body
PF: predicated region fallthrough
CT: control target
= control target key end

     0   :  { %s2738_s18 = smov 0   ;;  %s4023_s0 = inlined_call_operand.vmem [shape: f32[2,16,16,4], index: 0, kind: input, shape index: {}]   ;;  %s4024_s1 = inlined_call_operand.vmem [shape: bf16[36,8], index: 1, kind: input, shape index: {}]   ;;  %s4025_s2 = inlined_call_operand.vmem [shape: f32[1,8], index: 2, kind: input, shape index: {}]   ;;  %s4026_s3 = inlined_call_operand.vmem [shape: f32[1,8], index: 3, kind: input, shape index: {}]   ;;  %s4027_s4 = inlined_call_operand.vmem [shape: f32[1,8], index: 4, kind: input, shape index: {}]   ;;  %s4028_s5 = inlined_call_operand.vmem [shape: f32[2,8,8,8], index: 5, kind: output, shape index: {}]  }
   0x1 LB: > { %s2571_s19 = sadd.s32 4294967295, %s2697_s18   ;;  %p2575_p0 = scmp.ge.s32.totalorder %s2697_s18, 1  ;;  %s2697_s18 = sphi %s2738_s18, %s15_s18  }
   0x2   : > { %p187_p1 = scmp.lt.s32.totalorder %s2697_s18, 3 }
   0x4   : > { %p188_p2 = pnand %p2575_p0, %p187_p1 }
   0x6   : > { %191 = sbr.rel (%p188_p2) target bundleno = 926 (0x39e), region = 40 }
   0xd   : > { %vm226_vm0 = vcmask 31744   ;;  %p2748_p3 = scmp.lt.s32.totalorder %s2571_s19, 1  ;;  %vm229_vm1 = vcmask 25600   ;;  %v2699_v0 = vmov 0.0   ;;  %s2700_s25 = smov 4   ;;  %vm571_vm2 = vcmask 64544  }
   0xe   : > { %227 = vst.msk [vmem:[#allocation2] sm:$0xff] %vm226_vm0, %v2699_v0  ;;  %228 = vst.msk [vmem:[#allocation2 + $0x8] sm:$0xff] %vm226_vm0, %v2699_v0  ;;  %s2701_s26 = smov 8   ;;  %s2702_s27 = smov 12   ;;  %vm764_vm3 = vcmask 97344   ;;  %vm957_vm4 = vcmask 130144  }
   0xf   : > { %231 = vst.msk [vmem:[#allocation2 + $0x18] sm:$0xff] %vm226_vm0, %v2699_v0  ;;  %232 = vst.msk [vmem:[#allocation2 + $0x20] sm:$0xff] %vm226_vm0, %v2699_v0  ;;  %s4052_s19 = smov (!%p2748_p3, %s2571_s19), 1  ;;  %s2703_s28 = smov 16   ;;  %vm2080_vm5 = vcmask 1041408   ;;  %vm1150_vm6 = vcmask 162944  }
  0x10   : > { %234 = vst.msk [vmem:[#allocation2 + $0x30] sm:$0xff] %vm226_vm0, %v2699_v0  ;;  %235 = vst.msk [vmem:[#allocation2 + $0x38] sm:$0xff] %vm226_vm0, %v2699_v0  ;;  %s2604_s21 = sshll.u32 %s4052_s19, 8  ;;  %s2704_s29 = smov 20   ;;  %vm1343_vm7 = vcmask 195744   ;;  %vm1537_vm8 = vcmask 228544  }
  0x11   : > { %237 = vst.msk [vmem:[#allocation2 + $0x48] sm:$0xff] %vm226_vm0, %v2699_v0  ;;  %238 = vst.msk [vmem:[#allocation2 + $0x50] sm:$0xff] %vm226_vm0, %v2699_v0  ;;  %s2816_s24 = scalar_lea.vmem %s4023_s0, %s2604_s21  ;;  %s2705_s30 = smov 24   ;;  %vm1730_vm9 = vcmask 261344   ;;  %vm1923_vm10 = vcmask 294144   ;;  %vm2031_vm11 = vcmask 293888  }
  0x12   : > { %240 = vst.msk [vmem:[#allocation2 + $0x60] sm:$0xff] %vm226_vm0, %v2699_v0  ;;  %241 = vst.msk [vmem:[#allocation2 + $0x68] sm:$0xff] %vm226_vm0, %v2699_v0  ;;  %v282_v1 = vld [vmem:[%s2816_s24] sm:$0xff]  ;;  %v283_v2 = vld [vmem:[%s2816_s24 + $0x8] sm:$0xff]  ;;  %s2706_s6 = smov 28   ;;  %s2707_s9 = smov 32  }
  0x13   : > { %243 = vst.msk [vmem:[#allocation2 + $0x78] sm:$0xff] %vm226_vm0, %v2699_v0  ;;  %244 = vst.msk [vmem:[#allocation2 + $0x80] sm:$0xff] %vm226_vm0, %v2699_v0  ;;  %v284_v3 = vld [vmem:[%s2816_s24 + $0x10] sm:$0xff]  ;;  %v285_v4 = vld [vmem:[%s2816_s24 + $0x18] sm:$0xff]  ;;  %vm2355_vm12 = vcmask 64512   ;;  %s2605_s22 = sshll.u32 %s4052_s19, 6 }
  0x14   : > { %246 = vst.msk [vmem:[#allocation2 + $0x90] sm:$0xff] %vm226_vm0, %v2699_v0  ;;  %247 = vst.msk [vmem:[#allocation2 + $0x98] sm:$0xff] %vm226_vm0, %v2699_v0  ;;  %v286_v5 = vld [vmem:[%s2816_s24 + $0x20] sm:$0xff]  ;;  %v287_v6 = vld [vmem:[%s2816_s24 + $0x28] sm:$0xff] }
  0x15   : > { %249 = vst.msk [vmem:[#allocation2 + $0xa8] sm:$0xff] %vm226_vm0, %v2699_v0  ;;  %250 = vst.msk [vmem:[#allocation2 + $0xb0] sm:$0xff] %vm226_vm0, %v2699_v0  ;;  %v411_v7 = vld [vmem:[#allocation2 + $0x1] sm:$0xff]  ;;  %v288_v9 = vld [vmem:[%s2816_s24 + $0x30] sm:$0xff] }
  0x16   : > { %252 = vst.msk [vmem:[#allocation2 + $0xc0] sm:$0xff] %vm226_vm0, %v2699_v0  ;;  %253 = vst.msk [vmem:[#allocation2 + $0xc8] sm:$0xff] %vm226_vm0, %v2699_v0  ;;  %475 = vrot.lane.b32.xlu0 %v411_v7, %s2700_s25  ;;  %v289_v10 = vld [vmem:[%s2816_s24 + $0x38] sm:$0xff]  ;;  %v290_v11 = vld [vmem:[%s2816_s24 + $0x40] sm:$0xff] }
  0x17   : > { %255 = vst.msk [vmem:[#allocation2 + $0xd8] sm:$0xff] %vm226_vm0, %v2699_v0  ;;  %256 = vst.msk [vmem:[#allocation2 + $0xe0] sm:$0xff] %vm226_vm0, %v2699_v0  ;;  %v291_v12 = vld [vmem:[%s2816_s24 + $0x48] sm:$0xff]  ;;  %v292_v13 = vld [vmem:[%s2816_s24 + $0x50] sm:$0xff] }
  0x18   : > { %258 = vst.msk [vmem:[#allocation2 + $0xf0] sm:$0xff] %vm226_vm0, %v2699_v0  ;;  %259 = vst.msk [vmem:[#allocation2 + $0xf8] sm:$0xff] %vm226_vm0, %v2699_v0  ;;  %v293_v14 = vld [vmem:[%s2816_s24 + $0x58] sm:$0xff]  ;;  %v294_v15 = vld [vmem:[%s2816_s24 + $0x60] sm:$0xff] }
  0x19   : > { %261 = vst.msk [vmem:[#allocation2 + $0x108] sm:$0xff] %vm226_vm0, %v2699_v0  ;;  %262 = vst.msk [vmem:[#allocation2 + $0x110] sm:$0xff] %vm226_vm0, %v2699_v0  ;;  %v295_v16 = vld [vmem:[%s2816_s24 + $0x68] sm:$0xff]  ;;  %v296_v17 = vld [vmem:[%s2816_s24 + $0x70] sm:$0xff] }
  0x1a   : > { %264 = vst.msk [vmem:[#allocation2 + $0x120] sm:$0xff] %vm226_vm0, %v2699_v0  ;;  %265 = vst.msk [vmem:[#allocation2 + $0x128] sm:$0xff] %vm226_vm0, %v2699_v0  ;;  %v297_v18 = vld [vmem:[%s2816_s24 + $0x78] sm:$0xff]  ;;  %v298_v19 = vld [vmem:[%s2816_s24 + $0x80] sm:$0xff] }
  0x1b   : > { %267 = vst.msk [vmem:[#allocation2 + $0x138] sm:$0xff] %vm226_vm0, %v2699_v0  ;;  %268 = vst.msk [vmem:[#allocation2 + $0x140] sm:$0xff] %vm226_vm0, %v2699_v0  ;;  %v299_v20 = vld [vmem:[%s2816_s24 + $0x88] sm:$0xff]  ;;  %v300_v21 = vld [vmem:[%s2816_s24 + $0x90] sm:$0xff] }
  0x1c   : > { %270 = vst.msk [vmem:[#allocation2 + $0x150] sm:$0xff] %vm226_vm0, %v2699_v0  ;;  %271 = vst.msk [vmem:[#allocation2 + $0x158] sm:$0xff] %vm226_vm0, %v2699_v0  ;;  %v301_v22 = vld [vmem:[%s2816_s24 + $0x98] sm:$0xff]  ;;  %v302_v23 = vld [vmem:[%s2816_s24 + $0xa0] sm:$0xff] }
  0x1d   : > { %273 = vst.msk [vmem:[#allocation2 + $0x168] sm:$0xff] %vm226_vm0, %v2699_v0  ;;  %274 = vst.msk [vmem:[#allocation2 + $0x170] sm:$0xff] %vm226_vm0, %v2699_v0  ;;  %v303_v24 = vld [vmem:[%s2816_s24 + $0xa8] sm:$0xff]  ;;  %v304_v28 = vld [vmem:[%s2816_s24 + $0xb0] sm:$0xff] }
  0x1e   : > { %276 = vst.msk [vmem:[#allocation2 + $0x180] sm:$0xff] %vm226_vm0, %v2699_v0  ;;  %277 = vst.msk [vmem:[#allocation2 + $0x188] sm:$0xff] %vm226_vm0, %v2699_v0  ;;  %v305_v29 = vld [vmem:[%s2816_s24 + $0xb8] sm:$0xff]  ;;  %v306_v33 = vld [vmem:[%s2816_s24 + $0xc0] sm:$0xff] }
  0x1f   : > { %279 = vst.msk [vmem:[#allocation2 + $0x198] sm:$0xff] %vm226_vm0, %v2699_v0  ;;  %280 = vst.msk [vmem:[#allocation2 + $0x1a0] sm:$0xff] %vm226_vm0, %v2699_v0  ;;  %v307_v34 = vld [vmem:[%s2816_s24 + $0xc8] sm:$0xff]  ;;  %v308_v35 = vld [vmem:[%s2816_s24 + $0xd0] sm:$0xff] }
  0x20   : > { %230 = vst.msk [vmem:[#allocation2 + $0x10] sm:$0x3] %vm229_vm1, %v2699_v0  ;;  %233 = vst.msk [vmem:[#allocation2 + $0x28] sm:$0x3] %vm229_vm1, %v2699_v0  ;;  %v309_v36 = vld [vmem:[%s2816_s24 + $0xd8] sm:$0xff]  ;;  %v310_v37 = vld [vmem:[%s2816_s24 + $0xe0] sm:$0xff] }
  0x21   : > { %236 = vst.msk [vmem:[#allocation2 + $0x40] sm:$0x3] %vm229_vm1, %v2699_v0  ;;  %239 = vst.msk [vmem:[#allocation2 + $0x58] sm:$0x3] %vm229_vm1, %v2699_v0  ;;  %v311_v38 = vld [vmem:[%s2816_s24 + $0xe8] sm:$0xff]  ;;  %v347_v45 = vld [vmem:[#allocation2] sm:$0xff] }
  0x22   : > { %242 = vst.msk [vmem:[#allocation2 + $0x70] sm:$0x3] %vm229_vm1, %v2699_v0  ;;  %245 = vst.msk [vmem:[#allocation2 + $0x88] sm:$0x3] %vm229_vm1, %v2699_v0  ;;  %v348_v48 = vld [vmem:[#allocation2 + $0x8] sm:$0xff] }
  0x23   : > { %248 = vst.msk [vmem:[#allocation2 + $0xa0] sm:$0x3] %vm229_vm1, %v2699_v0  ;;  %251 = vst.msk [vmem:[#allocation2 + $0xb8] sm:$0x3] %vm229_vm1, %v2699_v0 }
  0x24   : > { %254 = vst.msk [vmem:[#allocation2 + $0xd0] sm:$0x3] %vm229_vm1, %v2699_v0  ;;  %257 = vst.msk [vmem:[#allocation2 + $0xe8] sm:$0x3] %vm229_vm1, %v2699_v0 }
  0x25   : > { %260 = vst.msk [vmem:[#allocation2 + $0x100] sm:$0x3] %vm229_vm1, %v2699_v0  ;;  %263 = vst.msk [vmem:[#allocation2 + $0x118] sm:$0x3] %vm229_vm1, %v2699_v0 }
  0x26   : > { %266 = vst.msk [vmem:[#allocation2 + $0x130] sm:$0x3] %vm229_vm1, %v2699_v0  ;;  %269 = vst.msk [vmem:[#allocation2 + $0x148] sm:$0x3] %vm229_vm1, %v2699_v0 }
  0x27   : > { %272 = vst.msk [vmem:[#allocation2 + $0x160] sm:$0x3] %vm229_vm1, %v2699_v0  ;;  %275 = vst.msk [vmem:[#allocation2 + $0x178] sm:$0x3] %vm229_vm1, %v2699_v0  ;;  %v412_v8 = vld [vmem:[#allocation2 + $0x9] sm:$0xff] }
  0x28   : > { %278 = vst.msk [vmem:[#allocation2 + $0x190] sm:$0x3] %vm229_vm1, %v2699_v0  ;;  %281 = vst.msk [vmem:[#allocation2 + $0x1a8] sm:$0x3] %vm229_vm1, %v2699_v0  ;;  %477 = vrot.lane.b32.xlu0 %v412_v8, %s2700_s25 }
  0x29   : > { %315 = vst.msk [vmem:[#allocation2 + $0x19] sm:$0xff] %vm226_vm0, %v282_v1  ;;  %316 = vst.msk [vmem:[#allocation2 + $0x21] sm:$0xff] %vm226_vm0, %v283_v2 }
  0x2a   : > { %317 = vst.msk [vmem:[#allocation2 + $0x31] sm:$0xff] %vm226_vm0, %v284_v3  ;;  %318 = vst.msk [vmem:[#allocation2 + $0x39] sm:$0xff] %vm226_vm0, %v285_v4 }
  0x2b   : > { %319 = vst.msk [vmem:[#allocation2 + $0x49] sm:$0xff] %vm226_vm0, %v286_v5  ;;  %320 = vst.msk [vmem:[#allocation2 + $0x51] sm:$0xff] %vm226_vm0, %v287_v6 }
  0x2c   : > { %321 = vst.msk [vmem:[#allocation2 + $0x61] sm:$0xff] %vm226_vm0, %v288_v9  ;;  %322 = vst.msk [vmem:[#allocation2 + $0x69] sm:$0xff] %vm226_vm0, %v289_v10 }
  0x2d   : > { %323 = vst.msk [vmem:[#allocation2 + $0x79] sm:$0xff] %vm226_vm0, %v290_v11  ;;  %324 = vst.msk [vmem:[#allocation2 + $0x81] sm:$0xff] %vm226_vm0, %v291_v12 }
  0x2e   : > { %325 = vst.msk [vmem:[#allocation2 + $0x91] sm:$0xff] %vm226_vm0, %v292_v13  ;;  %326 = vst.msk [vmem:[#allocation2 + $0x99] sm:$0xff] %vm226_vm0, %v293_v14 }
  0x2f   : > { %327 = vst.msk [vmem:[#allocation2 + $0xa9] sm:$0xff] %vm226_vm0, %v294_v15  ;;  %328 = vst.msk [vmem:[#allocation2 + $0xb1] sm:$0xff] %vm226_vm0, %v295_v16 }
  0x30   : > { %329 = vst.msk [vmem:[#allocation2 + $0xc1] sm:$0xff] %vm226_vm0, %v296_v17  ;;  %330 = vst.msk [vmem:[#allocation2 + $0xc9] sm:$0xff] %vm226_vm0, %v297_v18  ;;  %v2861_v25 = vld [vmem:[#allocation2 + $0x19] sm:$0xff]  ;;  %v2870_v27 = vld [vmem:[#allocation2 + $0x21] sm:$0xff] }
  0x31   : > { %331 = vst.msk [vmem:[#allocation2 + $0xd9] sm:$0xff] %vm226_vm0, %v298_v19  ;;  %332 = vst.msk [vmem:[#allocation2 + $0xe1] sm:$0xff] %vm226_vm0, %v299_v20  ;;  %v2863_v26 = vld [vmem:[#allocation2 + $0x31] sm:$0xff]  ;;  %479 = vrot.lane.b32.xlu1 %v2861_v25, %s2700_s25  ;;  %v2882_v31 = vld [vmem:[#allocation2 + $0x39] sm:$0xff] }
  0x32   : > { %333 = vst.msk [vmem:[#allocation2 + $0xf1] sm:$0xff] %vm226_vm0, %v300_v21  ;;  %334 = vst.msk [vmem:[#allocation2 + $0xf9] sm:$0xff] %vm226_vm0, %v301_v22  ;;  %483 = vrot.lane.b32.xlu0 %v2863_v26, %s2700_s25  ;;  %v2878_v30 = vld [vmem:[#allocation2 + $0x49] sm:$0xff]  ;;  %v2897_v39 = vld [vmem:[#allocation2 + $0x51] sm:$0xff] }
  0x33   : > { %335 = vst.msk [vmem:[#allocation2 + $0x109] sm:$0xff] %vm226_vm0, %v302_v23  ;;  %336 = vst.msk [vmem:[#allocation2 + $0x111] sm:$0xff] %vm226_vm0, %v303_v24  ;;  %v419_v32 = vld [vmem:[#allocation2 + $0x61] sm:$0xff]  ;;  %v420_v41 = vld [vmem:[#allocation2 + $0x69] sm:$0xff] }
  0x34   : > { %337 = vst.msk [vmem:[#allocation2 + $0x121] sm:$0xff] %vm226_vm0, %v304_v28  ;;  %338 = vst.msk [vmem:[#allocation2 + $0x129] sm:$0xff] %vm226_vm0, %v305_v29  ;;  %v421_v40 = vld [vmem:[#allocation2 + $0x79] sm:$0xff]  ;;  %v422_v43 = vld [vmem:[#allocation2 + $0x81] sm:$0xff] }
  0x35   : > { %481 = vrot.lane.b32.xlu1 %v2870_v27, %s2700_s25  ;;  %339 = vst.msk [vmem:[#allocation2 + $0x139] sm:$0xff] %vm226_vm0, %v306_v33  ;;  %340 = vst.msk [vmem:[#allocation2 + $0x141] sm:$0xff] %vm226_vm0, %v307_v34  ;;  %v423_v42 = vld [vmem:[#allocation2 + $0x91] sm:$0xff]  ;;  %v424_v47 = vld [vmem:[#allocation2 + $0x99] sm:$0xff] }
  0x36   : > { %487 = vrot.lane.b32.xlu0 %v2878_v30, %s2700_s25  ;;  %341 = vst.msk [vmem:[#allocation2 + $0x151] sm:$0xff] %vm226_vm0, %v308_v35  ;;  %342 = vst.msk [vmem:[#allocation2 + $0x159] sm:$0xff] %vm226_vm0, %v309_v36  ;;  %v425_v44 = vld [vmem:[#allocation2 + $0xa9] sm:$0xff]  ;;  %v2909_v46 = vld [vmem:[#allocation2 + $0x18] sm:$0xff] }
  0x37   : > { %343 = vst.msk [vmem:[#allocation2 + $0x169] sm:$0xff] %vm226_vm0, %v310_v37  ;;  %344 = vst.msk [vmem:[#allocation2 + $0x171] sm:$0xff] %vm226_vm0, %v311_v38  ;;  %v2916_v49 = vld [vmem:[#allocation2 + $0x20] sm:$0xff]  ;;  %v2920_v51 = vld [vmem:[#allocation2 + $0x30] sm:$0xff] }
  0x38   : > { %379 = vst.msk [vmem:[#allocation3] sm:$0xff] %vm226_vm0, %v347_v45  ;;  %381 = vst.msk [vmem:[#allocation3 + $0x10] sm:$0xff] %vm226_vm0, %v2909_v46  ;;  %v427_v50 = vld [vmem:[#allocation2 + $0xc1] sm:$0xff]  ;;  %v2922_v52 = vld [vmem:[#allocation2 + $0x38] sm:$0xff] }
  0x39   : > { %485 = vrot.lane.b32.xlu1 %v2882_v31, %s2700_s25  ;;  %380 = vst.msk [vmem:[#allocation3 + $0x8] sm:$0xff] %vm226_vm0, %v348_v48  ;;  %382 = vst.msk [vmem:[#allocation3 + $0x18] sm:$0xff] %vm226_vm0, %v2916_v49  ;;  %v426_v53 = vld [vmem:[#allocation2 + $0xb1] sm:$0xff]  ;;  %v2929_v54 = vld [vmem:[#allocation2 + $0x48] sm:$0xff] }
  0x3a   : > { %491 = vrot.lane.b32.xlu0 %v419_v32, %s2700_s25  ;;  %383 = vst.msk [vmem:[#allocation3 + $0x20] sm:$0xff] %vm226_vm0, %v2920_v51  ;;  %384 = vst.msk [vmem:[#allocation3 + $0x28] sm:$0xff] %vm226_vm0, %v2922_v52  ;;  %v2931_v55 = vld [vmem:[#allocation2 + $0x50] sm:$0xff]  ;;  %v2933_v56 = vld [vmem:[#allocation2 + $0xd9] sm:$0xff] }
  0x3b   : > { %385 = vst.msk [vmem:[#allocation3 + $0x30] sm:$0xff] %vm226_vm0, %v2929_v54  ;;  %386 = vst.msk [vmem:[#allocation3 + $0x38] sm:$0xff] %vm226_vm0, %v2931_v55  ;;  %v2939_v57 = vld [vmem:[#allocation2 + $0x60] sm:$0xff]  ;;  %v2941_v58 = vld [vmem:[#allocation2 + $0x68] sm:$0xff] }
  0x3c   : > { %v2943_v59 = vld [vmem:[#allocation2 + $0x78] sm:$0xff]  ;;  %387 = vst.msk [vmem:[#allocation3 + $0x40] sm:$0xff] %vm226_vm0, %v2939_v57  ;;  %388 = vst.msk [vmem:[#allocation3 + $0x48] sm:$0xff] %vm226_vm0, %v2941_v58  ;;  %v2952_v60 = vld [vmem:[#allocation2 + $0x80] sm:$0xff] }
  0x3d   : > { %489 = vrot.lane.b32.xlu1 %v2897_v39, %s2700_s25  ;;  %389 = vst.msk [vmem:[#allocation3 + $0x50] sm:$0xff] %vm226_vm0, %v2943_v59  ;;  %v2954_v61 = vld [vmem:[#allocation2 + $0x90] sm:$0xff]  ;;  %v2956_v62 = vld [vmem:[#allocation2 + $0x98] sm:$0xff]  ;;  %390 = vst.msk [vmem:[#allocation3 + $0x58] sm:$0xff] %vm226_vm0, %v2952_v60 }
  0x3e   : > { %495 = vrot.lane.b32.xlu0 %v421_v40, %s2700_s25  ;;  %v428_v63 = vld [vmem:[#allocation2 + $0xc9] sm:$0xff]  ;;  %391 = vst.msk [vmem:[#allocation3 + $0x60] sm:$0xff] %vm226_vm0, %v2954_v61  ;;  %392 = vst.msk [vmem:[#allocation3 + $0x68] sm:$0xff] %vm226_vm0, %v2956_v62  ;;  %v2968_v2 = vld [vmem:[#allocation2 + $0xc0] sm:$0xff] }
  0x3f   : > { %v2964_v0 = vld [vmem:[#allocation2 + $0xa8] sm:$0xff]  ;;  %v2966_v1 = vld [vmem:[#allocation2 + $0xb0] sm:$0xff]  ;;  %395 = vst.msk [vmem:[#allocation3 + $0x80] sm:$0xff] %vm226_vm0, %v2968_v2  ;;  %v2979_v4 = vld [vmem:[#allocation2 + $0xd8] sm:$0xff] }
  0x40   : > { %393 = vst.msk [vmem:[#allocation3 + $0x70] sm:$0xff] %vm226_vm0, %v2964_v0  ;;  %394 = vst.msk [vmem:[#allocation3 + $0x78] sm:$0xff] %vm226_vm0, %v2966_v1  ;;  %v2977_v3 = vld [vmem:[#allocation2 + $0xc8] sm:$0xff]  ;;  %v2981_v5 = vld [vmem:[#allocation2 + $0xe0] sm:$0xff] }
  0x41   : > { %493 = vrot.lane.b32.xlu1 %v420_v41, %s2700_s25  ;;  %396 = vst.msk [vmem:[#allocation3 + $0x88] sm:$0xff] %vm226_vm0, %v2977_v3  ;;  %397 = vst.msk [vmem:[#allocation3 + $0x90] sm:$0xff] %vm226_vm0, %v2979_v4  ;;  %v2989_v6 = vld [vmem:[#allocation2 + $0xf0] sm:$0xff]  ;;  %v2991_v7 = vld [vmem:[#allocation2 + $0xf8] sm:$0xff] }
  0x42   : > { %499 = vrot.lane.b32.xlu0 %v423_v42, %s2700_s25  ;;  %398 = vst.msk [vmem:[#allocation3 + $0x98] sm:$0xff] %vm226_vm0, %v2981_v5  ;;  %v2993_v8 = vld [vmem:[#allocation2 + $0x108] sm:$0xff]  ;;  %399 = vst.msk [vmem:[#allocation3 + $0xa0] sm:$0xff] %vm226_vm0, %v2989_v6  ;;  %v3003_v9 = vld [vmem:[#allocation2 + $0x110] sm:$0xff] }
  0x43   : > { %400 = vst.msk [vmem:[#allocation3 + $0xa8] sm:$0xff] %vm226_vm0, %v2991_v7  ;;  %401 = vst.msk [vmem:[#allocation3 + $0xb0] sm:$0xff] %vm226_vm0, %v2993_v8  ;;  %v3005_v10 = vld [vmem:[#allocation2 + $0xf1] sm:$0xff]  ;;  %v3010_v11 = vld [vmem:[#allocation2 + $0x120] sm:$0xff] }
  0x44   : > { %402 = vst.msk [vmem:[#allocation3 + $0xb8] sm:$0xff] %vm226_vm0, %v3003_v9  ;;  %v3012_v12 = vld [vmem:[#allocation2 + $0x128] sm:$0xff]  ;;  %403 = vst.msk [vmem:[#allocation3 + $0xc0] sm:$0xff] %vm226_vm0, %v3010_v11  ;;  %v3026_v15 = vld [vmem:[#allocation2 + $0x138] sm:$0xff] }
  0x45   : > { %497 = vrot.lane.b32.xlu1 %v422_v43, %s2700_s25  ;;  %v3014_v13 = vld [vmem:[#allocation2 + $0xe1] sm:$0xff]  ;;  %404 = vst.msk [vmem:[#allocation3 + $0xc8] sm:$0xff] %vm226_vm0, %v3012_v12  ;;  %v3022_v14 = vld [vmem:[#allocation2 + $0x109] sm:$0xff]  ;;  %v3030_v17 = vld [vmem:[#allocation2 + $0xf9] sm:$0xff] }
  0x46   : > { %503 = vrot.lane.b32.xlu0 %v425_v44, %s2700_s25  ;;  %v3028_v16 = vld [vmem:[#allocation2 + $0x140] sm:$0xff]  ;;  %405 = vst.msk [vmem:[#allocation3 + $0xd0] sm:$0xff] %vm226_vm0, %v3026_v15  ;;  %v3042_v19 = vld [vmem:[#allocation2 + $0x150] sm:$0xff]  ;;  %v3044_v20 = vld [vmem:[#allocation2 + $0x158] sm:$0xff] }
  0x47   : > { %4039 = vst [vmem:[#allocation6_spill] sm:$0xff] %v3028_v16  ;;  %406 = vst.msk [vmem:[#allocation3 + $0xd8] sm:$0xff] %vm226_vm0, %v3028_v16  ;;  %v3038_v18 = vld [vmem:[#allocation2 + $0x121] sm:$0xff]  ;;  %v3046_v21 = vld [vmem:[#allocation2 + $0x111] sm:$0xff] }
  0x48   : > { %4040 = vst [vmem:[#allocation7_spill] sm:$0xff] %v3042_v19  ;;  %4041 = vst [vmem:[#allocation8_spill] sm:$0xff] %v3044_v20  ;;  %v437_v22 = vld [vmem:[#allocation2 + $0x139] sm:$0xff]  ;;  %v3056_v23 = vld [vmem:[#allocation2 + $0x168] sm:$0xff] }
  0x49   : > { %501 = vrot.lane.b32.xlu1 %v424_v47, %s2700_s25  ;;  %407 = vst.msk [vmem:[#allocation3 + $0xe0] sm:$0xff] %vm226_vm0, %v3042_v19  ;;  %408 = vst.msk [vmem:[#allocation3 + $0xe8] sm:$0xff] %vm226_vm0, %v3044_v20  ;;  %v3058_v24 = vld [vmem:[#allocation2 + $0x170] sm:$0xff]  ;;  %v438_v32 = vld [vmem:[#allocation2 + $0x141] sm:$0xff] }
  0x4a   : > { %507 = vrot.lane.b32.xlu0 %v427_v50, %s2700_s25  ;;  %4042 = vst [vmem:[#allocation9_spill] sm:$0xff] %v3056_v23  ;;  %4043 = vst [vmem:[#allocation10_spill] sm:$0xff] %v3058_v24  ;;  %v3060_v28 = vld [vmem:[#allocation2 + $0x129] sm:$0xff]  ;;  %v439_v29 = vld [vmem:[#allocation2 + $0x151] sm:$0xff] }
  0x4b   : > { %409 = vst.msk [vmem:[#allocation3 + $0xf0] sm:$0xff] %vm226_vm0, %v3056_v23  ;;  %410 = vst.msk [vmem:[#allocation3 + $0xf8] sm:$0xff] %vm226_vm0, %v3058_v24  ;;  %v441_v33 = vld [vmem:[#allocation2 + $0x169] sm:$0xff]  ;;  %v440_v34 = vld [vmem:[#allocation2 + $0x159] sm:$0xff] }
  0x4c   : > { %v604_v35 = vld [vmem:[#allocation2 + $0x2] sm:$0xff]  ;;  %v442_v36 = vld [vmem:[#allocation2 + $0x171] sm:$0xff]  ;;  %v3074_v37 = vld [vmem:[#allocation2 + $0x1a] sm:$0xff] }
  0x4d   : > { %505 = vrot.lane.b32.xlu1 %v426_v53, %s2700_s25  ;;  %v605_v38 = vld [vmem:[#allocation2 + $0xa] sm:$0xff]  ;;  %v3079_v40 = vld [vmem:[#allocation2 + $0x32] sm:$0xff]  ;;  %v3082_v41 = vld [vmem:[#allocation2 + $0x22] sm:$0xff] }
  0x4e   : > { %511 = vrot.lane.b32.xlu0 %v2933_v56, %s2700_s25  ;;  %v3086_v42 = vld [vmem:[#allocation2 + $0x4a] sm:$0xff]  ;;  %v3090_v43 = vld [vmem:[#allocation2 + $0x3a] sm:$0xff]  ;;  %v3094_v44 = vld [vmem:[#allocation2 + $0x62] sm:$0xff] }
  0x4f   : > { %v3098_v45 = vld [vmem:[#allocation2 + $0x52] sm:$0xff]  ;;  %v614_v47 = vld [vmem:[#allocation2 + $0x7a] sm:$0xff]  ;;  %v3104_v48 = vld [vmem:[#allocation2 + $0x6a] sm:$0xff] }
  0x50   : > { %v616_v50 = vld [vmem:[#allocation2 + $0x92] sm:$0xff]  ;;  %v615_v53 = vld [vmem:[#allocation2 + $0x82] sm:$0xff]  ;;  %v634_v20 = vld [vmem:[#allocation2 + $0x16a] sm:$0xff] }
  0x51   : > { %509 = vrot.lane.b32.xlu1 %v428_v63, %s2700_s25  ;;  %v618_v63 = vld [vmem:[#allocation2 + $0xaa] sm:$0xff]  ;;  %v3153_v24 = vld [vmem:[#allocation2 + $0x142] sm:$0xff]  ;;  %v633_v19 = vld [vmem:[#allocation2 + $0x15a] sm:$0xff] }
  0x52   : > { %515 = vrot.lane.b32.xlu0 %v3005_v10, %s2700_s25  ;;  %v635_v16 = vld [vmem:[#allocation2 + $0x172] sm:$0xff] }
  0x55   : > { %513 = vrot.lane.b32.xlu1 %v3014_v13, %s2700_s25 }
  0x56   : > { %519 = vrot.lane.b32.xlu0 %v3022_v14, %s2700_s25 }
  0x59   : > { %517 = vrot.lane.b32.xlu1 %v3030_v17, %s2700_s25 }
  0x5a   : > { %523 = vrot.lane.b32.xlu0 %v3038_v18, %s2700_s25 }
  0x5d   : > { %521 = vrot.lane.b32.xlu1 %v3046_v21, %s2700_s25 }
  0x5e   : > { %527 = vrot.lane.b32.xlu0 %v437_v22, %s2700_s25  ;;  %v617_v22 = vld [vmem:[#allocation2 + $0x9a] sm:$0xff] }
  0x61   : > { %525 = vrot.lane.b32.xlu1 %v3060_v28, %s2700_s25 }
  0x62   : > { %531 = vrot.lane.b32.xlu0 %v439_v29, %s2700_s25  ;;  %v620_v29 = vld [vmem:[#allocation2 + $0xc2] sm:$0xff] }
  0x65   : > { %529 = vrot.lane.b32.xlu1 %v438_v32, %s2700_s25  ;;  %v619_v32 = vld [vmem:[#allocation2 + $0xb2] sm:$0xff] }
  0x66   : > { %535 = vrot.lane.b32.xlu0 %v441_v33, %s2700_s25  ;;  %v3114_v33 = vld [vmem:[#allocation2 + $0xda] sm:$0xff] }
  0x69   : > { %533 = vrot.lane.b32.xlu1 %v440_v34, %s2700_s25  ;;  %v621_v34 = vld [vmem:[#allocation2 + $0xca] sm:$0xff] }
  0x6a   : > { %668 = vrot.lane.b32.xlu0 %v604_v35, %s2701_s26  ;;  %v3119_v35 = vld [vmem:[#allocation2 + $0xf2] sm:$0xff] }
  0x6d   : > { %537 = vrot.lane.b32.xlu1 %v442_v36, %s2700_s25  ;;  %v3122_v36 = vld [vmem:[#allocation2 + $0xe2] sm:$0xff]  ;;  %s3883_s25 = scalar_lea.vmem %s4028_s5, %s2605_s22 }
  0x6e   : > { %672 = vrot.lane.b32.xlu0 %v3074_v37, %s2701_s26 }
  0x71   : > { %670 = vrot.lane.b32.xlu1 %v605_v38, %s2701_s26  ;;  %v3126_v38 = vld [vmem:[#allocation2 + $0x10a] sm:$0xff] }
  0x72   : > { %676 = vrot.lane.b32.xlu0 %v3079_v40, %s2701_s26 }
  0x75   : > { %674 = vrot.lane.b32.xlu1 %v3082_v41, %s2701_s26 }
  0x76   : > { %680 = vrot.lane.b32.xlu0 %v3086_v42, %s2701_s26 }
  0x79   : > { %678 = vrot.lane.b32.xlu1 %v3090_v43, %s2701_s26 }
  0x7a   : > { %684 = vrot.lane.b32.xlu0 %v3094_v44, %s2701_s26 }
  0x7d   : > { %682 = vrot.lane.b32.xlu1 %v3098_v45, %s2701_s26 }
  0x7e   : > { %688 = vrot.lane.b32.xlu0 %v614_v47, %s2701_s26  ;;  %v3130_v47 = vld [vmem:[#allocation2 + $0xfa] sm:$0xff] }
  0x81   : > { %686 = vrot.lane.b32.xlu1 %v3104_v48, %s2701_s26 }
  0x82   : > { %692 = vrot.lane.b32.xlu0 %v616_v50, %s2701_s26  ;;  %v3134_v50 = vld [vmem:[#allocation2 + $0x122] sm:$0xff] }
  0x85   : > { %690 = vrot.lane.b32.xlu1 %v615_v53, %s2701_s26  ;;  %v3138_v53 = vld [vmem:[#allocation2 + $0x112] sm:$0xff] }
  0x86   : > { %696 = vrot.lane.b32.xlu0 %v618_v63, %s2701_s26  ;;  %v3142_v63 = vld [vmem:[#allocation2 + $0x13a] sm:$0xff] }
  0x87   : > { %4044 = vst [vmem:[#allocation11_spill] sm:$0xff] %v3142_v63 }
  0x89   : > { %694 = vrot.lane.b32.xlu1 %v617_v22, %s2701_s26  ;;  %v476_v22 = vpop.permute.xlu0 %475 }
  0x8a   : > { %700 = vrot.lane.b32.xlu0 %v620_v29, %s2701_s26  ;;  %v3146_v29 = vld [vmem:[#allocation2 + $0x12a] sm:$0xff]  ;;  %572 = vst.msk [vmem:[#allocation3] sm:$0xff] %vm571_vm2, %v476_v22 }
  0x8d   : > { %698 = vrot.lane.b32.xlu1 %v619_v32, %s2701_s26  ;;  %v632_v32 = vld [vmem:[#allocation2 + $0x152] sm:$0xff] }
  0x8e   : > { %704 = vrot.lane.b32.xlu0 %v3114_v33, %s2701_s26 }
  0x91   : > { %702 = vrot.lane.b32.xlu1 %v621_v34, %s2701_s26 }
  0x92   : > { %708 = vrot.lane.b32.xlu0 %v3119_v35, %s2701_s26 }
  0x95   : > { %706 = vrot.lane.b32.xlu1 %v3122_v36, %s2701_s26 }
  0x96   : > { %712 = vrot.lane.b32.xlu0 %v3126_v38, %s2701_s26 }
  0x99   : > { %710 = vrot.lane.b32.xlu1 %v3130_v47, %s2701_s26 }
  0x9a   : > { %716 = vrot.lane.b32.xlu0 %v3134_v50, %s2701_s26  ;;  %v478_v34 = vpop.permute.xlu0 %477 }
  0x9b   : > { %573 = vst.msk [vmem:[#allocation3 + $0x8] sm:$0xff] %vm571_vm2, %v478_v34 }
  0x9d   : > { %714 = vrot.lane.b32.xlu1 %v3138_v53, %s2701_s26 }
  0x9e   : > { %720 = vrot.lane.b32.xlu0 %v3142_v63, %s2701_s26 }
  0xa1   : > { %718 = vrot.lane.b32.xlu1 %v3146_v29, %s2701_s26 }
  0xa2   : > { %724 = vrot.lane.b32.xlu0 %v632_v32, %s2701_s26 }
  0xa3   : > { %v480_v23 = vpop.permute.xlu1 %479 }
  0xa4   : > { %574 = vst.msk [vmem:[#allocation3 + $0x10] sm:$0xff] %vm571_vm2, %v480_v23  ;;  %v484_v22 = vpop.permute.xlu0 %483 }
  0xa5   : > { %722 = vrot.lane.b32.xlu1 %v3153_v24, %s2701_s26  ;;  %576 = vst.msk [vmem:[#allocation3 + $0x20] sm:$0xff] %vm571_vm2, %v484_v22 }
  0xa6   : > { %728 = vrot.lane.b32.xlu0 %v634_v20, %s2701_s26 }
  0xa7   : > { %v482_v63 = vpop.permute.xlu1 %481 }
  0xa8   : > { %575 = vst.msk [vmem:[#allocation3 + $0x18] sm:$0xff] %vm571_vm2, %v482_v63  ;;  %v488_v34 = vpop.permute.xlu0 %487 }
  0xa9   : > { %726 = vrot.lane.b32.xlu1 %v633_v19, %s2701_s26  ;;  %578 = vst.msk [vmem:[#allocation3 + $0x30] sm:$0xff] %vm571_vm2, %v488_v34 }
  0xaa   : > { %861 = vrot.lane.b32.xlu0 %v2909_v46, %s2702_s27 }
  0xab   : > { %v486_v23 = vpop.permute.xlu1 %485 }
  0xac   : > { %577 = vst.msk [vmem:[#allocation3 + $0x28] sm:$0xff] %vm571_vm2, %v486_v23  ;;  %v492_v32 = vpop.permute.xlu0 %491 }
  0xad   : > { %730 = vrot.lane.b32.xlu1 %v635_v16, %s2701_s26  ;;  %580 = vst.msk [vmem:[#allocation3 + $0x40] sm:$0xff] %vm571_vm2, %v492_v32 }
  0xae   : > { %865 = vrot.lane.b32.xlu0 %v2920_v51, %s2702_s27 }
  0xaf   : > { %v490_v20 = vpop.permute.xlu1 %489 }
  0xb0   : > { %579 = vst.msk [vmem:[#allocation3 + $0x38] sm:$0xff] %vm571_vm2, %v490_v20  ;;  %v496_v19 = vpop.permute.xlu0 %495 }
  0xb1   : > { %863 = vrot.lane.b32.xlu1 %v2916_v49, %s2702_s27  ;;  %582 = vst.msk [vmem:[#allocation3 + $0x50] sm:$0xff] %vm571_vm2, %v496_v19 }
  0xb2   : > { %869 = vrot.lane.b32.xlu0 %v2929_v54, %s2702_s27 }
  0xb3   : > { %v494_v46 = vpop.permute.xlu1 %493 }
  0xb4   : > { %581 = vst.msk [vmem:[#allocation3 + $0x48] sm:$0xff] %vm571_vm2, %v494_v46  ;;  %v500_v16 = vpop.permute.xlu0 %499 }
  0xb5   : > { %867 = vrot.lane.b32.xlu1 %v2922_v52, %s2702_s27  ;;  %584 = vst.msk [vmem:[#allocation3 + $0x60] sm:$0xff] %vm571_vm2, %v500_v16 }
  0xb6   : > { %873 = vrot.lane.b32.xlu0 %v2939_v57, %s2702_s27 }
  0xb7   : > { %v498_v63 = vpop.permute.xlu1 %497 }
  0xb8   : > { %583 = vst.msk [vmem:[#allocation3 + $0x58] sm:$0xff] %vm571_vm2, %v498_v63  ;;  %v504_v49 = vpop.permute.xlu0 %503 }
  0xb9   : > { %871 = vrot.lane.b32.xlu1 %v2931_v55, %s2702_s27  ;;  %586 = vst.msk [vmem:[#allocation3 + $0x70] sm:$0xff] %vm571_vm2, %v504_v49 }
  0xba   : > { %877 = vrot.lane.b32.xlu0 %v2943_v59, %s2702_s27 }
  0xbb   : > { %v502_v22 = vpop.permute.xlu1 %501 }
  0xbc   : > { %585 = vst.msk [vmem:[#allocation3 + $0x68] sm:$0xff] %vm571_vm2, %v502_v22  ;;  %v508_v34 = vpop.permute.xlu0 %507 }
  0xbd   : > { %875 = vrot.lane.b32.xlu1 %v2941_v58, %s2702_s27  ;;  %588 = vst.msk [vmem:[#allocation3 + $0x80] sm:$0xff] %vm571_vm2, %v508_v34 }
  0xbe   : > { %881 = vrot.lane.b32.xlu0 %v2954_v61, %s2702_s27 }
  0xbf   : > { %v506_v23 = vpop.permute.xlu1 %505 }
  0xc0   : > { %587 = vst.msk [vmem:[#allocation3 + $0x78] sm:$0xff] %vm571_vm2, %v506_v23  ;;  %v512_v32 = vpop.permute.xlu0 %511 }
  0xc1   : > { %879 = vrot.lane.b32.xlu1 %v2952_v60, %s2702_s27  ;;  %590 = vst.msk [vmem:[#allocation3 + $0x90] sm:$0xff] %vm571_vm2, %v512_v32 }
  0xc2   : > { %885 = vrot.lane.b32.xlu0 %v2964_v0, %s2702_s27 }
  0xc3   : > { %v510_v20 = vpop.permute.xlu1 %509 }
  0xc4   : > { %589 = vst.msk [vmem:[#allocation3 + $0x88] sm:$0xff] %vm571_vm2, %v510_v20  ;;  %v516_v19 = vpop.permute.xlu0 %515 }
  0xc5   : > { %883 = vrot.lane.b32.xlu1 %v2956_v62, %s2702_s27  ;;  %592 = vst.msk [vmem:[#allocation3 + $0xa0] sm:$0xff] %vm571_vm2, %v516_v19 }
  0xc6   : > { %889 = vrot.lane.b32.xlu0 %v2968_v2, %s2702_s27 }
  0xc7   : > { %v514_v61 = vpop.permute.xlu1 %513 }
  0xc8   : > { %591 = vst.msk [vmem:[#allocation3 + $0x98] sm:$0xff] %vm571_vm2, %v514_v61  ;;  %v520_v46 = vpop.permute.xlu0 %519 }
  0xc9   : > { %887 = vrot.lane.b32.xlu1 %v2966_v1, %s2702_s27  ;;  %594 = vst.msk [vmem:[#allocation3 + $0xb0] sm:$0xff] %vm571_vm2, %v520_v46 }
  0xca   : > { %893 = vrot.lane.b32.xlu0 %v2979_v4, %s2702_s27 }
  0xcb   : > { %v518_v0 = vpop.permute.xlu1 %517 }
  0xcc   : > { %593 = vst.msk [vmem:[#allocation3 + $0xa8] sm:$0xff] %vm571_vm2, %v518_v0  ;;  %v524_v62 = vpop.permute.xlu0 %523 }
  0xcd   : > { %891 = vrot.lane.b32.xlu1 %v2977_v3, %s2702_s27  ;;  %596 = vst.msk [vmem:[#allocation3 + $0xc0] sm:$0xff] %vm571_vm2, %v524_v62 }
  0xce   : > { %897 = vrot.lane.b32.xlu0 %v2989_v6, %s2702_s27 }
  0xcf   : > { %v522_v2 = vpop.permute.xlu1 %521 }
  0xd0   : > { %595 = vst.msk [vmem:[#allocation3 + $0xb8] sm:$0xff] %vm571_vm2, %v522_v2  ;;  %v528_v1 = vpop.permute.xlu0 %527  ;;  %v2689_v2 = vld [vmem:[%s4024_s1 + $0x8] sm:$0xff]  }
  0xd1   : > { %895 = vrot.lane.b32.xlu1 %v2981_v5, %s2702_s27  ;;  %598 = vst.msk [vmem:[#allocation3 + $0xd0] sm:$0xff] %vm571_vm2, %v528_v1 }
  0xd2   : > { %901 = vrot.lane.b32.xlu0 %v2993_v8, %s2702_s27 }
  0xd3   : > { %v526_v4 = vpop.permute.xlu1 %525 }
  0xd4   : > { %597 = vst.msk [vmem:[#allocation3 + $0xc8] sm:$0xff] %vm571_vm2, %v526_v4  ;;  %v532_v3 = vpop.permute.xlu0 %531 }
  0xd5   : > { %899 = vrot.lane.b32.xlu1 %v2991_v7, %s2702_s27  ;;  %600 = vst.msk [vmem:[#allocation3 + $0xe0] sm:$0xff] %vm571_vm2, %v532_v3 }
  0xd6   : > { %1054 = vrot.lane.b32.xlu0 %v2861_v25, %s2703_s28 }
  0xd7   : > { %v530_v16 = vpop.permute.xlu1 %529 }
  0xd8   : > { %599 = vst.msk [vmem:[#allocation3 + $0xd8] sm:$0xff] %vm571_vm2, %v530_v16  ;;  %v536_v5 = vpop.permute.xlu0 %535 }
  0xd9   : > { %903 = vrot.lane.b32.xlu1 %v3003_v9, %s2702_s27  ;;  %602 = vst.msk [vmem:[#allocation3 + $0xf0] sm:$0xff] %vm571_vm2, %v536_v5 }
  0xda   : > { %1086 = vrot.lane.b32.xlu0 %v2933_v56, %s2703_s28 }
  0xdb   : > { %v534_v63 = vpop.permute.xlu1 %533 }
  0xdc   : > { %601 = vst.msk [vmem:[#allocation3 + $0xe8] sm:$0xff] %vm571_vm2, %v534_v63  ;;  %v669_v49 = vpop.permute.xlu0 %668 }
  0xdd   : > { %1056 = vrot.lane.b32.xlu1 %v2870_v27, %s2703_s28  ;;  %765 = vst.msk [vmem:[#allocation3] sm:$0xff] %vm764_vm3, %v669_v49 }
  0xde   : > { %1058 = vrot.lane.b32.xlu0 %v2863_v26, %s2703_s28 }
  0xdf   : > { %v538_v25 = vpop.permute.xlu1 %537 }
  0xe0   : > { %603 = vst.msk [vmem:[#allocation3 + $0xf8] sm:$0xff] %vm571_vm2, %v538_v25  ;;  %v673_v22 = vpop.permute.xlu0 %672 }
  0xe1   : > { %1088 = vrot.lane.b32.xlu1 %v3014_v13, %s2703_s28  ;;  %767 = vst.msk [vmem:[#allocation3 + $0x10] sm:$0xff] %vm764_vm3, %v673_v22 }
  0xe2   : > { %1090 = vrot.lane.b32.xlu0 %v3005_v10, %s2703_s28 }
  0xe3   : > { %v671_v56 = vpop.permute.xlu1 %670 }
  0xe4   : > { %766 = vst.msk [vmem:[#allocation3 + $0x8] sm:$0xff] %vm764_vm3, %v671_v56  ;;  %v677_v27 = vpop.permute.xlu0 %676 }
  0xe5   : > { %1060 = vrot.lane.b32.xlu1 %v2882_v31, %s2703_s28  ;;  %769 = vst.msk [vmem:[#allocation3 + $0x20] sm:$0xff] %vm764_vm3, %v677_v27  ;;  %v3374_v27 = vld [vmem:[#allocation2 + $0x61] sm:$0xff] }
  0xe6   : > { %1247 = vrot.lane.b32.xlu0 %v3074_v37, %s2704_s29 }
  0xe7   : > { %v675_v34 = vpop.permute.xlu1 %674 }
  0xe8   : > { %768 = vst.msk [vmem:[#allocation3 + $0x18] sm:$0xff] %vm764_vm3, %v675_v34  ;;  %v681_v13 = vpop.permute.xlu0 %680 }
  0xe9   : > { %1092 = vrot.lane.b32.xlu1 %v3030_v17, %s2703_s28  ;;  %771 = vst.msk [vmem:[#allocation3 + $0x30] sm:$0xff] %vm764_vm3, %v681_v13  ;;  %v3384_v13 = vld [vmem:[#allocation2 + $0x69] sm:$0xff] }
  0xea   : > { %1279 = vrot.lane.b32.xlu0 %v3114_v33, %s2704_s29 }
  0xeb   : > { %v679_v23 = vpop.permute.xlu1 %678 }
  0xec   : > { %770 = vst.msk [vmem:[#allocation3 + $0x28] sm:$0xff] %vm764_vm3, %v679_v23  ;;  %v685_v32 = vpop.permute.xlu0 %684 }
  0xed   : > { %1249 = vrot.lane.b32.xlu1 %v3082_v41, %s2704_s29  ;;  %773 = vst.msk [vmem:[#allocation3 + $0x40] sm:$0xff] %vm764_vm3, %v685_v32 }
  0xee   : > { %1251 = vrot.lane.b32.xlu0 %v3079_v40, %s2704_s29 }
  0xef   : > { %v683_v37 = vpop.permute.xlu1 %682 }
  0xf0   : > { %772 = vst.msk [vmem:[#allocation3 + $0x38] sm:$0xff] %vm764_vm3, %v683_v37  ;;  %v689_v20 = vpop.permute.xlu0 %688 }
  0xf1   : > { %1281 = vrot.lane.b32.xlu1 %v3122_v36, %s2704_s29  ;;  %775 = vst.msk [vmem:[#allocation3 + $0x50] sm:$0xff] %vm764_vm3, %v689_v20 }
  0xf2   : > { %1283 = vrot.lane.b32.xlu0 %v3119_v35, %s2704_s29 }
  0xf3   : > { %v687_v33 = vpop.permute.xlu1 %686 }
  0xf4   : > { %774 = vst.msk [vmem:[#allocation3 + $0x48] sm:$0xff] %vm764_vm3, %v687_v33  ;;  %v693_v41 = vpop.permute.xlu0 %692  ;;  %v312_v33 = vld [vmem:[%s2816_s24 + $0xf0] sm:$0xff] }
  0xf5   : > { %1253 = vrot.lane.b32.xlu1 %v3090_v43, %s2704_s29  ;;  %777 = vst.msk [vmem:[#allocation3 + $0x60] sm:$0xff] %vm764_vm3, %v693_v41 }
  0xf6   : > { %1441 = vrot.lane.b32.xlu0 %v2920_v51, %s2705_s30  ;;  %345 = vst.msk [vmem:[#allocation2 + $0x181] sm:$0xff] %vm226_vm0, %v312_v33 }
  0xf7   : > { %v691_v19 = vpop.permute.xlu1 %690 }
  0xf8   : > { %776 = vst.msk [vmem:[#allocation3 + $0x58] sm:$0xff] %vm764_vm3, %v691_v19  ;;  %v697_v36 = vpop.permute.xlu0 %696  ;;  %v1590_v19 = vld [vmem:[#allocation2 + $0x121] sm:$0xff] }
  0xf9   : > { %1285 = vrot.lane.b32.xlu1 %v3130_v47, %s2704_s29  ;;  %779 = vst.msk [vmem:[#allocation3 + $0x70] sm:$0xff] %vm764_vm3, %v697_v36  ;;  %v4045_v36 = vld [vmem:[#allocation6_spill] sm:$0xff] }
  0xfa   : > { %1473 = vrot.lane.b32.xlu0 %v2989_v6, %s2705_s30 }
  0xfb   : > { %v695_v61 = vpop.permute.xlu1 %694 }
  0xfc   : > { %778 = vst.msk [vmem:[#allocation3 + $0x68] sm:$0xff] %vm764_vm3, %v695_v61  ;;  %v701_v46 = vpop.permute.xlu0 %700 }
  0xfd   : > { %1443 = vrot.lane.b32.xlu1 %v2922_v52, %s2705_s30  ;;  %781 = vst.msk [vmem:[#allocation3 + $0x80] sm:$0xff] %vm764_vm3, %v701_v46 }
  0xfe   : > { %1445 = vrot.lane.b32.xlu0 %v2929_v54, %s2705_s30 }
  0xff   : > { %v699_v51 = vpop.permute.xlu1 %698 }
 0x100   : > { %780 = vst.msk [vmem:[#allocation3 + $0x78] sm:$0xff] %vm764_vm3, %v699_v51  ;;  %v705_v0 = vpop.permute.xlu0 %704 }
 0x101   : > { %1475 = vrot.lane.b32.xlu1 %v2991_v7, %s2705_s30  ;;  %783 = vst.msk [vmem:[#allocation3 + $0x90] sm:$0xff] %vm764_vm3, %v705_v0  ;;  %v1591_v0 = vld [vmem:[#allocation2 + $0x129] sm:$0xff] }
 0x102   : > { %1477 = vrot.lane.b32.xlu0 %v2993_v8, %s2705_s30 }
 0x103   : > { %v703_v6 = vpop.permute.xlu1 %702 }
 0x104   : > { %782 = vst.msk [vmem:[#allocation3 + $0x88] sm:$0xff] %vm764_vm3, %v703_v6  ;;  %v709_v52 = vpop.permute.xlu0 %708 }
 0x105   : > { %1447 = vrot.lane.b32.xlu1 %v2931_v55, %s2705_s30  ;;  %785 = vst.msk [vmem:[#allocation3 + $0xa0] sm:$0xff] %vm764_vm3, %v709_v52  ;;  %v1592_v52 = vld [vmem:[#allocation2 + $0x139] sm:$0xff] }
 0x106   : > { %1634 = vrot.lane.b32.xlu0 %v2863_v26, %s2706_s6 }
 0x107   : > { %v707_v54 = vpop.permute.xlu1 %706 }
 0x108   : > { %784 = vst.msk [vmem:[#allocation3 + $0x98] sm:$0xff] %vm764_vm3, %v707_v54  ;;  %v713_v7 = vpop.permute.xlu0 %712 }
 0x109   : > { %1479 = vrot.lane.b32.xlu1 %v3003_v9, %s2705_s30  ;;  %787 = vst.msk [vmem:[#allocation3 + $0xb0] sm:$0xff] %vm764_vm3, %v713_v7  ;;  %v1577_v7 = vld [vmem:[#allocation2 + $0x81] sm:$0xff] }
 0x10a   : > { %1666 = vrot.lane.b32.xlu0 %v3005_v10, %s2706_s6 }
 0x10b   : > { %v711_v8 = vpop.permute.xlu1 %710 }
 0x10c   : > { %786 = vst.msk [vmem:[#allocation3 + $0xa8] sm:$0xff] %vm764_vm3, %v711_v8  ;;  %v717_v55 = vpop.permute.xlu0 %716 }
 0x10d   : > { %1636 = vrot.lane.b32.xlu1 %v2882_v31, %s2706_s6  ;;  %789 = vst.msk [vmem:[#allocation3 + $0xc0] sm:$0xff] %vm764_vm3, %v717_v55  ;;  %v2688_v31 = vld [vmem:[%s4024_s1] sm:$0xff]  }
 0x10e   : > { %1638 = vrot.lane.b32.xlu0 %v2878_v30, %s2706_s6  ;;  %2625 = vmatprep.subr.bf16.mxu0 %v2688_v31  ;;  %v1767_v55 = vld [vmem:[#allocation2 + $0x62] sm:$0xff] }
 0x10f   : > { %v715_v26 = vpop.permute.xlu1 %714  ;;  %2663 = vmatprep.subr.bf16.mxu1 %v2688_v31  ;;  %2626 = vmatpush3.bf16.msra.mxu0 %v2688_v31 }
 0x110   : > { %788 = vst.msk [vmem:[#allocation3 + $0xb8] sm:$0xff] %vm764_vm3, %v715_v26  ;;  %v721_v9 = vpop.permute.xlu0 %720  ;;  %2666 = vmatpush3.bf16.msra.mxu1 %v2688_v31  ;;  %2627 = vmatprep.subr.bf16.mxu0 %v2689_v2 }
 0x111   : > { %1668 = vrot.lane.b32.xlu1 %v3030_v17, %s2706_s6  ;;  %791 = vst.msk [vmem:[#allocation3 + $0xd0] sm:$0xff] %vm764_vm3, %v721_v9  ;;  %2664 = vmatprep.subr.bf16.mxu1 %v2689_v2  ;;  %v1593_v9 = vld [vmem:[#allocation2 + $0x141] sm:$0xff] }
 0x112   : > { %1670 = vrot.lane.b32.xlu0 %v3022_v14, %s2706_s6 }
 0x113   : > { %v719_v10 = vpop.permute.xlu1 %718  ;;  %2628 = vmatpush3.bf16.msra.mxu0 %v2689_v2 }
 0x114   : > { %790 = vst.msk [vmem:[#allocation3 + $0xc8] sm:$0xff] %vm764_vm3, %v719_v10  ;;  %v725_v62 = vpop.permute.xlu0 %724  ;;  %2667 = vmatpush3.bf16.msra.mxu1 %v2689_v2  ;;  %v1769_v2 = vld [vmem:[#allocation2 + $0x7a] sm:$0xff] }
 0x115   : > { %1640 = vrot.lane.b32.xlu1 %v2897_v39, %s2706_s6  ;;  %793 = vst.msk [vmem:[#allocation3 + $0xe0] sm:$0xff] %vm764_vm3, %v725_v62  ;;  %v1768_v62 = vld [vmem:[#allocation2 + $0x6a] sm:$0xff] }
 0x116   : > { %1827 = vrot.lane.b32.xlu0 %v3079_v40, %s2707_s9  ;;  %v2690_v40 = vld [vmem:[%s4024_s1 + $0x10] ss:$0 sps:$4 sm:$0x33]  }
 0x117   : > { %v723_v17 = vpop.permute.xlu1 %722  ;;  %2669 = vmatprep.subr.msk.bf16.mxu0 %vm2080_vm5, %v2690_v40  ;;  %v2082_v16 = vsel %vm2080_vm5, %v2690_v40, 0  ;;  %2670 = vmatprep.subr.msk.bf16.mxu1 %vm2080_vm5, %v2690_v40 }
 0x118   : > { %792 = vst.msk [vmem:[#allocation3 + $0xd8] sm:$0xff] %vm764_vm3, %v723_v17  ;;  %v729_v1 = vpop.permute.xlu0 %728  ;;  %2630 = vmatpush3.bf16.msra.mxu0 %v2082_v16  ;;  %2668 = vmatpush3.bf16.msra.mxu1 %v2082_v16  ;;  %v4046_v16 = vld [vmem:[#allocation11_spill] sm:$0xff] }
 0x119   : > { %1672 = vrot.lane.b32.xlu1 %v3046_v21, %s2706_s6  ;;  %795 = vst.msk [vmem:[#allocation3 + $0xf0] sm:$0xff] %vm764_vm3, %v729_v1 }
 0x11a   : > { %1859 = vrot.lane.b32.xlu0 %v3119_v35, %s2707_s9 }
 0x11b   : > { %v727_v4 = vpop.permute.xlu1 %726 }
 0x11c   : > { %794 = vst.msk [vmem:[#allocation3 + $0xe8] sm:$0xff] %vm764_vm3, %v727_v4  ;;  %v862_v3 = vpop.permute.xlu0 %861 }
 0x11d   : > { %1829 = vrot.lane.b32.xlu1 %v3090_v43, %s2707_s9  ;;  %958 = vst.msk [vmem:[#allocation3] sm:$0xff] %vm957_vm4, %v862_v3  ;;  %v3477_v3 = vld [vmem:[#allocation2 + $0x82] sm:$0xff] }
 0x11e   : > { %1831 = vrot.lane.b32.xlu0 %v3086_v42, %s2707_s9 }
 0x11f   : > { %v731_v35 = vpop.permute.xlu1 %730 }
 0x120   : > { %796 = vst.msk [vmem:[#allocation3 + $0xf8] sm:$0xff] %vm764_vm3, %v731_v35  ;;  %v866_v5 = vpop.permute.xlu0 %865 }
 0x121   : > { %1861 = vrot.lane.b32.xlu1 %v3130_v47, %s2707_s9  ;;  %960 = vst.msk [vmem:[#allocation3 + $0x10] sm:$0xff] %vm957_vm4, %v866_v5 }
 0x122   : > { %1863 = vrot.lane.b32.xlu0 %v3126_v38, %s2707_s9 }
 0x123   : > { %v864_v43 = vpop.permute.xlu1 %863 }
 0x124   : > { %959 = vst.msk [vmem:[#allocation3 + $0x8] sm:$0xff] %vm957_vm4, %v864_v43  ;;  %v870_v63 = vpop.permute.xlu0 %869 }
 0x125   : > { %1833 = vrot.lane.b32.xlu1 %v3098_v45, %s2707_s9  ;;  %962 = vst.msk [vmem:[#allocation3 + $0x20] sm:$0xff] %vm957_vm4, %v870_v63  ;;  %v4047_v63 = vld [vmem:[#allocation7_spill] sm:$0xff] }
 0x126   : > { %905 = vrot.lane.b32.xlu0 %v3010_v11, %s2702_s27 }
 0x127   : > { %v868_v49 = vpop.permute.xlu1 %867 }
 0x128   : > { %961 = vst.msk [vmem:[#allocation3 + $0x18] sm:$0xff] %vm957_vm4, %v868_v49  ;;  %v874_v47 = vpop.permute.xlu0 %873 }
 0x129   : > { %1865 = vrot.lane.b32.xlu1 %v3138_v53, %s2707_s9  ;;  %964 = vst.msk [vmem:[#allocation3 + $0x30] sm:$0xff] %vm957_vm4, %v874_v47 }
 0x12a   : > { %1062 = vrot.lane.b32.xlu0 %v2878_v30, %s2703_s28 }
 0x12b   : > { %v872_v25 = vpop.permute.xlu1 %871 }
 0x12c   : > { %963 = vst.msk [vmem:[#allocation3 + $0x28] sm:$0xff] %vm957_vm4, %v872_v25  ;;  %v878_v22 = vpop.permute.xlu0 %877 }
 0x12d   : > { %907 = vrot.lane.b32.xlu1 %v3012_v12, %s2702_s27  ;;  %966 = vst.msk [vmem:[#allocation3 + $0x40] sm:$0xff] %vm957_vm4, %v878_v22  ;;  %v3505_v22 = vld [vmem:[#allocation2 + $0x91] sm:$0xff] }
 0x12e   : > { %1094 = vrot.lane.b32.xlu0 %v3022_v14, %s2703_s28 }
 0x12f   : > { %v876_v56 = vpop.permute.xlu1 %875 }
 0x130   : > { %965 = vst.msk [vmem:[#allocation3 + $0x38] sm:$0xff] %vm957_vm4, %v876_v56  ;;  %v882_v30 = vpop.permute.xlu0 %881 }
 0x131   : > { %1064 = vrot.lane.b32.xlu1 %v2897_v39, %s2703_s28  ;;  %968 = vst.msk [vmem:[#allocation3 + $0x50] sm:$0xff] %vm957_vm4, %v882_v30  ;;  %v3512_v30 = vld [vmem:[#allocation2 + $0x151] sm:$0xff] }
 0x132   : > { %1066 = vrot.lane.b32.xlu0 %v3374_v27, %s2703_s28 }
 0x133   : > { %v880_v34 = vpop.permute.xlu1 %879 }
 0x134   : > { %967 = vst.msk [vmem:[#allocation3 + $0x48] sm:$0xff] %vm957_vm4, %v880_v34  ;;  %v886_v14 = vpop.permute.xlu0 %885 }
 0x135   : > { %1096 = vrot.lane.b32.xlu1 %v3046_v21, %s2703_s28  ;;  %970 = vst.msk [vmem:[#allocation3 + $0x60] sm:$0xff] %vm957_vm4, %v886_v14  ;;  %v3515_v14 = vld [vmem:[#allocation2 + $0x99] sm:$0xff] }
 0x136   : > { %1098 = vrot.lane.b32.xlu0 %v3038_v18, %s2703_s28 }
 0x137   : > { %v884_v23 = vpop.permute.xlu1 %883 }
 0x138   : > { %969 = vst.msk [vmem:[#allocation3 + $0x58] sm:$0xff] %vm957_vm4, %v884_v23  ;;  %v890_v39 = vpop.permute.xlu0 %889 }
 0x139   : > { %1068 = vrot.lane.b32.xlu1 %v3384_v13, %s2703_s28  ;;  %972 = vst.msk [vmem:[#allocation3 + $0x70] sm:$0xff] %vm957_vm4, %v890_v39  ;;  %v3523_v39 = vld [vmem:[#allocation2 + $0x159] sm:$0xff] }
 0x13a   : > { %1255 = vrot.lane.b32.xlu0 %v3086_v42, %s2704_s29 }
 0x13b   : > { %v888_v32 = vpop.permute.xlu1 %887 }
 0x13c   : > { %971 = vst.msk [vmem:[#allocation3 + $0x68] sm:$0xff] %vm957_vm4, %v888_v32  ;;  %v894_v21 = vpop.permute.xlu0 %893 }
 0x13d   : > { %1100 = vrot.lane.b32.xlu1 %v3060_v28, %s2703_s28  ;;  %974 = vst.msk [vmem:[#allocation3 + $0x80] sm:$0xff] %vm957_vm4, %v894_v21  ;;  %v1207_v21 = vld [vmem:[#allocation2 + $0x13a] sm:$0xff] }
 0x13e   : > { %1287 = vrot.lane.b32.xlu0 %v3126_v38, %s2704_s29 }
 0x13f   : > { %v892_v18 = vpop.permute.xlu1 %891 }
 0x140   : > { %973 = vst.msk [vmem:[#allocation3 + $0x78] sm:$0xff] %vm957_vm4, %v892_v18  ;;  %v898_v37 = vpop.permute.xlu0 %897 }
 0x141   : > { %1257 = vrot.lane.b32.xlu1 %v3098_v45, %s2704_s29  ;;  %976 = vst.msk [vmem:[#allocation3 + $0x90] sm:$0xff] %vm957_vm4, %v898_v37 }
 0x142   : > { %1259 = vrot.lane.b32.xlu0 %v3094_v44, %s2704_s29 }
 0x143   : > { %v896_v42 = vpop.permute.xlu1 %895 }
 0x144   : > { %975 = vst.msk [vmem:[#allocation3 + $0x88] sm:$0xff] %vm957_vm4, %v896_v42  ;;  %v902_v28 = vpop.permute.xlu0 %901 }
 0x145   : > { %1289 = vrot.lane.b32.xlu1 %v3138_v53, %s2704_s29  ;;  %978 = vst.msk [vmem:[#allocation3 + $0xa0] sm:$0xff] %vm957_vm4, %v902_v28 }
 0x146   : > { %1291 = vrot.lane.b32.xlu0 %v3134_v50, %s2704_s29 }
 0x147   : > { %v900_v38 = vpop.permute.xlu1 %899 }
 0x148   : > { %977 = vst.msk [vmem:[#allocation3 + $0x98] sm:$0xff] %vm957_vm4, %v900_v38  ;;  %v1055_v45 = vpop.permute.xlu0 %1054 }
 0x149   : > { %1261 = vrot.lane.b32.xlu1 %v3104_v48, %s2704_s29  ;;  %1151 = vst.msk [vmem:[#allocation3] sm:$0xff] %vm1150_vm6, %v1055_v45  ;;  %v3533_v45 = vld [vmem:[#allocation2 + $0x92] sm:$0xff] }
 0x14a   : > { %1449 = vrot.lane.b32.xlu0 %v2939_v57, %s2705_s30 }
 0x14b   : > { %v904_v44 = vpop.permute.xlu1 %903 }
 0x14c   : > { %979 = vst.msk [vmem:[#allocation3 + $0xa8] sm:$0xff] %vm957_vm4, %v904_v44  ;;  %v1087_v53 = vpop.permute.xlu0 %1086 }
 0x14d   : > { %1293 = vrot.lane.b32.xlu1 %v3146_v29, %s2704_s29  ;;  %1167 = vst.msk [vmem:[#allocation3 + $0x80] sm:$0xff] %vm1150_vm6, %v1087_v53 }
 0x14e   : > { %1481 = vrot.lane.b32.xlu0 %v3010_v11, %s2705_s30  ;;  %v313_v11 = vld [vmem:[%s2816_s24 + $0xf8] sm:$0xff] }
 0x14f   : > { %v1057_v20 = vpop.permute.xlu1 %1056  ;;  %346 = vst.msk [vmem:[#allocation2 + $0x189] sm:$0xff] %vm226_vm0, %v313_v11 }
 0x150   : > { %1152 = vst.msk [vmem:[#allocation3 + $0x8] sm:$0xff] %vm1150_vm6, %v1057_v20  ;;  %v1059_v48 = vpop.permute.xlu0 %1058  ;;  %v1208_v20 = vld [vmem:[#allocation2 + $0x142] sm:$0xff] }
 0x151   : > { %1451 = vrot.lane.b32.xlu1 %v2941_v58, %s2705_s30  ;;  %1153 = vst.msk [vmem:[#allocation3 + $0x10] sm:$0xff] %vm1150_vm6, %v1059_v48 }
 0x152   : > { %1453 = vrot.lane.b32.xlu0 %v2943_v59, %s2705_s30 }
 0x153   : > { %v1089_v57 = vpop.permute.xlu1 %1088 }
 0x154   : > { %1168 = vst.msk [vmem:[#allocation3 + $0x88] sm:$0xff] %vm1150_vm6, %v1089_v57  ;;  %v1091_v41 = vpop.permute.xlu0 %1090 }
 0x155   : > { %1483 = vrot.lane.b32.xlu1 %v3012_v12, %s2705_s30  ;;  %1169 = vst.msk [vmem:[#allocation3 + $0x90] sm:$0xff] %vm1150_vm6, %v1091_v41  ;;  %v3542_v41 = vld [vmem:[#allocation2 + $0x152] sm:$0xff] }
 0x156   : > { %1485 = vrot.lane.b32.xlu0 %v3026_v15, %s2705_s30 }
 0x157   : > { %v1061_v58 = vpop.permute.xlu1 %1060 }
 0x158   : > { %1154 = vst.msk [vmem:[#allocation3 + $0x18] sm:$0xff] %vm1150_vm6, %v1061_v58  ;;  %v1248_v59 = vpop.permute.xlu0 %1247 }
 0x159   : > { %1455 = vrot.lane.b32.xlu1 %v2952_v60, %s2705_s30  ;;  %1344 = vst.msk [vmem:[#allocation3] sm:$0xff] %vm1343_vm7, %v1248_v59  ;;  %v1576_v60 = vld [vmem:[#allocation2 + $0x79] sm:$0xff] }
 0x15a   : > { %1642 = vrot.lane.b32.xlu0 %v3374_v27, %s2706_s6  ;;  %v3546_v59 = vld [vmem:[#allocation2 + $0x9a] sm:$0xff] }
 0x15b   : > { %v1093_v12 = vpop.permute.xlu1 %1092 }
 0x15c   : > { %1170 = vst.msk [vmem:[#allocation3 + $0x98] sm:$0xff] %vm1150_vm6, %v1093_v12  ;;  %v1280_v61 = vpop.permute.xlu0 %1279 }
 0x15d   : > { %1487 = vrot.lane.b32.xlu1 %v4045_v36, %s2705_s30  ;;  %1360 = vst.msk [vmem:[#allocation3 + $0x80] sm:$0xff] %vm1343_vm7, %v1280_v61  ;;  %v1385_v61 = vld [vmem:[#allocation2 + $0x90] sm:$0xff] }
 0x15e   : > { %1674 = vrot.lane.b32.xlu0 %v1590_v19, %s2706_s6 }
 0x15f   : > { %v1250_v46 = vpop.permute.xlu1 %1249 }
 0x160   : > { %1345 = vst.msk [vmem:[#allocation3 + $0x8] sm:$0xff] %vm1343_vm7, %v1250_v46  ;;  %v1252_v51 = vpop.permute.xlu0 %1251 }
 0x161   : > { %1644 = vrot.lane.b32.xlu1 %v3384_v13, %s2706_s6  ;;  %1346 = vst.msk [vmem:[#allocation3 + $0x10] sm:$0xff] %vm1343_vm7, %v1252_v51  ;;  %v3555_v51 = vld [vmem:[#allocation2 + $0x15a] sm:$0xff] }
 0x162   : > { %1646 = vrot.lane.b32.xlu0 %v1576_v60, %s2706_s6 }
 0x163   : > { %v1282_v6 = vpop.permute.xlu1 %1281 }
 0x164   : > { %1361 = vst.msk [vmem:[#allocation3 + $0x88] sm:$0xff] %vm1343_vm7, %v1282_v6  ;;  %v1284_v54 = vpop.permute.xlu0 %1283 }
 0x165   : > { %1676 = vrot.lane.b32.xlu1 %v1591_v0, %s2706_s6  ;;  %1362 = vst.msk [vmem:[#allocation3 + $0x90] sm:$0xff] %vm1343_vm7, %v1284_v54 }
 0x166   : > { %1678 = vrot.lane.b32.xlu0 %v1592_v52, %s2706_s6 }
 0x167   : > { %v1254_v8 = vpop.permute.xlu1 %1253 }
 0x168   : > { %1347 = vst.msk [vmem:[#allocation3 + $0x18] sm:$0xff] %vm1343_vm7, %v1254_v8  ;;  %v1442_v26 = vpop.permute.xlu0 %1441 }
 0x169   : > { %1648 = vrot.lane.b32.xlu1 %v1577_v7, %s2706_s6  ;;  %1538 = vst.msk [vmem:[#allocation3] sm:$0xff] %vm1537_vm8, %v1442_v26 }
 0x16a   : > { %1835 = vrot.lane.b32.xlu0 %v1767_v55, %s2707_s9  ;;  %v1387_v55 = vld [vmem:[#allocation2 + $0xa8] sm:$0xff] }
 0x16b   : > { %v1286_v10 = vpop.permute.xlu1 %1285 }
 0x16c   : > { %1363 = vst.msk [vmem:[#allocation3 + $0x98] sm:$0xff] %vm1343_vm7, %v1286_v10  ;;  %v1474_v31 = vpop.permute.xlu0 %1473 }
 0x16d   : > { %1680 = vrot.lane.b32.xlu1 %v1593_v9, %s2706_s6  ;;  %1554 = vst.msk [vmem:[#allocation3 + $0x80] sm:$0xff] %vm1537_vm8, %v1474_v31  ;;  %v1388_v31 = vld [vmem:[#allocation2 + $0xb0] sm:$0xff] }
 0x16e   : > { %1867 = vrot.lane.b32.xlu0 %v3134_v50, %s2707_s9 }
 0x16f   : > { %v1444_v17 = vpop.permute.xlu1 %1443 }
 0x170   : > { %1539 = vst.msk [vmem:[#allocation3 + $0x8] sm:$0xff] %vm1537_vm8, %v1444_v17  ;;  %v1446_v1 = vpop.permute.xlu0 %1445  ;;  %v4049_v17 = vld [vmem:[#allocation9_spill] sm:$0xff] }
 0x171   : > { %1837 = vrot.lane.b32.xlu1 %v1768_v62, %s2707_s9  ;;  %1540 = vst.msk [vmem:[#allocation3 + $0x10] sm:$0xff] %vm1537_vm8, %v1446_v1 }
 0x172   : > { %1839 = vrot.lane.b32.xlu0 %v1769_v2, %s2707_s9 }
 0x173   : > { %v1476_v4 = vpop.permute.xlu1 %1475 }
 0x174   : > { %1555 = vst.msk [vmem:[#allocation3 + $0x88] sm:$0xff] %vm1537_vm8, %v1476_v4  ;;  %v1478_v40 = vpop.permute.xlu0 %1477  ;;  %v4050_v4 = vld [vmem:[#allocation10_spill] sm:$0xff] }
 0x175   : > { %1869 = vrot.lane.b32.xlu1 %v3146_v29, %s2707_s9  ;;  %1556 = vst.msk [vmem:[#allocation3 + $0x90] sm:$0xff] %vm1537_vm8, %v1478_v40 }
 0x176   : > { %1871 = vrot.lane.b32.xlu0 %v4046_v16, %s2707_s9 }
 0x177   : > { %v1448_v50 = vpop.permute.xlu1 %1447 }
 0x178   : > { %1541 = vst.msk [vmem:[#allocation3 + $0x18] sm:$0xff] %vm1537_vm8, %v1448_v50  ;;  %v1635_v35 = vpop.permute.xlu0 %1634  ;;  %v3588_v50 = vld [vmem:[#allocation2 + $0xa9] sm:$0xff] }
 0x179   : > { %1841 = vrot.lane.b32.xlu1 %v3477_v3, %s2707_s9  ;;  %1731 = vst.msk [vmem:[#allocation3] sm:$0xff] %vm1730_vm9, %v1635_v35 }
 0x17a   : > { %909 = vrot.lane.b32.xlu0 %v3026_v15, %s2702_s27 }
 0x17b   : > { %v1480_v5 = vpop.permute.xlu1 %1479 }
 0x17c   : > { %1557 = vst.msk [vmem:[#allocation3 + $0x98] sm:$0xff] %vm1537_vm8, %v1480_v5  ;;  %v1667_v29 = vpop.permute.xlu0 %1666  ;;  %v1596_v5 = vld [vmem:[#allocation2 + $0x169] sm:$0xff] }
 0x17d   : > { %1873 = vrot.lane.b32.xlu1 %v3153_v24, %s2707_s9  ;;  %1747 = vst.msk [vmem:[#allocation3 + $0x80] sm:$0xff] %vm1730_vm9, %v1667_v29  ;;  %v4048_v24 = vld [vmem:[#allocation8_spill] sm:$0xff] }
 0x17e   : > { %913 = vrot.lane.b32.xlu0 %v4047_v63, %s2702_s27 }
 0x17f   : > { %v1637_v43 = vpop.permute.xlu1 %1636 }
 0x180   : > { %1732 = vst.msk [vmem:[#allocation3 + $0x8] sm:$0xff] %vm1730_vm9, %v1637_v43  ;;  %v1639_v49 = vpop.permute.xlu0 %1638  ;;  %v1581_v43 = vld [vmem:[#allocation2 + $0xb1] sm:$0xff] }
 0x181   : > { %911 = vrot.lane.b32.xlu1 %v4045_v36, %s2702_s27  ;;  %1733 = vst.msk [vmem:[#allocation3 + $0x10] sm:$0xff] %vm1730_vm9, %v1639_v49 }
 0x182   : > { %1070 = vrot.lane.b32.xlu0 %v1576_v60, %s2703_s28 }
 0x183   : > { %v1669_v15 = vpop.permute.xlu1 %1668 }
 0x184   : > { %1748 = vst.msk [vmem:[#allocation3 + $0x88] sm:$0xff] %vm1730_vm9, %v1669_v15  ;;  %v1671_v47 = vpop.permute.xlu0 %1670  ;;  %v1597_v15 = vld [vmem:[#allocation2 + $0x171] sm:$0xff] }
 0x185   : > { %915 = vrot.lane.b32.xlu1 %v4048_v24, %s2702_s27  ;;  %1749 = vst.msk [vmem:[#allocation3 + $0x90] sm:$0xff] %vm1730_vm9, %v1671_v47 }
 0x186   : > { %1102 = vrot.lane.b32.xlu0 %v1592_v52, %s2703_s28 }
 0x187   : > { %v1641_v25 = vpop.permute.xlu1 %1640 }
 0x188   : > { %1734 = vst.msk [vmem:[#allocation3 + $0x18] sm:$0xff] %vm1730_vm9, %v1641_v25  ;;  %v1828_v56 = vpop.permute.xlu0 %1827 }
 0x189   : > { %1072 = vrot.lane.b32.xlu1 %v1577_v7, %s2703_s28  ;;  %1924 = vst.msk [vmem:[#allocation3] sm:$0xff] %vm1923_vm10, %v1828_v56  ;;  %v1386_v7 = vld [vmem:[#allocation2 + $0x98] sm:$0xff] }
 0x18a   : > { %1074 = vrot.lane.b32.xlu0 %v3505_v22, %s2703_s28 }
 0x18b   : > { %v1673_v27 = vpop.permute.xlu1 %1672 }
 0x18c   : > { %1750 = vst.msk [vmem:[#allocation3 + $0x98] sm:$0xff] %vm1730_vm9, %v1673_v27  ;;  %v1860_v34 = vpop.permute.xlu0 %1859 }
 0x18d   : > { %1104 = vrot.lane.b32.xlu1 %v1593_v9, %s2703_s28  ;;  %1940 = vst.msk [vmem:[#allocation3 + $0x80] sm:$0xff] %vm1923_vm10, %v1860_v34 }
 0x18e   : > { %1106 = vrot.lane.b32.xlu0 %v3512_v30, %s2703_s28 }
 0x18f   : > { %v1830_v13 = vpop.permute.xlu1 %1829 }
 0x190   : > { %1925 = vst.msk [vmem:[#allocation3 + $0x8] sm:$0xff] %vm1923_vm10, %v1830_v13  ;;  %v1832_v23 = vpop.permute.xlu0 %1831  ;;  %v1956_v18 = vld [vmem:[#allocation3] sm:$0xff] }
 0x191   : > { %1076 = vrot.lane.b32.xlu1 %v3515_v14, %s2703_s28  ;;  %1926 = vst.msk [vmem:[#allocation3 + $0x10] sm:$0xff] %vm1923_vm10, %v1832_v23  ;;  %v825_v23 = vld [vmem:[#allocation2 + $0x168] sm:$0xff] }
 0x192   : > { %1263 = vrot.lane.b32.xlu0 %v1769_v2, %s2704_s29 }
 0x193   : > { %v1862_v32 = vpop.permute.xlu1 %1861 }
 0x194   : > { %1941 = vst.msk [vmem:[#allocation3 + $0x88] sm:$0xff] %vm1923_vm10, %v1862_v32  ;;  %v1864_v37 = vpop.permute.xlu0 %1863  ;;  %v1972_v44 = vld [vmem:[#allocation3 + $0x80] sm:$0xff] }
 0x195   : > { %1108 = vrot.lane.b32.xlu1 %v3523_v39, %s2703_s28  ;;  %1942 = vst.msk [vmem:[#allocation3 + $0x90] sm:$0xff] %vm1923_vm10, %v1864_v37  ;;  %v3631_v32 = vld [vmem:[#allocation2 + $0x172] sm:$0xff] }
 0x196   : > { %1295 = vrot.lane.b32.xlu0 %v1207_v21, %s2704_s29 }
 0x197   : > { %v1834_v42 = vpop.permute.xlu1 %1833  ;;  %v1957_v28 = vld [vmem:[#allocation3 + $0x8] sm:$0xff] }
 0x198   : > { %1927 = vst.msk [vmem:[#allocation3 + $0x18] sm:$0xff] %vm1923_vm10, %v1834_v42  ;;  %v1988_v38 = vpack.c.bf16 %v1957_v28, %v1956_v18  ;;  %v906_v53 = vpop.permute.xlu0 %905  ;;  %v1958_v11 = vld [vmem:[#allocation3 + $0x10] sm:$0xff]  ;;  %v826_v42 = vld [vmem:[#allocation2 + $0x170] sm:$0xff] }
 0x199   : > { %1265 = vrot.lane.b32.xlu1 %v3477_v3, %s2704_s29  ;;  %980 = vst.msk [vmem:[#allocation3 + $0xb0] sm:$0xff] %vm957_vm4, %v906_v53  ;;  %v3636_v18 = vld [vmem:[#allocation2 + $0x180] sm:$0xff] }
 0x19a   : > { %2631 = vmatprep.mubr.msk.bf16.mxu0 %vm2031_vm11, %v1988_v38  ;;  %1267 = vrot.lane.b32.xlu0 %v3533_v45, %s2704_s29 }
 0x19b   : > { %v1866_v48 = vpop.permute.xlu1 %1865  ;;  %v1973_v57 = vld [vmem:[#allocation3 + $0x88] sm:$0xff] }
 0x19c   : > { %1943 = vst.msk [vmem:[#allocation3 + $0x98] sm:$0xff] %vm1923_vm10, %v1866_v48  ;;  %v1996_v33 = vpack.c.bf16 %v1973_v57, %v1972_v44  ;;  %v1063_v58 = vpop.permute.xlu0 %1062  ;;  %v1974_v46 = vld [vmem:[#allocation3 + $0x90] sm:$0xff] }
 0x19d   : > { %1297 = vrot.lane.b32.xlu1 %v1208_v20, %s2704_s29  ;;  %1155 = vst.msk [vmem:[#allocation3 + $0x20] sm:$0xff] %vm1150_vm6, %v1063_v58  ;;  %v3656_v48 = vld [vmem:[#allocation2 + $0xc1] sm:$0xff]  ;;  %v3666_v58 = vld [vmem:[#allocation2 + $0xc9] sm:$0xff] }
 0x19e   : > { %2647 = vmatprep.mubr.msk.bf16.mxu1 %vm2031_vm11, %v1996_v33  ;;  %1299 = vrot.lane.b32.xlu0 %v3542_v41, %s2704_s29 }
 0x19f   : > { %v908_v12 = vpop.permute.xlu1 %907  ;;  %v1959_v19 = vld [vmem:[#allocation3 + $0x18] sm:$0xff] }
 0x1a0   : > { %981 = vst.msk [vmem:[#allocation3 + $0xb8] sm:$0xff] %vm957_vm4, %v908_v12  ;;  %v1989_v36 = vpack.c.bf16 %v1959_v19, %v1958_v11  ;;  %v1095_v60 = vpop.permute.xlu0 %1094 }
 0x1a1   : > { %1269 = vrot.lane.b32.xlu1 %v3546_v59, %s2704_s29  ;;  %1171 = vst.msk [vmem:[#allocation3 + $0xa0] sm:$0xff] %vm1150_vm6, %v1095_v60 }
 0x1a2   : > { %2632 = vmatmul.mubr.msk.bf16.vlgmr.msra.gmra.mrb[0].mxu0 %vm2031_vm11, %v1989_v36  ;;  %1457 = vrot.lane.b32.xlu0 %v1385_v61, %s2705_s30  ;;  %v3674_v36 = vld [vmem:[#allocation2 + $0x189] sm:$0xff] }
 0x1a3   : > { %v1065_v0 = vpop.permute.xlu1 %1064  ;;  %v1975_v6 = vld [vmem:[#allocation3 + $0x98] sm:$0xff] }
 0x1a4   : > { %1156 = vst.msk [vmem:[#allocation3 + $0x28] sm:$0xff] %vm1150_vm6, %v1065_v0  ;;  %v1997_v52 = vpack.c.bf16 %v1975_v6, %v1974_v46  ;;  %v1067_v54 = vpop.permute.xlu0 %1066 }
 0x1a5   : > { %1301 = vrot.lane.b32.xlu1 %v3555_v51, %s2704_s29  ;;  %1157 = vst.msk [vmem:[#allocation3 + $0x30] sm:$0xff] %vm1150_vm6, %v1067_v54 }
 0x1a6   : > { %2648 = vmatmul.mubr.msk.bf16.vlgmr.msra.gmra.mrb[0].mxu1 %vm2031_vm11, %v1997_v52  ;;  %1489 = vrot.lane.b32.xlu0 %v4047_v63, %s2705_s30 }
 0x1a7   : > { %v1097_v8 = vpop.permute.xlu1 %1096 }
 0x1a8   : > { %1172 = vst.msk [vmem:[#allocation3 + $0xa8] sm:$0xff] %vm1150_vm6, %v1097_v8  ;;  %v1099_v26 = vpop.permute.xlu0 %1098 }
 0x1a9   : > { %1459 = vrot.lane.b32.xlu1 %v1386_v7, %s2705_s30  ;;  %1173 = vst.msk [vmem:[#allocation3 + $0xb0] sm:$0xff] %vm1150_vm6, %v1099_v26  ;;  %v3687_v7 = vld [vmem:[#allocation2 + $0xc2] sm:$0xff] }
 0x1aa   : > { %1461 = vrot.lane.b32.xlu0 %v1387_v55, %s2705_s30 }
 0x1ab   : > { %v1069_v9 = vpop.permute.xlu1 %1068 }
 0x1ac   : > { %1158 = vst.msk [vmem:[#allocation3 + $0x38] sm:$0xff] %vm1150_vm6, %v1069_v9  ;;  %v1256_v10 = vpop.permute.xlu0 %1255 }
 0x1ad   : > { %1491 = vrot.lane.b32.xlu1 %v4048_v24, %s2705_s30  ;;  %1348 = vst.msk [vmem:[#allocation3 + $0x20] sm:$0xff] %vm1343_vm7, %v1256_v10 }
 0x1ae   : > { %1493 = vrot.lane.b32.xlu0 %v4049_v17, %s2705_s30 }
 0x1af   : > { %v1101_v62 = vpop.permute.xlu1 %1100 }
 0x1b0   : > { %1174 = vst.msk [vmem:[#allocation3 + $0xb8] sm:$0xff] %vm1150_vm6, %v1101_v62  ;;  %v1288_v2 = vpop.permute.xlu0 %1287 }
 0x1b1   : > { %1463 = vrot.lane.b32.xlu1 %v1388_v31, %s2705_s30  ;;  %1364 = vst.msk [vmem:[#allocation3 + $0xa0] sm:$0xff] %vm1343_vm7, %v1288_v2  ;;  %v3696_v31 = vld [vmem:[#allocation2 + $0x182] sm:$0xff]  ;;  %v3701_v2 = vld [vmem:[#allocation2 + $0xca] sm:$0xff] }
 0x1b2   : > { %1650 = vrot.lane.b32.xlu0 %v3505_v22, %s2706_s6  ;;  %v3611_v22 = vld [vmem:[#allocation2 + $0xaa] sm:$0xff] }
 0x1b3   : > { %v1258_v1 = vpop.permute.xlu1 %1257 }
 0x1b4   : > { %1349 = vst.msk [vmem:[#allocation3 + $0x28] sm:$0xff] %vm1343_vm7, %v1258_v1  ;;  %v1260_v40 = vpop.permute.xlu0 %1259 }
 0x1b5   : > { %1495 = vrot.lane.b32.xlu1 %v4050_v4, %s2705_s30  ;;  %1350 = vst.msk [vmem:[#allocation3 + $0x30] sm:$0xff] %vm1343_vm7, %v1260_v40 }
 0x1b6   : > { %1682 = vrot.lane.b32.xlu0 %v3512_v30, %s2706_s6  ;;  %v3619_v30 = vld [vmem:[#allocation2 + $0x16a] sm:$0xff] }
 0x1b7   : > { %v1290_v3 = vpop.permute.xlu1 %1289 }
 0x1b8   : > { %1365 = vst.msk [vmem:[#allocation3 + $0xa8] sm:$0xff] %vm1343_vm7, %v1290_v3  ;;  %v1292_v16 = vpop.permute.xlu0 %1291  ;;  %v1389_v3 = vld [vmem:[#allocation2 + $0xc0] sm:$0xff] }
 0x1b9   : > { %1652 = vrot.lane.b32.xlu1 %v3515_v14, %s2706_s6  ;;  %1366 = vst.msk [vmem:[#allocation3 + $0xb0] sm:$0xff] %vm1343_vm7, %v1292_v16  ;;  %v3623_v14 = vld [vmem:[#allocation2 + $0xb2] sm:$0xff]  ;;  %v3710_v16 = vld [vmem:[#allocation2 + $0x18a] sm:$0xff] }
 0x1ba   : > { %1654 = vrot.lane.b32.xlu0 %v3588_v50, %s2706_s6 }
 0x1bb   : > { %v1262_v35 = vpop.permute.xlu1 %1261 }
 0x1bc   : > { %1351 = vst.msk [vmem:[#allocation3 + $0x38] sm:$0xff] %vm1343_vm7, %v1262_v35  ;;  %v1450_v29 = vpop.permute.xlu0 %1449 }
 0x1bd   : > { %1684 = vrot.lane.b32.xlu1 %v3523_v39, %s2706_s6  ;;  %1542 = vst.msk [vmem:[#allocation3 + $0x20] sm:$0xff] %vm1537_vm8, %v1450_v29  ;;  %v1390_v29 = vld [vmem:[#allocation2 + $0xc8] sm:$0xff] }
 0x1be   : > { %1686 = vrot.lane.b32.xlu0 %v1596_v5, %s2706_s6 }
 0x1bf   : > { %v1294_v63 = vpop.permute.xlu1 %1293 }
 0x1c0   : > { %1367 = vst.msk [vmem:[#allocation3 + $0xb8] sm:$0xff] %vm1343_vm7, %v1294_v63  ;;  %v1482_v49 = vpop.permute.xlu0 %1481  ;;  %v1391_v63 = vld [vmem:[#allocation2 + $0xd8] sm:$0xff] }
 0x1c1   : > { %1656 = vrot.lane.b32.xlu1 %v1581_v43, %s2706_s6  ;;  %1558 = vst.msk [vmem:[#allocation3 + $0xa0] sm:$0xff] %vm1537_vm8, %v1482_v49 }
 0x1c2   : > { %1843 = vrot.lane.b32.xlu0 %v3533_v45, %s2707_s9  ;;  %v3645_v45 = vld [vmem:[#allocation2 + $0x188] sm:$0xff] }
 0x1c3   : > { %v1452_v24 = vpop.permute.xlu1 %1451 }
 0x1c4   : > { %1543 = vst.msk [vmem:[#allocation3 + $0x28] sm:$0xff] %vm1537_vm8, %v1452_v24  ;;  %v1454_v47 = vpop.permute.xlu0 %1453  ;;  %v1407_v24 = vld [vmem:[#allocation2 + $0x198] sm:$0xff] }
 0x1c5   : > { %1688 = vrot.lane.b32.xlu1 %v1597_v15, %s2706_s6  ;;  %1544 = vst.msk [vmem:[#allocation3 + $0x30] sm:$0xff] %vm1537_vm8, %v1454_v47 }
 0x1c6   : > { %1875 = vrot.lane.b32.xlu0 %v3542_v41, %s2707_s9  ;;  %v3663_v41 = vld [vmem:[#allocation2 + $0x181] sm:$0xff] }
 0x1c7   : > { %v1484_v25 = vpop.permute.xlu1 %1483 }
 0x1c8   : > { %1559 = vst.msk [vmem:[#allocation3 + $0xa8] sm:$0xff] %vm1537_vm8, %v1484_v25  ;;  %v1486_v56 = vpop.permute.xlu0 %1485  ;;  %v1392_v25 = vld [vmem:[#allocation2 + $0xe0] sm:$0xff] }
 0x1c9   : > { %1845 = vrot.lane.b32.xlu1 %v3546_v59, %s2707_s9  ;;  %1560 = vst.msk [vmem:[#allocation3 + $0xb0] sm:$0xff] %vm1537_vm8, %v1486_v56 }
 0x1ca   : > { %1847 = vrot.lane.b32.xlu0 %v3611_v22, %s2707_s9 }
 0x1cb   : > { %v1456_v27 = vpop.permute.xlu1 %1455 }
 0x1cc   : > { %1545 = vst.msk [vmem:[#allocation3 + $0x38] sm:$0xff] %vm1537_vm8, %v1456_v27  ;;  %v1643_v34 = vpop.permute.xlu0 %1642  ;;  %v1408_v27 = vld [vmem:[#allocation2 + $0x1a0] sm:$0xff] }
 0x1cd   : > { %1877 = vrot.lane.b32.xlu1 %v3555_v51, %s2707_s9  ;;  %1735 = vst.msk [vmem:[#allocation3 + $0x20] sm:$0xff] %vm1730_vm9, %v1643_v34 }
 0x1ce   : > { %1879 = vrot.lane.b32.xlu0 %v3619_v30, %s2707_s9 }
 0x1cf   : > { %v1488_v13 = vpop.permute.xlu1 %1487 }
 0x1d0   : > { %1561 = vst.msk [vmem:[#allocation3 + $0xb8] sm:$0xff] %vm1537_vm8, %v1488_v13  ;;  %v1675_v39 = vpop.permute.xlu0 %1674  ;;  %v1584_v13 = vld [vmem:[#allocation2 + $0xd9] sm:$0xff] }
 0x1d1   : > { %1849 = vrot.lane.b32.xlu1 %v3623_v14, %s2707_s9  ;;  %1751 = vst.msk [vmem:[#allocation3 + $0xa0] sm:$0xff] %vm1730_vm9, %v1675_v39 }
 0x1d2   : > { %917 = vrot.lane.b32.xlu0 %v825_v23, %s2702_s27 }
 0x1d3   : > { %v1645_v21 = vpop.permute.xlu1 %1644 }
 0x1d4   : > { %1736 = vst.msk [vmem:[#allocation3 + $0x28] sm:$0xff] %vm1730_vm9, %v1645_v21  ;;  %v1647_v37 = vpop.permute.xlu0 %1646 }
 0x1d5   : > { %1881 = vrot.lane.b32.xlu1 %v3631_v32, %s2707_s9  ;;  %1737 = vst.msk [vmem:[#allocation3 + $0x30] sm:$0xff] %vm1730_vm9, %v1647_v37 }
 0x1d6   : > { %921 = vrot.lane.b32.xlu0 %v3636_v18, %s2702_s27 }
 0x1d7   : > { %v1677_v28 = vpop.permute.xlu1 %1676 }
 0x1d8   : > { %1752 = vst.msk [vmem:[#allocation3 + $0xa8] sm:$0xff] %vm1730_vm9, %v1677_v28  ;;  %v1679_v38 = vpop.permute.xlu0 %1678  ;;  %v1601_v28 = vld [vmem:[#allocation2 + $0x1a1] sm:$0xff] }
 0x1d9   : > { %919 = vrot.lane.b32.xlu1 %v826_v42, %s2702_s27  ;;  %1753 = vst.msk [vmem:[#allocation3 + $0xb0] sm:$0xff] %vm1730_vm9, %v1679_v38 }
 0x1da   : > { %1078 = vrot.lane.b32.xlu0 %v3588_v50, %s2703_s28 }
 0x1db   : > { %v1649_v44 = vpop.permute.xlu1 %1648 }
 0x1dc   : > { %1738 = vst.msk [vmem:[#allocation3 + $0x38] sm:$0xff] %vm1730_vm9, %v1649_v44  ;;  %v1836_v53 = vpop.permute.xlu0 %1835 }
 0x1dd   : > { %923 = vrot.lane.b32.xlu1 %v3645_v45, %s2702_s27  ;;  %1928 = vst.msk [vmem:[#allocation3 + $0x20] sm:$0xff] %vm1923_vm10, %v1836_v53  ;;  %v1777_v53 = vld [vmem:[#allocation2 + $0xda] sm:$0xff] }
 0x1de   : > { %1110 = vrot.lane.b32.xlu0 %v1596_v5, %s2703_s28 }
 0x1df   : > { %v1681_v20 = vpop.permute.xlu1 %1680 }
 0x1e0   : > { %1754 = vst.msk [vmem:[#allocation3 + $0xb8] sm:$0xff] %vm1730_vm9, %v1681_v20  ;;  %v1868_v57 = vpop.permute.xlu0 %1867 }
 0x1e1   : > { %1080 = vrot.lane.b32.xlu1 %v1581_v43, %s2703_s28  ;;  %1944 = vst.msk [vmem:[#allocation3 + $0xa0] sm:$0xff] %vm1923_vm10, %v1868_v57  ;;  %v1793_v57 = vld [vmem:[#allocation2 + $0x19a] sm:$0xff] }
 0x1e2   : > { %1082 = vrot.lane.b32.xlu0 %v3656_v48, %s2703_s28 }
 0x1e3   : > { %v1838_v33 = vpop.permute.xlu1 %1837 }
 0x1e4   : > { %1929 = vst.msk [vmem:[#allocation3 + $0x28] sm:$0xff] %vm1923_vm10, %v1838_v33  ;;  %v1840_v11 = vpop.permute.xlu0 %1839  ;;  %v1960_v12 = vld [vmem:[#allocation3 + $0x20] sm:$0xff] }
 0x1e5   : > { %1112 = vrot.lane.b32.xlu1 %v1597_v15, %s2703_s28  ;;  %1930 = vst.msk [vmem:[#allocation3 + $0x30] sm:$0xff] %vm1923_vm10, %v1840_v11 }
 0x1e6   : > { %1114 = vrot.lane.b32.xlu0 %v3663_v41, %s2703_s28 }
 0x1e7   : > { %v1870_v59 = vpop.permute.xlu1 %1869 }
 0x1e8   : > { %1945 = vst.msk [vmem:[#allocation3 + $0xa8] sm:$0xff] %vm1923_vm10, %v1870_v59  ;;  %v1872_v19 = vpop.permute.xlu0 %1871  ;;  %v1976_v51 = vld [vmem:[#allocation3 + $0xa0] sm:$0xff]  ;;  %v1794_v59 = vld [vmem:[#allocation2 + $0x1a2] sm:$0xff] }
 0x1e9   : > { %1084 = vrot.lane.b32.xlu1 %v3666_v58, %s2703_s28  ;;  %1946 = vst.msk [vmem:[#allocation3 + $0xb0] sm:$0xff] %vm1923_vm10, %v1872_v19 }
 0x1ea   : > { %1271 = vrot.lane.b32.xlu0 %v3611_v22, %s2704_s29 }
 0x1eb   : > { %v1842_v61 = vpop.permute.xlu1 %1841  ;;  %v1961_v46 = vld [vmem:[#allocation3 + $0x28] sm:$0xff] }
 0x1ec   : > { %1931 = vst.msk [vmem:[#allocation3 + $0x38] sm:$0xff] %vm1923_vm10, %v1842_v61  ;;  %v1990_v60 = vpack.c.bf16 %v1961_v46, %v1960_v12  ;;  %v910_v0 = vpop.permute.xlu0 %909  ;;  %v1962_v8 = vld [vmem:[#allocation3 + $0x30] sm:$0xff] }
 0x1ed   : > { %1116 = vrot.lane.b32.xlu1 %v3674_v36, %s2703_s28  ;;  %982 = vst.msk [vmem:[#allocation3 + $0xc0] sm:$0xff] %vm957_vm4, %v910_v0 }
 0x1ee   : > { %2635 = vmatprep.mubr.msk.bf16.mxu0 %vm2031_vm11, %v1990_v60  ;;  %1303 = vrot.lane.b32.xlu0 %v3619_v30, %s2704_s29 }
 0x1ef   : > { %v1874_v6 = vpop.permute.xlu1 %1873  ;;  %v1977_v52 = vld [vmem:[#allocation3 + $0xa8] sm:$0xff] }
 0x1f0   : > { %1947 = vst.msk [vmem:[#allocation3 + $0xb8] sm:$0xff] %vm1923_vm10, %v1874_v6  ;;  %v1998_v54 = vpack.c.bf16 %v1977_v52, %v1976_v51  ;;  %v914_v55 = vpop.permute.xlu0 %913  ;;  %v1978_v62 = vld [vmem:[#allocation3 + $0xb0] sm:$0xff] }
 0x1f1   : > { %1273 = vrot.lane.b32.xlu1 %v3623_v14, %s2704_s29  ;;  %984 = vst.msk [vmem:[#allocation3 + $0xd0] sm:$0xff] %vm957_vm4, %v914_v55 }
 0x1f2   : > { %2651 = vmatprep.mubr.msk.bf16.mxu1 %vm2031_vm11, %v1998_v54  ;;  %1275 = vrot.lane.b32.xlu0 %v3687_v7, %s2704_s29 }
 0x1f3   : > { %v912_v26 = vpop.permute.xlu1 %911  ;;  %v1963_v9 = vld [vmem:[#allocation3 + $0x38] sm:$0xff] }
 0x1f4   : > { %983 = vst.msk [vmem:[#allocation3 + $0xc8] sm:$0xff] %vm957_vm4, %v912_v26  ;;  %v1991_v10 = vpack.c.bf16 %v1963_v9, %v1962_v8  ;;  %v1071_v17 = vpop.permute.xlu0 %1070 }
 0x1f5   : > { %1305 = vrot.lane.b32.xlu1 %v3631_v32, %s2704_s29  ;;  %1159 = vst.msk [vmem:[#allocation3 + $0x40] sm:$0xff] %vm1150_vm6, %v1071_v17  ;;  %v1600_v32 = vld [vmem:[#allocation2 + $0x199] sm:$0xff] }
 0x1f6   : > { %2636 = vmatmul.mubr.msk.bf16.gmra.mrb[4].mxu0 %vm2031_vm11, %v1991_v10  ;;  %1307 = vrot.lane.b32.xlu0 %v3696_v31, %s2704_s29 }
 0x1f7   : > { %v916_v1 = vpop.permute.xlu1 %915  ;;  %v1979_v4 = vld [vmem:[#allocation3 + $0xb8] sm:$0xff] }
 0x1f8   : > { %985 = vst.msk [vmem:[#allocation3 + $0xd8] sm:$0xff] %vm957_vm4, %v916_v1  ;;  %v1999_v40 = vpack.c.bf16 %v1979_v4, %v1978_v62  ;;  %v1103_v50 = vpop.permute.xlu0 %1102 }
 0x1f9   : > { %1277 = vrot.lane.b32.xlu1 %v3701_v2, %s2704_s29  ;;  %1175 = vst.msk [vmem:[#allocation3 + $0xc0] sm:$0xff] %vm1150_vm6, %v1103_v50 }
 0x1fa   : > { %2652 = vmatmul.mubr.msk.bf16.gmra.mrb[4].mxu1 %vm2031_vm11, %v1999_v40  ;;  %1465 = vrot.lane.b32.xlu0 %v1389_v3, %s2705_s30 }
 0x1fb   : > { %v1073_v35 = vpop.permute.xlu1 %1072 }
 0x1fc   : > { %1160 = vst.msk [vmem:[#allocation3 + $0x48] sm:$0xff] %vm1150_vm6, %v1073_v35  ;;  %v1075_v5 = vpop.permute.xlu0 %1074 }
 0x1fd   : > { %1309 = vrot.lane.b32.xlu1 %v3710_v16, %s2704_s29  ;;  %1161 = vst.msk [vmem:[#allocation3 + $0x50] sm:$0xff] %vm1150_vm6, %v1075_v5 }
 0x1fe   : > { %1497 = vrot.lane.b32.xlu0 %v3636_v18, %s2705_s30  ;;  %v1585_v18 = vld [vmem:[#allocation2 + $0xe1] sm:$0xff] }
 0x1ff   : > { %v1105_v43 = vpop.permute.xlu1 %1104 }
 0x200   : > { %1176 = vst.msk [vmem:[#allocation3 + $0xc8] sm:$0xff] %vm1150_vm6, %v1105_v43  ;;  %v1107_v49 = vpop.permute.xlu0 %1106 }
 0x201   : > { %1467 = vrot.lane.b32.xlu1 %v1390_v29, %s2705_s30  ;;  %1177 = vst.msk [vmem:[#allocation3 + $0xd0] sm:$0xff] %vm1150_vm6, %v1107_v49 }
 0x202   : > { %1469 = vrot.lane.b32.xlu0 %v1391_v63, %s2705_s30 }
 0x203   : > { %v1077_v15 = vpop.permute.xlu1 %1076 }
 0x204   : > { %1162 = vst.msk [vmem:[#allocation3 + $0x58] sm:$0xff] %vm1150_vm6, %v1077_v15  ;;  %v1264_v47 = vpop.permute.xlu0 %1263 }
 0x205   : > { %1499 = vrot.lane.b32.xlu1 %v3645_v45, %s2705_s30  ;;  %1352 = vst.msk [vmem:[#allocation3 + $0x40] sm:$0xff] %vm1343_vm7, %v1264_v47 }
 0x206   : > { %1501 = vrot.lane.b32.xlu0 %v1407_v24, %s2705_s30 }
 0x207   : > { %v1109_v22 = vpop.permute.xlu1 %1108 }
 0x208   : > { %1178 = vst.msk [vmem:[#allocation3 + $0xd8] sm:$0xff] %vm1150_vm6, %v1109_v22  ;;  %v1296_v56 = vpop.permute.xlu0 %1295 }
 0x209   : > { %1471 = vrot.lane.b32.xlu1 %v1392_v25, %s2705_s30  ;;  %1368 = vst.msk [vmem:[#allocation3 + $0xc0] sm:$0xff] %vm1343_vm7, %v1296_v56 }
 0x20a   : > { %1658 = vrot.lane.b32.xlu0 %v3656_v48, %s2706_s6 }
 0x20b   : > { %v1266_v30 = vpop.permute.xlu1 %1265 }
 0x20c   : > { %1353 = vst.msk [vmem:[#allocation3 + $0x48] sm:$0xff] %vm1343_vm7, %v1266_v30  ;;  %v1268_v34 = vpop.permute.xlu0 %1267 }
 0x20d   : > { %1503 = vrot.lane.b32.xlu1 %v1408_v27, %s2705_s30  ;;  %1354 = vst.msk [vmem:[#allocation3 + $0x50] sm:$0xff] %vm1343_vm7, %v1268_v34 }
 0x20e   : > { %1690 = vrot.lane.b32.xlu0 %v3663_v41, %s2706_s6  ;;  %v1778_v41 = vld [vmem:[#allocation2 + $0xe2] sm:$0xff] }
 0x20f   : > { %v1298_v14 = vpop.permute.xlu1 %1297 }
 0x210   : > { %1369 = vst.msk [vmem:[#allocation3 + $0xc8] sm:$0xff] %vm1343_vm7, %v1298_v14  ;;  %v1300_v23 = vpop.permute.xlu0 %1299 }
 0x211   : > { %1660 = vrot.lane.b32.xlu1 %v3666_v58, %s2706_s6  ;;  %1370 = vst.msk [vmem:[#allocation3 + $0xd0] sm:$0xff] %vm1343_vm7, %v1300_v23 }
 0x212   : > { %1662 = vrot.lane.b32.xlu0 %v1584_v13, %s2706_s6 }
 0x213   : > { %v1270_v39 = vpop.permute.xlu1 %1269 }
 0x214   : > { %1355 = vst.msk [vmem:[#allocation3 + $0x58] sm:$0xff] %vm1343_vm7, %v1270_v39  ;;  %v1458_v21 = vpop.permute.xlu0 %1457 }
 0x215   : > { %1692 = vrot.lane.b32.xlu1 %v3674_v36, %s2706_s6  ;;  %1546 = vst.msk [vmem:[#allocation3 + $0x40] sm:$0xff] %vm1537_vm8, %v1458_v21 }
 0x216   : > { %1694 = vrot.lane.b32.xlu0 %v1600_v32, %s2706_s6 }
 0x217   : > { %v1302_v37 = vpop.permute.xlu1 %1301 }
 0x218   : > { %1371 = vst.msk [vmem:[#allocation3 + $0xd8] sm:$0xff] %vm1343_vm7, %v1302_v37  ;;  %v1490_v42 = vpop.permute.xlu0 %1489  ;;  %v3816_v37 = vld [vmem:[%s4025_s2] ss:$0 sm:$0xff] }
 0x219   : > { %1664 = vrot.lane.b32.xlu1 %v1585_v18, %s2706_s6  ;;  %1562 = vst.msk [vmem:[#allocation3 + $0xc0] sm:$0xff] %vm1537_vm8, %v1490_v42 }
 0x21a   : > { %1851 = vrot.lane.b32.xlu0 %v3687_v7, %s2707_s9 }
 0x21b   : > { %v1460_v38 = vpop.permute.xlu1 %1459 }
 0x21c   : > { %1547 = vst.msk [vmem:[#allocation3 + $0x48] sm:$0xff] %vm1537_vm8, %v1460_v38  ;;  %v1462_v45 = vpop.permute.xlu0 %1461 }
 0x21d   : > { %1696 = vrot.lane.b32.xlu1 %v1601_v28, %s2706_s6  ;;  %1548 = vst.msk [vmem:[#allocation3 + $0x50] sm:$0xff] %vm1537_vm8, %v1462_v45 }
 0x21e   : > { %1883 = vrot.lane.b32.xlu0 %v3696_v31, %s2707_s9 }
 0x21f   : > { %v1492_v44 = vpop.permute.xlu1 %1491 }
 0x220   : > { %1563 = vst.msk [vmem:[#allocation3 + $0xc8] sm:$0xff] %vm1537_vm8, %v1492_v44  ;;  %v1494_v20 = vpop.permute.xlu0 %1493  ;;  %v3824_v44 = vld [vmem:[%s4026_s3] ss:$0 sm:$0xff] }
 0x221   : > { %1853 = vrot.lane.b32.xlu1 %v3701_v2, %s2707_s9  ;;  %1564 = vst.msk [vmem:[#allocation3 + $0xd0] sm:$0xff] %vm1537_vm8, %v1494_v20 }
 0x222   : > { %1855 = vrot.lane.b32.xlu0 %v1777_v53, %s2707_s9 }
 0x223   : > { %v1464_v48 = vpop.permute.xlu1 %1463 }
 0x224   : > { %1549 = vst.msk [vmem:[#allocation3 + $0x58] sm:$0xff] %vm1537_vm8, %v1464_v48  ;;  %v1651_v33 = vpop.permute.xlu0 %1650 }
 0x225   : > { %1885 = vrot.lane.b32.xlu1 %v3710_v16, %s2707_s9  ;;  %1739 = vst.msk [vmem:[#allocation3 + $0x40] sm:$0xff] %vm1730_vm9, %v1651_v33 }
 0x226   : > { %1887 = vrot.lane.b32.xlu0 %v1793_v57, %s2707_s9 }
 0x227   : > { %v1496_v11 = vpop.permute.xlu1 %1495 }
 0x228   : > { %1565 = vst.msk [vmem:[#allocation3 + $0xd8] sm:$0xff] %vm1537_vm8, %v1496_v11  ;;  %v1683_v58 = vpop.permute.xlu0 %1682  ;;  %v3832_v11 = vld [vmem:[%s4027_s4] ss:$0 sm:$0xff] }
 0x229   : > { %1857 = vrot.lane.b32.xlu1 %v1778_v41, %s2707_s9  ;;  %1755 = vst.msk [vmem:[#allocation3 + $0xc0] sm:$0xff] %vm1730_vm9, %v1683_v58 }
 0x22b   : > { %v1653_v12 = vpop.permute.xlu1 %1652 }
 0x22c   : > { %1740 = vst.msk [vmem:[#allocation3 + $0x48] sm:$0xff] %vm1730_vm9, %v1653_v12  ;;  %v1655_v19 = vpop.permute.xlu0 %1654 }
 0x22d   : > { %1889 = vrot.lane.b32.xlu1 %v1794_v59, %s2707_s9  ;;  %1741 = vst.msk [vmem:[#allocation3 + $0x50] sm:$0xff] %vm1730_vm9, %v1655_v19 }
 0x22f   : > { %v1685_v36 = vpop.permute.xlu1 %1684 }
 0x230   : > { %1756 = vst.msk [vmem:[#allocation3 + $0xc8] sm:$0xff] %vm1730_vm9, %v1685_v36  ;;  %v1687_v61 = vpop.permute.xlu0 %1686 }
 0x231   : > { %1757 = vst.msk [vmem:[#allocation3 + $0xd0] sm:$0xff] %vm1730_vm9, %v1687_v61 }
 0x233   : > { %v1657_v46 = vpop.permute.xlu1 %1656 }
 0x234   : > { %1742 = vst.msk [vmem:[#allocation3 + $0x58] sm:$0xff] %vm1730_vm9, %v1657_v46  ;;  %v1844_v60 = vpop.permute.xlu0 %1843 }
 0x235   : > { %1932 = vst.msk [vmem:[#allocation3 + $0x40] sm:$0xff] %vm1923_vm10, %v1844_v60 }
 0x237   : > { %v1689_v51 = vpop.permute.xlu1 %1688 }
 0x238   : > { %1758 = vst.msk [vmem:[#allocation3 + $0xd8] sm:$0xff] %vm1730_vm9, %v1689_v51  ;;  %v1876_v0 = vpop.permute.xlu0 %1875 }
 0x239   : > { %1948 = vst.msk [vmem:[#allocation3 + $0xc0] sm:$0xff] %vm1923_vm10, %v1876_v0 }
 0x23b   : > { %v1846_v6 = vpop.permute.xlu1 %1845 }
 0x23c   : > { %1933 = vst.msk [vmem:[#allocation3 + $0x48] sm:$0xff] %vm1923_vm10, %v1846_v6  ;;  %v1848_v52 = vpop.permute.xlu0 %1847  ;;  %v1964_v7 = vld [vmem:[#allocation3 + $0x40] sm:$0xff] }
 0x23d   : > { %1934 = vst.msk [vmem:[#allocation3 + $0x50] sm:$0xff] %vm1923_vm10, %v1848_v52 }
 0x23f   : > { %v1878_v54 = vpop.permute.xlu1 %1877 }
 0x240   : > { %1949 = vst.msk [vmem:[#allocation3 + $0xc8] sm:$0xff] %vm1923_vm10, %v1878_v54  ;;  %v1880_v8 = vpop.permute.xlu0 %1879  ;;  %v1980_v10 = vld [vmem:[#allocation3 + $0xc0] sm:$0xff] }
 0x241   : > { %1950 = vst.msk [vmem:[#allocation3 + $0xd0] sm:$0xff] %vm1923_vm10, %v1880_v8 }
 0x243   : > { %v1850_v55 = vpop.permute.xlu1 %1849  ;;  %v1965_v26 = vld [vmem:[#allocation3 + $0x48] sm:$0xff] }
 0x244   : > { %1935 = vst.msk [vmem:[#allocation3 + $0x58] sm:$0xff] %vm1923_vm10, %v1850_v55  ;;  %v1992_v9 = vpack.c.bf16 %v1965_v26, %v1964_v7  ;;  %v918_v31 = vpop.permute.xlu0 %917  ;;  %v1966_v1 = vld [vmem:[#allocation3 + $0x50] sm:$0xff] }
 0x245   : > { %986 = vst.msk [vmem:[#allocation3 + $0xe0] sm:$0xff] %vm957_vm4, %v918_v31 }
 0x246   : > { %2639 = vmatprep.mubr.msk.bf16.mxu0 %vm2031_vm11, %v1992_v9 }
 0x247   : > { %v1882_v62 = vpop.permute.xlu1 %1881  ;;  %v1981_v17 = vld [vmem:[#allocation3 + $0xc8] sm:$0xff] }
 0x248   : > { %1951 = vst.msk [vmem:[#allocation3 + $0xd8] sm:$0xff] %vm1923_vm10, %v1882_v62  ;;  %v2000_v2 = vpack.c.bf16 %v1981_v17, %v1980_v10  ;;  %v922_v4 = vpop.permute.xlu0 %921  ;;  %v1982_v16 = vld [vmem:[#allocation3 + $0xd0] sm:$0xff] }
 0x249   : > { %988 = vst.msk [vmem:[#allocation3 + $0xf0] sm:$0xff] %vm957_vm4, %v922_v4 }
 0x24a   : > { %2655 = vmatprep.mubr.msk.bf16.mxu1 %vm2031_vm11, %v2000_v2 }
 0x24b   : > { %v920_v40 = vpop.permute.xlu1 %919  ;;  %v1967_v3 = vld [vmem:[#allocation3 + $0x58] sm:$0xff] }
 0x24c   : > { %987 = vst.msk [vmem:[#allocation3 + $0xe8] sm:$0xff] %vm957_vm4, %v920_v40  ;;  %v1993_v50 = vpack.c.bf16 %v1967_v3, %v1966_v1  ;;  %v1079_v35 = vpop.permute.xlu0 %1078 }
 0x24d   : > { %1163 = vst.msk [vmem:[#allocation3 + $0x60] sm:$0xff] %vm1150_vm6, %v1079_v35 }
 0x24e   : > { %2640 = vmatmul.mubr.msk.bf16.gmra.mrb[8].mxu0 %vm2031_vm11, %v1993_v50 }
 0x24f   : > { %v924_v5 = vpop.permute.xlu1 %923  ;;  %v1983_v29 = vld [vmem:[#allocation3 + $0xd8] sm:$0xff] }
 0x250   : > { %989 = vst.msk [vmem:[#allocation3 + $0xf8] sm:$0xff] %vm957_vm4, %v924_v5  ;;  %v2001_v43 = vpack.c.bf16 %v1983_v29, %v1982_v16  ;;  %v1111_v63 = vpop.permute.xlu0 %1110 }
 0x251   : > { %1179 = vst.msk [vmem:[#allocation3 + $0xe0] sm:$0xff] %vm1150_vm6, %v1111_v63 }
 0x252   : > { %2656 = vmatmul.mubr.msk.bf16.gmra.mrb[8].mxu1 %vm2031_vm11, %v2001_v43 }
 0x253   : > { %v1081_v49 = vpop.permute.xlu1 %1080 }
 0x254   : > { %1164 = vst.msk [vmem:[#allocation3 + $0x68] sm:$0xff] %vm1150_vm6, %v1081_v49  ;;  %v1083_v15 = vpop.permute.xlu0 %1082 }
 0x255   : > { %1165 = vst.msk [vmem:[#allocation3 + $0x70] sm:$0xff] %vm1150_vm6, %v1083_v15 }
 0x257   : > { %v1113_v24 = vpop.permute.xlu1 %1112 }
 0x258   : > { %1180 = vst.msk [vmem:[#allocation3 + $0xe8] sm:$0xff] %vm1150_vm6, %v1113_v24  ;;  %v1115_v47 = vpop.permute.xlu0 %1114 }
 0x259   : > { %1181 = vst.msk [vmem:[#allocation3 + $0xf0] sm:$0xff] %vm1150_vm6, %v1115_v47 }
 0x25b   : > { %v1085_v25 = vpop.permute.xlu1 %1084 }
 0x25c   : > { %1166 = vst.msk [vmem:[#allocation3 + $0x78] sm:$0xff] %vm1150_vm6, %v1085_v25  ;;  %v1272_v22 = vpop.permute.xlu0 %1271 }
 0x25d   : > { %1356 = vst.msk [vmem:[#allocation3 + $0x60] sm:$0xff] %vm1343_vm7, %v1272_v22 }
 0x25f   : > { %v1117_v56 = vpop.permute.xlu1 %1116 }
 0x260   : > { %1182 = vst.msk [vmem:[#allocation3 + $0xf8] sm:$0xff] %vm1150_vm6, %v1117_v56  ;;  %v1304_v27 = vpop.permute.xlu0 %1303 }
 0x261   : > { %1372 = vst.msk [vmem:[#allocation3 + $0xe0] sm:$0xff] %vm1343_vm7, %v1304_v27 }
 0x263   : > { %v1274_v30 = vpop.permute.xlu1 %1273 }
 0x264   : > { %1357 = vst.msk [vmem:[#allocation3 + $0x68] sm:$0xff] %vm1343_vm7, %v1274_v30  ;;  %v1276_v34 = vpop.permute.xlu0 %1275 }
 0x265   : > { %1358 = vst.msk [vmem:[#allocation3 + $0x70] sm:$0xff] %vm1343_vm7, %v1276_v34 }
 0x267   : > { %v1306_v14 = vpop.permute.xlu1 %1305 }
 0x268   : > { %1373 = vst.msk [vmem:[#allocation3 + $0xe8] sm:$0xff] %vm1343_vm7, %v1306_v14  ;;  %v1308_v13 = vpop.permute.xlu0 %1307 }
 0x269   : > { %1374 = vst.msk [vmem:[#allocation3 + $0xf0] sm:$0xff] %vm1343_vm7, %v1308_v13 }
 0x26b   : > { %v1278_v23 = vpop.permute.xlu1 %1277 }
 0x26c   : > { %1359 = vst.msk [vmem:[#allocation3 + $0x78] sm:$0xff] %vm1343_vm7, %v1278_v23  ;;  %v1466_v39 = vpop.permute.xlu0 %1465 }
 0x26d   : > { %1550 = vst.msk [vmem:[#allocation3 + $0x60] sm:$0xff] %vm1537_vm8, %v1466_v39 }
 0x26f   : > { %v1310_v32 = vpop.permute.xlu1 %1309 }
 0x270   : > { %1375 = vst.msk [vmem:[#allocation3 + $0xf8] sm:$0xff] %vm1343_vm7, %v1310_v32  ;;  %v1498_v21 = vpop.permute.xlu0 %1497 }
 0x271   : > { %1566 = vst.msk [vmem:[#allocation3 + $0xe0] sm:$0xff] %vm1537_vm8, %v1498_v21 }
 0x273   : > { %v1468_v18 = vpop.permute.xlu1 %1467 }
 0x274   : > { %1551 = vst.msk [vmem:[#allocation3 + $0x68] sm:$0xff] %vm1537_vm8, %v1468_v18  ;;  %v1470_v28 = vpop.permute.xlu0 %1469 }
 0x275   : > { %v2633_v42 = vpop.f32.mrb[0].mxu0  ;;  %1552 = vst.msk [vmem:[#allocation3 + $0x70] sm:$0xff] %vm1537_vm8, %v1470_v28 }
 0x276   : > { %v2127_v38 = vadd.f32 %v2633_v42, %v3816_v37  ;;  %v2118_v45 = vpop.f32.mrb[1].mxu0 }
 0x277   : > { %v2119_v53 = vadd.f32 %v3816_v37, %v2118_v45  ;;  %v1500_v20 = vpop.permute.xlu1 %1499  ;;  %v2634_v48 = vpop.f32.mrb[2].mxu0 }
 0x278   : > { %v2247_v57 = vmax.f32 %v2127_v38, 0.0  ;;  %1567 = vst.msk [vmem:[#allocation3 + $0xe8] sm:$0xff] %vm1537_vm8, %v1500_v20  ;;  %v2130_v33 = vadd.f32 %v2634_v48, %v3816_v37  ;;  %v2121_v41 = vpop.f32.mrb[3].mxu0  ;;  %v1502_v19 = vpop.permute.xlu0 %1501 }
 0x279   : > { %v2245_v58 = vmax.f32 %v2119_v53, 0.0  ;;  %v2122_v59 = vadd.f32 %v3816_v37, %v2121_v41  ;;  %v2649_v12 = vpop.f32.mrb[0].mxu1  ;;  %1568 = vst.msk [vmem:[#allocation3 + $0xf0] sm:$0xff] %vm1537_vm8, %v1502_v19 }
 0x27a   : > { %v2286_v36 = vmul.f32 %v3824_v44, %v2247_v57  ;;  %v2248_v61 = vmax.f32 %v2130_v33, 0.0  ;;  %v2191_v46 = vadd.f32 %v2649_v12, %v3816_v37  ;;  %v2182_v60 = vpop.f32.mrb[1].mxu1 }
 0x27b   : > { %v2284_v51 = vmul.f32 %v3824_v44, %v2245_v58  ;;  %v2246_v0 = vmax.f32 %v2122_v59, 0.0  ;;  %v2183_v6 = vadd.f32 %v3816_v37, %v2182_v60  ;;  %v2650_v52 = vpop.f32.mrb[2].mxu1  ;;  %v1472_v54 = vpop.permute.xlu1 %1471 }
 0x27c   : > { %v2325_v7 = vadd.f32 %v3832_v11, %v2286_v36  ;;  %v2287_v8 = vmul.f32 %v3824_v44, %v2248_v61  ;;  %v2263_v55 = vmax.f32 %v2191_v46, 0.0  ;;  %v2194_v26 = vadd.f32 %v2650_v52, %v3816_v37  ;;  %1553 = vst.msk [vmem:[#allocation3 + $0x78] sm:$0xff] %vm1537_vm8, %v1472_v54  ;;  %v2185_v9 = vpop.f32.mrb[3].mxu1  ;;  %v1659_v2 = vpop.permute.xlu0 %1658 }
 0x27d   : > { %v2323_v10 = vadd.f32 %v3832_v11, %v2284_v51  ;;  %v2285_v31 = vmul.f32 %v3824_v44, %v2246_v0  ;;  %v2261_v62 = vmax.f32 %v2183_v6, 0.0  ;;  %v2186_v17 = vadd.f32 %v3816_v37, %v2185_v9  ;;  %1743 = vst.msk [vmem:[#allocation3 + $0x60] sm:$0xff] %vm1730_vm9, %v1659_v2 }
 0x27e   : > { %2358 = vst.msk [vmem:[#allocation4 + $0x10] sm:$0xff] %vm2355_vm12, %v2325_v7  ;;  %v2326_v1 = vadd.f32 %v3832_v11, %v2287_v8  ;;  %v2302_v4 = vmul.f32 %v3824_v44, %v2263_v55  ;;  %v2264_v40 = vmax.f32 %v2194_v26, 0.0 }
 0x27f   : > { %2356 = vst.msk [vmem:[#allocation4] sm:$0xff] %vm2355_vm12, %v2323_v10  ;;  %v2324_v3 = vadd.f32 %v3832_v11, %v2285_v31  ;;  %v2300_v50 = vmul.f32 %v3824_v44, %v2261_v62  ;;  %v2262_v16 = vmax.f32 %v2186_v17, 0.0  ;;  %v1504_v35 = vpop.permute.xlu1 %1503 }
 0x280   : > { %2359 = vst.msk [vmem:[#allocation4 + $0x18] sm:$0xff] %vm2355_vm12, %v2326_v1  ;;  %v2341_v5 = vadd.f32 %v3832_v11, %v2302_v4  ;;  %v2303_v29 = vmul.f32 %v3824_v44, %v2264_v40  ;;  %v1691_v49 = vpop.permute.xlu0 %1690 }
 0x281   : > { %1569 = vst.msk [vmem:[#allocation3 + $0xf8] sm:$0xff] %vm1537_vm8, %v1504_v35  ;;  %v2339_v43 = vadd.f32 %v3832_v11, %v2300_v50  ;;  %v2301_v63 = vmul.f32 %v3824_v44, %v2262_v16 }
 0x282   : > { %2357 = vst.msk [vmem:[#allocation4 + $0x8] sm:$0xff] %vm2355_vm12, %v2324_v3  ;;  %2374 = vst.msk [vmem:[#allocation4 + $0x90] sm:$0xff] %vm2355_vm12, %v2341_v5  ;;  %v2342_v15 = vadd.f32 %v3832_v11, %v2303_v29 }
 0x283   : > { %1759 = vst.msk [vmem:[#allocation3 + $0xe0] sm:$0xff] %vm1730_vm9, %v1691_v49  ;;  %v2340_v24 = vadd.f32 %v3832_v11, %v2301_v63  ;;  %v1661_v47 = vpop.permute.xlu1 %1660 }
 0x284   : > { %2372 = vst.msk [vmem:[#allocation4 + $0x80] sm:$0xff] %vm2355_vm12, %v2339_v43  ;;  %2375 = vst.msk [vmem:[#allocation4 + $0x98] sm:$0xff] %vm2355_vm12, %v2342_v15  ;;  %v1663_v25 = vpop.permute.xlu0 %1662 }
 0x285   : > { %1744 = vst.msk [vmem:[#allocation3 + $0x68] sm:$0xff] %vm1730_vm9, %v1661_v47  ;;  %1745 = vst.msk [vmem:[#allocation3 + $0x70] sm:$0xff] %vm1730_vm9, %v1663_v25 }
 0x286   : > { %2373 = vst.msk [vmem:[#allocation4 + $0x88] sm:$0xff] %vm2355_vm12, %v2340_v24 }
 0x287   : > { %v2390_v22 = vld [vmem:[#allocation4 + $0x10] ss:$2 sm:$0xff]  ;;  %v2422_v56 = vld [vmem:[#allocation4 + $0x11] ss:$2 sm:$0xff]  ;;  %v1693_v27 = vpop.permute.xlu1 %1692 }
 0x288   : > { %v2452_v30 = vmax.f32 %v2390_v22, %v2422_v56  ;;  %1760 = vst.msk [vmem:[#allocation3 + $0xe8] sm:$0xff] %vm1730_vm9, %v1693_v27  ;;  %v1695_v23 = vpop.permute.xlu0 %1694 }
 0x289   : > { %v2388_v34 = vld [vmem:[#allocation4] ss:$2 sm:$0xff]  ;;  %v2420_v14 = vld [vmem:[#allocation4 + $0x1] ss:$2 sm:$0xff]  ;;  %1761 = vst.msk [vmem:[#allocation3 + $0xf0] sm:$0xff] %vm1730_vm9, %v1695_v23 }
 0x28a   : > { %v2451_v13 = vmax.f32 %v2388_v34, %v2420_v14  ;;  %2468 = vst.msk [vmem:[#allocation5 + $0x8] sm:$0xff] %vm2355_vm12, %v2452_v30 }
 0x28b   : > { %v2406_v39 = vld [vmem:[#allocation4 + $0x90] ss:$2 sm:$0xff]  ;;  %v2438_v32 = vld [vmem:[#allocation4 + $0x91] ss:$2 sm:$0xff]  ;;  %v1665_v21 = vpop.permute.xlu1 %1664 }
 0x28c   : > { %2467 = vst.msk [vmem:[#allocation5] sm:$0xff] %vm2355_vm12, %v2451_v13  ;;  %v2460_v18 = vmax.f32 %v2406_v39, %v2438_v32  ;;  %v1852_v45 = vpop.permute.xlu0 %1851 }
 0x28d   : > { %v2404_v42 = vld [vmem:[#allocation4 + $0x80] ss:$2 sm:$0xff]  ;;  %v2436_v28 = vld [vmem:[#allocation4 + $0x81] ss:$2 sm:$0xff]  ;;  %1746 = vst.msk [vmem:[#allocation3 + $0x78] sm:$0xff] %vm1730_vm9, %v1665_v21 }
 0x28e   : > { %v2459_v38 = vmax.f32 %v2404_v42, %v2436_v28  ;;  %2476 = vst.msk [vmem:[#allocation5 + $0x48] sm:$0xff] %vm2355_vm12, %v2460_v18 }
 0x28f   : > { %1936 = vst.msk [vmem:[#allocation3 + $0x60] sm:$0xff] %vm1923_vm10, %v1852_v45  ;;  %v1697_v53 = vpop.permute.xlu1 %1696 }
 0x290   : > { %2475 = vst.msk [vmem:[#allocation5 + $0x40] sm:$0xff] %vm2355_vm12, %v2459_v38  ;;  %v1884_v48 = vpop.permute.xlu0 %1883 }
 0x291   : > { %1762 = vst.msk [vmem:[#allocation3 + $0xf8] sm:$0xff] %vm1730_vm9, %v1697_v53  ;;  %v2492_v20 = vld [vmem:[#allocation5 + $0x8] sm:$0xff] }
 0x292   : > { %1952 = vst.msk [vmem:[#allocation3 + $0xe0] sm:$0xff] %vm1923_vm10, %v1884_v48 }
 0x293   : > { %v2483_v57 = vld [vmem:[#allocation5] sm:$0xff]  ;;  %v1854_v41 = vpop.permute.xlu1 %1853 }
 0x294   : > { %v2500_v33 = vmax.f32 %v2483_v57, %v2492_v20  ;;  %1937 = vst.msk [vmem:[#allocation3 + $0x68] sm:$0xff] %vm1923_vm10, %v1854_v41  ;;  %v1856_v59 = vpop.permute.xlu0 %1855 }
 0x295   : > { %v2496_v58 = vld [vmem:[#allocation5 + $0x48] sm:$0xff]  ;;  %1938 = vst.msk [vmem:[#allocation3 + $0x70] sm:$0xff] %vm1923_vm10, %v1856_v59 }
 0x296   : > { %2508 = vst.msk [vmem:[%s3883_s25] sm:$0xff] %vm2355_vm12, %v2500_v33  ;;  %v1968_v61 = vld [vmem:[#allocation3 + $0x60] sm:$0xff] }
 0x297   : > { %v2487_v12 = vld [vmem:[#allocation5 + $0x40] sm:$0xff]  ;;  %v1886_v36 = vpop.permute.xlu1 %1885 }
 0x298   : > { %v2504_v19 = vmax.f32 %v2487_v12, %v2496_v58  ;;  %1953 = vst.msk [vmem:[#allocation3 + $0xe8] sm:$0xff] %vm1923_vm10, %v1886_v36  ;;  %v1888_v46 = vpop.permute.xlu0 %1887 }
 0x299   : > { %1954 = vst.msk [vmem:[#allocation3 + $0xf0] sm:$0xff] %vm1923_vm10, %v1888_v46  ;;  %v1984_v6 = vld [vmem:[#allocation3 + $0xe0] sm:$0xff] }
 0x29a   : > { %2512 = vst.msk [vmem:[%s3883_s25 + $0x20] sm:$0xff] %vm2355_vm12, %v2504_v19 }
 0x29b   : > { %v1858_v60 = vpop.permute.xlu1 %1857  ;;  %v1969_v51 = vld [vmem:[#allocation3 + $0x68] sm:$0xff] }
 0x29c   : > { %1939 = vst.msk [vmem:[#allocation3 + $0x78] sm:$0xff] %vm1923_vm10, %v1858_v60  ;;  %v1994_v0 = vpack.c.bf16 %v1969_v51, %v1968_v61  ;;  %v1970_v8 = vld [vmem:[#allocation3 + $0x70] sm:$0xff] }
 0x29e   : > { %2643 = vmatprep.mubr.msk.bf16.mxu0 %vm2031_vm11, %v1994_v0 }
 0x29f   : > { %v1890_v52 = vpop.permute.xlu1 %1889  ;;  %v1985_v54 = vld [vmem:[#allocation3 + $0xe8] sm:$0xff] }
 0x2a0   : > { %1955 = vst.msk [vmem:[#allocation3 + $0xf8] sm:$0xff] %vm1923_vm10, %v1890_v52  ;;  %v2002_v7 = vpack.c.bf16 %v1985_v54, %v1984_v6  ;;  %v1986_v9 = vld [vmem:[#allocation3 + $0xf0] sm:$0xff] }
 0x2a2   : > { %2659 = vmatprep.mubr.msk.bf16.mxu1 %vm2031_vm11, %v2002_v7 }
 0x2a3   : > { %v1971_v55 = vld [vmem:[#allocation3 + $0x78] sm:$0xff] }
 0x2a4   : > { %v1995_v26 = vpack.c.bf16 %v1971_v55, %v1970_v8 }
 0x2a6   : > { %2644 = vmatmul.mubr.msk.bf16.gmra.mrb[12].mxu0 %vm2031_vm11, %v1995_v26 }
 0x2a7   : > { %v1987_v10 = vld [vmem:[#allocation3 + $0xf8] sm:$0xff] }
 0x2a8   : > { %v2003_v31 = vpack.c.bf16 %v1987_v10, %v1986_v9 }
 0x2aa   : > { %2660 = vmatmul.mubr.msk.bf16.gmra.mrb[12].mxu1 %vm2031_vm11, %v2003_v31 }
 0x2c9   : > { %v2637_v62 = vpop.f32.mrb[4].mxu0 }
 0x2ca   : > { %v2143_v17 = vadd.f32 %v2637_v62, %v3816_v37  ;;  %v2134_v2 = vpop.f32.mrb[5].mxu0 }
 0x2cb   : > { %v2135_v1 = vadd.f32 %v3816_v37, %v2134_v2  ;;  %v2638_v4 = vpop.f32.mrb[6].mxu0 }
 0x2cc   : > { %v2251_v40 = vmax.f32 %v2143_v17, 0.0  ;;  %v2146_v3 = vadd.f32 %v2638_v4, %v3816_v37  ;;  %v2137_v50 = vpop.f32.mrb[7].mxu0 }
 0x2cd   : > { %v2249_v16 = vmax.f32 %v2135_v1, 0.0  ;;  %v2138_v35 = vadd.f32 %v3816_v37, %v2137_v50  ;;  %v2653_v5 = vpop.f32.mrb[4].mxu1 }
 0x2ce   : > { %v2290_v29 = vmul.f32 %v3824_v44, %v2251_v40  ;;  %v2252_v43 = vmax.f32 %v2146_v3, 0.0  ;;  %v2207_v63 = vadd.f32 %v2653_v5, %v3816_v37  ;;  %v2198_v49 = vpop.f32.mrb[5].mxu1 }
 0x2cf   : > { %v2288_v15 = vmul.f32 %v3824_v44, %v2249_v16  ;;  %v2250_v24 = vmax.f32 %v2138_v35, 0.0  ;;  %v2199_v47 = vadd.f32 %v3816_v37, %v2198_v49  ;;  %v2654_v25 = vpop.f32.mrb[6].mxu1 }
 0x2d0   : > { %v2329_v22 = vadd.f32 %v3832_v11, %v2290_v29  ;;  %v2291_v56 = vmul.f32 %v3824_v44, %v2252_v43  ;;  %v2267_v27 = vmax.f32 %v2207_v63, 0.0  ;;  %v2210_v30 = vadd.f32 %v2654_v25, %v3816_v37  ;;  %v2201_v34 = vpop.f32.mrb[7].mxu1 }
 0x2d1   : > { %v2327_v14 = vadd.f32 %v3832_v11, %v2288_v15  ;;  %v2289_v13 = vmul.f32 %v3824_v44, %v2250_v24  ;;  %v2265_v23 = vmax.f32 %v2199_v47, 0.0  ;;  %v2202_v39 = vadd.f32 %v3816_v37, %v2201_v34 }
 0x2d2   : > { %2362 = vst.msk [vmem:[#allocation4 + $0x30] sm:$0xff] %vm2355_vm12, %v2329_v22  ;;  %v2330_v32 = vadd.f32 %v3832_v11, %v2291_v56  ;;  %v2306_v21 = vmul.f32 %v3824_v44, %v2267_v27  ;;  %v2268_v18 = vmax.f32 %v2210_v30, 0.0 }
 0x2d3   : > { %2360 = vst.msk [vmem:[#allocation4 + $0x20] sm:$0xff] %vm2355_vm12, %v2327_v14  ;;  %v2328_v42 = vadd.f32 %v3832_v11, %v2289_v13  ;;  %v2304_v28 = vmul.f32 %v3824_v44, %v2265_v23  ;;  %v2266_v38 = vmax.f32 %v2202_v39, 0.0 }
 0x2d4   : > { %2363 = vst.msk [vmem:[#allocation4 + $0x38] sm:$0xff] %vm2355_vm12, %v2330_v32  ;;  %v2345_v45 = vadd.f32 %v3832_v11, %v2306_v21  ;;  %v2307_v53 = vmul.f32 %v3824_v44, %v2268_v18 }
 0x2d5   : > { %2361 = vst.msk [vmem:[#allocation4 + $0x28] sm:$0xff] %vm2355_vm12, %v2328_v42  ;;  %v2343_v20 = vadd.f32 %v3832_v11, %v2304_v28  ;;  %v2305_v48 = vmul.f32 %v3824_v44, %v2266_v38 }
 0x2d6   : > { %2378 = vst.msk [vmem:[#allocation4 + $0xb0] sm:$0xff] %vm2355_vm12, %v2345_v45  ;;  %v2346_v57 = vadd.f32 %v3832_v11, %v2307_v53 }
 0x2d7   : > { %2376 = vst.msk [vmem:[#allocation4 + $0xa0] sm:$0xff] %vm2355_vm12, %v2343_v20  ;;  %v2344_v33 = vadd.f32 %v3832_v11, %v2305_v48 }
 0x2d8   : > { %2379 = vst.msk [vmem:[#allocation4 + $0xb8] sm:$0xff] %vm2355_vm12, %v2346_v57 }
 0x2d9   : > { %2377 = vst.msk [vmem:[#allocation4 + $0xa8] sm:$0xff] %vm2355_vm12, %v2344_v33 }
 0x2db   : > { %v2394_v41 = vld [vmem:[#allocation4 + $0x30] ss:$2 sm:$0xff]  ;;  %v2426_v58 = vld [vmem:[#allocation4 + $0x31] ss:$2 sm:$0xff] }
 0x2dc   : > { %v2454_v59 = vmax.f32 %v2394_v41, %v2426_v58  ;;  %v2392_v12 = vld [vmem:[#allocation4 + $0x20] ss:$2 sm:$0xff]  ;;  %v2424_v19 = vld [vmem:[#allocation4 + $0x21] ss:$2 sm:$0xff] }
 0x2dd   : > { %v2453_v36 = vmax.f32 %v2392_v12, %v2424_v19 }
 0x2de   : > { %2470 = vst.msk [vmem:[#allocation5 + $0x18] sm:$0xff] %vm2355_vm12, %v2454_v59 }
 0x2df   : > { %2469 = vst.msk [vmem:[#allocation5 + $0x10] sm:$0xff] %vm2355_vm12, %v2453_v36  ;;  %v2410_v61 = vld [vmem:[#allocation4 + $0xb0] ss:$2 sm:$0xff]  ;;  %v2442_v46 = vld [vmem:[#allocation4 + $0xb1] ss:$2 sm:$0xff] }
 0x2e0   : > { %v2462_v60 = vmax.f32 %v2410_v61, %v2442_v46  ;;  %v2408_v51 = vld [vmem:[#allocation4 + $0xa0] ss:$2 sm:$0xff]  ;;  %v2440_v0 = vld [vmem:[#allocation4 + $0xa1] ss:$2 sm:$0xff] }
 0x2e1   : > { %v2461_v6 = vmax.f32 %v2408_v51, %v2440_v0 }
 0x2e2   : > { %2478 = vst.msk [vmem:[#allocation5 + $0x58] sm:$0xff] %vm2355_vm12, %v2462_v60 }
 0x2e3   : > { %2477 = vst.msk [vmem:[#allocation5 + $0x50] sm:$0xff] %vm2355_vm12, %v2461_v6 }
 0x2e5   : > { %v2493_v52 = vld [vmem:[#allocation5 + $0x18] sm:$0xff] }
 0x2e6   : > { %v2484_v54 = vld [vmem:[#allocation5 + $0x10] sm:$0xff] }
 0x2e7   : > { %v2501_v7 = vmax.f32 %v2484_v54, %v2493_v52 }
 0x2e9   : > { %2509 = vst.msk [vmem:[%s3883_s25 + $0x8] sm:$0xff] %vm2355_vm12, %v2501_v7  ;;  %v2497_v8 = vld [vmem:[#allocation5 + $0x58] sm:$0xff] }
 0x2ea   : > { %v2488_v55 = vld [vmem:[#allocation5 + $0x50] sm:$0xff] }
 0x2eb   : > { %v2505_v26 = vmax.f32 %v2488_v55, %v2497_v8 }
 0x2ed   : > { %2513 = vst.msk [vmem:[%s3883_s25 + $0x28] sm:$0xff] %vm2355_vm12, %v2505_v26 }
 0x321   : > { %v2641_v9 = vpop.f32.mrb[8].mxu0 }
 0x322   : > { %v2159_v10 = vadd.f32 %v2641_v9, %v3816_v37  ;;  %v2150_v31 = vpop.f32.mrb[9].mxu0 }
 0x323   : > { %v2151_v62 = vadd.f32 %v3816_v37, %v2150_v31  ;;  %v2642_v17 = vpop.f32.mrb[10].mxu0 }
 0x324   : > { %v2255_v2 = vmax.f32 %v2159_v10, 0.0  ;;  %v2162_v1 = vadd.f32 %v2642_v17, %v3816_v37  ;;  %v2153_v4 = vpop.f32.mrb[11].mxu0 }
 0x325   : > { %v2253_v40 = vmax.f32 %v2151_v62, 0.0  ;;  %v2154_v3 = vadd.f32 %v3816_v37, %v2153_v4  ;;  %v2657_v50 = vpop.f32.mrb[8].mxu1 }
 0x326   : > { %v2294_v16 = vmul.f32 %v3824_v44, %v2255_v2  ;;  %v2256_v35 = vmax.f32 %v2162_v1, 0.0  ;;  %v2223_v5 = vadd.f32 %v2657_v50, %v3816_v37  ;;  %v2214_v29 = vpop.f32.mrb[9].mxu1 }
 0x327   : > { %v2292_v43 = vmul.f32 %v3824_v44, %v2253_v40  ;;  %v2254_v63 = vmax.f32 %v2154_v3, 0.0  ;;  %v2215_v49 = vadd.f32 %v3816_v37, %v2214_v29  ;;  %v2658_v15 = vpop.f32.mrb[10].mxu1 }
 0x328   : > { %v2333_v24 = vadd.f32 %v3832_v11, %v2294_v16  ;;  %v2295_v47 = vmul.f32 %v3824_v44, %v2256_v35  ;;  %v2271_v25 = vmax.f32 %v2223_v5, 0.0  ;;  %v2226_v22 = vadd.f32 %v2658_v15, %v3816_v37  ;;  %v2217_v56 = vpop.f32.mrb[11].mxu1 }
 0x329   : > { %v2331_v27 = vadd.f32 %v3832_v11, %v2292_v43  ;;  %v2293_v30 = vmul.f32 %v3824_v44, %v2254_v63  ;;  %v2269_v34 = vmax.f32 %v2215_v49, 0.0  ;;  %v2218_v14 = vadd.f32 %v3816_v37, %v2217_v56 }
 0x32a   : > { %2366 = vst.msk [vmem:[#allocation4 + $0x50] sm:$0xff] %vm2355_vm12, %v2333_v24  ;;  %v2334_v13 = vadd.f32 %v3832_v11, %v2295_v47  ;;  %v2310_v23 = vmul.f32 %v3824_v44, %v2271_v25  ;;  %v2272_v39 = vmax.f32 %v2226_v22, 0.0 }
 0x32b   : > { %2364 = vst.msk [vmem:[#allocation4 + $0x40] sm:$0xff] %vm2355_vm12, %v2331_v27  ;;  %v2332_v32 = vadd.f32 %v3832_v11, %v2293_v30  ;;  %v2308_v21 = vmul.f32 %v3824_v44, %v2269_v34  ;;  %v2270_v18 = vmax.f32 %v2218_v14, 0.0 }
 0x32c   : > { %2367 = vst.msk [vmem:[#allocation4 + $0x58] sm:$0xff] %vm2355_vm12, %v2334_v13  ;;  %v2349_v42 = vadd.f32 %v3832_v11, %v2310_v23  ;;  %v2311_v28 = vmul.f32 %v3824_v44, %v2272_v39 }
 0x32d   : > { %2365 = vst.msk [vmem:[#allocation4 + $0x48] sm:$0xff] %vm2355_vm12, %v2332_v32  ;;  %v2347_v38 = vadd.f32 %v3832_v11, %v2308_v21  ;;  %v2309_v45 = vmul.f32 %v3824_v44, %v2270_v18 }
 0x32e   : > { %2382 = vst.msk [vmem:[#allocation4 + $0xd0] sm:$0xff] %vm2355_vm12, %v2349_v42  ;;  %v2350_v53 = vadd.f32 %v3832_v11, %v2311_v28 }
 0x32f   : > { %2380 = vst.msk [vmem:[#allocation4 + $0xc0] sm:$0xff] %vm2355_vm12, %v2347_v38  ;;  %v2348_v20 = vadd.f32 %v3832_v11, %v2309_v45 }
 0x330   : > { %2383 = vst.msk [vmem:[#allocation4 + $0xd8] sm:$0xff] %vm2355_vm12, %v2350_v53 }
 0x331   : > { %2381 = vst.msk [vmem:[#allocation4 + $0xc8] sm:$0xff] %vm2355_vm12, %v2348_v20 }
 0x333   : > { %v2398_v48 = vld [vmem:[#allocation4 + $0x50] ss:$2 sm:$0xff]  ;;  %v2430_v57 = vld [vmem:[#allocation4 + $0x51] ss:$2 sm:$0xff] }
 0x334   : > { %v2456_v33 = vmax.f32 %v2398_v48, %v2430_v57  ;;  %v2396_v41 = vld [vmem:[#allocation4 + $0x40] ss:$2 sm:$0xff]  ;;  %v2428_v58 = vld [vmem:[#allocation4 + $0x41] ss:$2 sm:$0xff] }
 0x335   : > { %v2455_v59 = vmax.f32 %v2396_v41, %v2428_v58 }
 0x336   : > { %2472 = vst.msk [vmem:[#allocation5 + $0x28] sm:$0xff] %vm2355_vm12, %v2456_v33 }
 0x337   : > { %2471 = vst.msk [vmem:[#allocation5 + $0x20] sm:$0xff] %vm2355_vm12, %v2455_v59  ;;  %v2414_v12 = vld [vmem:[#allocation4 + $0xd0] ss:$2 sm:$0xff]  ;;  %v2446_v19 = vld [vmem:[#allocation4 + $0xd1] ss:$2 sm:$0xff] }
 0x338   : > { %v2464_v36 = vmax.f32 %v2414_v12, %v2446_v19  ;;  %v2412_v61 = vld [vmem:[#allocation4 + $0xc0] ss:$2 sm:$0xff]  ;;  %v2444_v46 = vld [vmem:[#allocation4 + $0xc1] ss:$2 sm:$0xff] }
 0x339   : > { %v2463_v60 = vmax.f32 %v2412_v61, %v2444_v46 }
 0x33a   : > { %2480 = vst.msk [vmem:[#allocation5 + $0x68] sm:$0xff] %vm2355_vm12, %v2464_v36 }
 0x33b   : > { %2479 = vst.msk [vmem:[#allocation5 + $0x60] sm:$0xff] %vm2355_vm12, %v2463_v60 }
 0x33d   : > { %v2494_v51 = vld [vmem:[#allocation5 + $0x28] sm:$0xff] }
 0x33e   : > { %v2485_v0 = vld [vmem:[#allocation5 + $0x20] sm:$0xff] }
 0x33f   : > { %v2502_v6 = vmax.f32 %v2485_v0, %v2494_v51 }
 0x341   : > { %2510 = vst.msk [vmem:[%s3883_s25 + $0x10] sm:$0xff] %vm2355_vm12, %v2502_v6  ;;  %v2498_v52 = vld [vmem:[#allocation5 + $0x68] sm:$0xff] }
 0x342   : > { %v2489_v54 = vld [vmem:[#allocation5 + $0x60] sm:$0xff] }
 0x343   : > { %v2506_v7 = vmax.f32 %v2489_v54, %v2498_v52 }
 0x345   : > { %2514 = vst.msk [vmem:[%s3883_s25 + $0x30] sm:$0xff] %vm2355_vm12, %v2506_v7 }
 0x379   : > { %v2645_v8 = vpop.f32.mrb[12].mxu0 }
 0x37a   : > { %v2175_v55 = vadd.f32 %v2645_v8, %v3816_v37  ;;  %v2166_v26 = vpop.f32.mrb[13].mxu0 }
 0x37b   : > { %v2167_v9 = vadd.f32 %v3816_v37, %v2166_v26  ;;  %v2646_v10 = vpop.f32.mrb[14].mxu0 }
 0x37c   : > { %v2259_v31 = vmax.f32 %v2175_v55, 0.0  ;;  %v2178_v62 = vadd.f32 %v2646_v10, %v3816_v37  ;;  %v2169_v17 = vpop.f32.mrb[15].mxu0 }
 0x37d   : > { %v2257_v2 = vmax.f32 %v2167_v9, 0.0  ;;  %v2170_v1 = vadd.f32 %v3816_v37, %v2169_v17  ;;  %v2661_v4 = vpop.f32.mrb[12].mxu1 }
 0x37e   : > { %v2298_v40 = vmul.f32 %v3824_v44, %v2259_v31  ;;  %v2260_v3 = vmax.f32 %v2178_v62, 0.0  ;;  %v2239_v50 = vadd.f32 %v2661_v4, %v3816_v37  ;;  %v2230_v16 = vpop.f32.mrb[13].mxu1 }
 0x37f   : > { %v2296_v35 = vmul.f32 %v3824_v44, %v2257_v2  ;;  %v2258_v5 = vmax.f32 %v2170_v1, 0.0  ;;  %v2231_v29 = vadd.f32 %v3816_v37, %v2230_v16  ;;  %v2662_v43 = vpop.f32.mrb[14].mxu1 }
 0x380   : > { %v2337_v63 = vadd.f32 %v3832_v11, %v2298_v40  ;;  %v2299_v49 = vmul.f32 %v3824_v44, %v2260_v3  ;;  %v2275_v15 = vmax.f32 %v2239_v50, 0.0  ;;  %v2242_v24 = vadd.f32 %v2662_v43, %v3816_v37  ;;  %v2233_v47 = vpop.f32.mrb[15].mxu1 }
 0x381   : > { %v2335_v25 = vadd.f32 %v3832_v11, %v2296_v35  ;;  %v2297_v22 = vmul.f32 %v3824_v44, %v2258_v5  ;;  %v2273_v56 = vmax.f32 %v2231_v29, 0.0  ;;  %v2234_v27 = vadd.f32 %v3816_v37, %v2233_v47 }
 0x382   : > { %2370 = vst.msk [vmem:[#allocation4 + $0x70] sm:$0xff] %vm2355_vm12, %v2337_v63  ;;  %v2338_v30 = vadd.f32 %v3832_v11, %v2299_v49  ;;  %v2314_v34 = vmul.f32 %v3824_v44, %v2275_v15  ;;  %v2276_v14 = vmax.f32 %v2242_v24, 0.0 }
 0x383   : > { %2368 = vst.msk [vmem:[#allocation4 + $0x60] sm:$0xff] %vm2355_vm12, %v2335_v25  ;;  %v2336_v13 = vadd.f32 %v3832_v11, %v2297_v22  ;;  %v2312_v23 = vmul.f32 %v3824_v44, %v2273_v56  ;;  %v2274_v39 = vmax.f32 %v2234_v27, 0.0 }
 0x384   : > { %2371 = vst.msk [vmem:[#allocation4 + $0x78] sm:$0xff] %vm2355_vm12, %v2338_v30  ;;  %v2353_v32 = vadd.f32 %v3832_v11, %v2314_v34  ;;  %v2315_v37 = vmul.f32 %v3824_v44, %v2276_v14 }
 0x385   : > { %2369 = vst.msk [vmem:[#allocation4 + $0x68] sm:$0xff] %vm2355_vm12, %v2336_v13  ;;  %v2351_v21 = vadd.f32 %v3832_v11, %v2312_v23  ;;  %v2313_v18 = vmul.f32 %v3824_v44, %v2274_v39 }
 0x386   : > { %2386 = vst.msk [vmem:[#allocation4 + $0xf0] sm:$0xff] %vm2355_vm12, %v2353_v32  ;;  %v2354_v42 = vadd.f32 %v3832_v11, %v2315_v37 }
 0x387   : > { %2384 = vst.msk [vmem:[#allocation4 + $0xe0] sm:$0xff] %vm2355_vm12, %v2351_v21  ;;  %v2352_v28 = vadd.f32 %v3832_v11, %v2313_v18 }
 0x388   : > { %2387 = vst.msk [vmem:[#allocation4 + $0xf8] sm:$0xff] %vm2355_vm12, %v2354_v42 }
 0x389   : > { %2385 = vst.msk [vmem:[#allocation4 + $0xe8] sm:$0xff] %vm2355_vm12, %v2352_v28 }
 0x38b   : > { %v2402_v38 = vld [vmem:[#allocation4 + $0x70] ss:$2 sm:$0xff]  ;;  %v2434_v45 = vld [vmem:[#allocation4 + $0x71] ss:$2 sm:$0xff] }
 0x38c   : > { %v2458_v53 = vmax.f32 %v2402_v38, %v2434_v45  ;;  %v2400_v20 = vld [vmem:[#allocation4 + $0x60] ss:$2 sm:$0xff]  ;;  %v2432_v48 = vld [vmem:[#allocation4 + $0x61] ss:$2 sm:$0xff] }
 0x38d   : > { %v2457_v57 = vmax.f32 %v2400_v20, %v2432_v48 }
 0x38e   : > { %2474 = vst.msk [vmem:[#allocation5 + $0x38] sm:$0xff] %vm2355_vm12, %v2458_v53 }
 0x38f   : > { %2473 = vst.msk [vmem:[#allocation5 + $0x30] sm:$0xff] %vm2355_vm12, %v2457_v57  ;;  %v2418_v44 = vld [vmem:[#allocation4 + $0xf0] ss:$2 sm:$0xff]  ;;  %v2450_v33 = vld [vmem:[#allocation4 + $0xf1] ss:$2 sm:$0xff] }
 0x390   : > { %v2466_v41 = vmax.f32 %v2418_v44, %v2450_v33  ;;  %v2416_v11 = vld [vmem:[#allocation4 + $0xe0] ss:$2 sm:$0xff]  ;;  %v2448_v58 = vld [vmem:[#allocation4 + $0xe1] ss:$2 sm:$0xff] }
 0x391   : > { %v2465_v59 = vmax.f32 %v2416_v11, %v2448_v58 }
 0x392   : > { %2482 = vst.msk [vmem:[#allocation5 + $0x78] sm:$0xff] %vm2355_vm12, %v2466_v41 }
 0x393   : > { %2481 = vst.msk [vmem:[#allocation5 + $0x70] sm:$0xff] %vm2355_vm12, %v2465_v59 }
 0x395   : > { %v2495_v12 = vld [vmem:[#allocation5 + $0x38] sm:$0xff] }
 0x396   : > { %v2486_v19 = vld [vmem:[#allocation5 + $0x30] sm:$0xff] }
 0x397   : > { %v2503_v36 = vmax.f32 %v2486_v19, %v2495_v12 }
 0x399   : > { %2511 = vst.msk [vmem:[%s3883_s25 + $0x18] sm:$0xff] %vm2355_vm12, %v2503_v36  ;;  %v2499_v61 = vld [vmem:[#allocation5 + $0x78] sm:$0xff] }
 0x39a   : > { %v2490_v46 = vld [vmem:[#allocation5 + $0x70] sm:$0xff] }
 0x39b   : > { %v2507_v60 = vmax.f32 %v2490_v46, %v2499_v61 }
 0x39d   : > { %2515 = vst.msk [vmem:[%s3883_s25 + $0x38] sm:$0xff] %vm2355_vm12, %v2507_v60 }
 0x39e PF: > { %s15_s18 = sadd.s32 1, %s2697_s18  }
 0x39f   : > { %p12_p4 = scmp.ge.s32.totalorder %s15_s18, 4  }
 0x3a1   :  { %14 = sbr.rel (!%p12_p4) target bundleno = 1 (0x1), region = 104 }

</bundles_post_ra>
